<compile_context>
chip_gen: v6e
topology: v6e:2x2x1
jax: 0.10.0
libtpu: 0.0.40
codegen_flags: <defaults>
</compile_context>

<pallas_src>
import numpy as np
import jax
import jax.numpy as jnp
from jax import lax
from jax.experimental import pallas as pl
from jax.experimental.pallas import tpu as pltpu

CHANNELS = [3, 12, 24, 36, 48, 36, 24, 12, 4]
BN_EPS = 1e-5
N_LAYERS = 8


def _spatial_sizes(h0):
    sizes = [h0]
    for _ in range(N_LAYERS):
        sizes.append((sizes[-1] + 2) // 2)   # conv(+2) then floor-pool(/2)
    return sizes


def _round_up(x, m):
    return ((x + m - 1) // m) * m


def _pick_batch_tile(n):
    # Sublane-aligned batch tile (>=8 rows per h index); capped at 32 so a
    # single tile's live activations stay tiny while M = hc*nb reaches >=128
    # on the expensive early layers for large batches.
    return int(min(32, _round_up(max(n, 1), 8)))


# ----------------------------- Pallas kernel -------------------------------

def _make_kernel(nb, hin_list):
    hcs = [h + 2 for h in hin_list]

    def kernel(*refs):
        x_ref = refs[0]
        t_refs = refs[1:1 + N_LAYERS]                       # (3, K_l, hc*cout) bf16
        b_refs = refs[1 + N_LAYERS:1 + 2 * N_LAYERS]        # (1, hc*cout) f32
        r_refs = refs[1 + 2 * N_LAYERS:1 + 3 * N_LAYERS]    # row-selection bf16/f32
        c_last_ref = refs[1 + 3 * N_LAYERS]                 # last-layer lane select
        out_ref = refs[2 + 3 * N_LAYERS]

        act = x_ref[...]                                    # ((H0+4)*nb, K0) f32
        for l in range(N_LAYERS):
            cout = CHANNELS[l + 1]
            hc = hcs[l]

            # Conv: 3 block-Toeplitz matmuls (one per kernel row), bf16 MXU
            # operands, f32 accumulation.  BN scale (and the previous layer's
            # even-w lane selection) are folded into t_refs offline.
            a = act.astype(jnp.bfloat16)
            acc = jnp.dot(a[0:hc * nb, :], t_refs[l][0],
                          preferred_element_type=jnp.float32)
            for kh in (1, 2):
                acc = acc + jnp.dot(a[kh * nb:(kh + hc) * nb, :], t_refs[l][kh],
                                    preferred_element_type=jnp.float32)

            # Folded conv-bias/BN bias + ReLU, then 2x2 max-pool as two shifted
            # elementwise maxes (H via 8-aligned row slices, W via lane slices).
            y = jnp.maximum(acc + b_refs[l][...], 0.0)
            y = jnp.maximum(y[0:(hc - 1) * nb, :], y[nb:hc * nb, :])
            z = jnp.maximum(y[:, 0:(hc - 1) * cout], y[:, cout:hc * cout])

            if l < N_LAYERS - 1:
                # Exact 0/1 row selection of the even-h pooled rows; also emits
                # the zero H-padding ring for the next layer's conv.  bf16
                # operands (exact) -> f32.  The even-w lane selection was folded
                # into the next layer's Toeplitz weights.
                act = jnp.dot(r_refs[l][...], z.astype(jnp.bfloat16),
                              preferred_element_type=jnp.float32)
            else:
                # Final layer: tiny f32 selections for exact-precision output.
                zc = jnp.dot(z, c_last_ref[...],
                             preferred_element_type=jnp.float32)
                out_ref[...] = jnp.dot(r_refs[l][...], zc,
                                       preferred_element_type=jnp.float32)

    return kernel


def _const_spec(shape):
    rank = len(shape)
    # Constant block index across the batch-tile grid axis => stays resident.
    return pl.BlockSpec(shape, lambda i, _r=rank: (0,) * _r)


def cnn_forward(x_nchw, consts, hin_list):
    nb, ts, bs, rs, c_last = consts
    n, c0, h, w = x_nchw.shape
    n_pad = _round_up(n, nb)
    ntiles = n_pad // nb
    k0 = _round_up((w + 4) * c0, 128)

    # NCHW -> tiled "(tile, h, b) x (w, c)" layout; zero-pad the conv halo (+2)
    # and the lanes up to a 128 multiple (lane-dense input DMA).
    xp = jnp.pad(x_nchw.astype(jnp.float32),
                 ((0, n_pad - n), (0, 0), (2, 2), (2, 2)))
    xk = jnp.transpose(xp.reshape(ntiles, nb, c0, h + 4, w + 4),
                       (0, 3, 1, 4, 2)).reshape(ntiles * (h + 4) * nb,
                                                (w + 4) * c0)
    xk = jnp.pad(xk, ((0, 0), (0, k0 - (w + 4) * c0)))

    hp_last = (hin_list[-1] + 2) // 2
    c_out = CHANNELS[-1]
    rows_tile = (h + 4) * nb
    out_rows_tile = hp_last * nb
    out_shape = (ntiles * out_rows_tile, hp_last * c_out)

    consts_in = list(ts) + list(bs) + list(rs) + [c_last]
    in_specs = ([pl.BlockSpec((rows_tile, k0), lambda i: (i, 0))]
                + [_const_spec(a.shape) for a in consts_in])

    out2d = pl.pallas_call(
        _make_kernel(nb, hin_list),
        grid=(ntiles,),
        in_specs=in_specs,
        out_specs=pl.BlockSpec((out_rows_tile, hp_last * c_out),
                               lambda i: (i, 0)),
        out_shape=jax.ShapeDtypeStruct(out_shape, jnp.float32),
        compiler_params=pltpu.CompilerParams(
            dimension_semantics=("parallel",)),
    )(xk, *consts_in)

    # (tile, hp, b, wp, c) -> NCHW flatten, matching torch's x.view(in_size,-1)
    out = out2d.reshape(ntiles, hp_last, nb, hp_last, c_out)
    out = jnp.transpose(out, (0, 2, 4, 1, 3)).reshape(n_pad, -1)
    return out[:n]


# --------------------------- parameter building ----------------------------

def init_layer_params(key, cin, cout):
    k = jax.random.split(key, 6)
    w = jax.random.normal(k[0], (cout, cin, 3, 3), jnp.float32) / (3.0 * float(cin) ** 0.5)
    conv_b = 0.1 * jax.random.normal(k[1], (cout,), jnp.float32)
    gamma = 1.0 + 0.1 * jax.random.normal(k[2], (cout,), jnp.float32)
    beta = 0.1 * jax.random.normal(k[3], (cout,), jnp.float32)
    mean = 0.1 * jax.random.normal(k[4], (cout,), jnp.float32)
    var = 1.0 + 0.1 * jax.random.uniform(k[5], (cout,), jnp.float32)
    return {"w": np.asarray(w), "b": np.asarray(conv_b), "gamma": np.asarray(gamma),
            "beta": np.asarray(beta), "mean": np.asarray(mean), "var": np.asarray(var)}


def build_consts(raw_params, hin_list, nb):
    ts, bs, rs = [], [], []
    c_last = None
    prev_c = None
    for l in range(N_LAYERS):
        cin, cout = CHANNELS[l], CHANNELS[l + 1]
        hin = hin_list[l]
        hc = hin + 2
        hp = hc // 2
        wpad = hin + 4
        p = raw_params[l]
        scale = p["gamma"] / np.sqrt(p["var"] + BN_EPS)
        bias = (p["b"] - p["mean"]) * scale + p["beta"]

        # Block-Toeplitz conv weights (one per kernel row kh), BN scale folded:
        # T[kh, w_in*Cin + c, w_out*Cout + d] = scale[d] * W[d, c, kh, w_in - w_out]
        t = np.zeros((3, wpad * cin, hc * cout), np.float32)
        for kh in range(3):
            wk = p["w"][:, :, kh, :] * scale[:, None, None]        # (cout, cin, 3)
            for w_out in range(hc):
                for kw in range(3):
                    w_in = w_out + kw
                    t[kh, w_in * cin:(w_in + 1) * cin,
                      w_out * cout:(w_out + 1) * cout] = wk[:, :, kw].T

        if l == 0:
            # Lane-pad the (W+4)*Cin input columns up to a 128 multiple (zeros).
            k0 = _round_up(wpad * cin, 128)
            tf = np.zeros((3, k0, hc * cout), np.float32)
            tf[:, :wpad * cin, :] = t
        else:
            # Fold the previous layer's even-w lane-selection matrix into this
            # layer's weights:  ((R z) C) @ T == (R z) @ (C @ T), exactly.
            tf = np.stack([prev_c @ t[kh] for kh in range(3)])

        ts.append(jnp.asarray(tf, jnp.bfloat16))
        bs.append(jnp.asarray(np.tile(bias, hc)[None, :], jnp.float32))

        is_last = l == N_LAYERS - 1
        pad = 0 if is_last else 2
        # Row selection: picks rows 2*i of the H-paired maxes and emits the
        # zero H-padding rows needed by the next layer's conv (exact 0/1).
        r = np.zeros(((hp + 2 * pad) * nb, (hc - 1) * nb), np.float32)
        for i in range(hp):
            for b in range(nb):
                r[(i + pad) * nb + b, (2 * i) * nb + b] = 1.0
        rs.append(jnp.asarray(r, jnp.float32 if is_last else jnp.bfloat16))

        # Lane selection: picks lanes 2*i of the W-paired maxes (+ W padding).
        c = np.zeros(((hc - 1) * cout, (hp + 2 * pad) * cout), np.float32)
        for i in range(hp):
            for d in range(cout):
                c[(2 * i) * cout + d, (i + pad) * cout + d] = 1.0
        if is_last:
            c_last = jnp.asarray(c, jnp.float32)
        else:
            prev_c = c

    return nb, ts, bs, rs, c_last


# ------------------------------ XLA reference -------------------------------

def reference_forward(x_nchw, raw_params):
    out = x_nchw.astype(jnp.float32)
    for p in raw_params:
        out = lax.conv_general_dilated(
            out, jnp.asarray(p["w"]), window_strides=(1, 1),
            padding=[(2, 2), (2, 2)],
            dimension_numbers=("NCHW", "OIHW", "NCHW"))
        out = out + jnp.asarray(p["b"])[None, :, None, None]
        scale = jnp.asarray(p["gamma"]) / jnp.sqrt(jnp.asarray(p["var"]) + BN_EPS)
        out = ((out - jnp.asarray(p["mean"])[None, :, None, None])
               * scale[None, :, None, None]
               + jnp.asarray(p["beta"])[None, :, None, None])
        out = jnp.maximum(out, 0.0)
        out = lax.reduce_window(out, -jnp.inf, lax.max,
                                (1, 1, 2, 2), (1, 1, 2, 2), "VALID")
    return out.reshape(out.shape[0], -1)


# ---------------------------------- main ------------------------------------

if __name__ == "__main__":
    key = jax.random.PRNGKey(0)
    kx, kp = jax.random.split(key)

    batch, h0 = 2, 16
    x = jax.random.normal(kx, (batch, CHANNELS[0], h0, h0), jnp.float32)

    hin_list = _spatial_sizes(h0)[:N_LAYERS]   # [16, 9, 5, 3, 2, 2, 2, 2]

    layer_keys = jax.random.split(kp, N_LAYERS)
    raw_params = [init_layer_params(layer_keys[i], CHANNELS[i], CHANNELS[i + 1])
                  for i in range(N_LAYERS)]

    nb = _pick_batch_tile(batch)               # 8 (sublane-aligned batch tile)
    consts = build_consts(raw_params, hin_list, nb)

    fwd = jax.jit(lambda inp: cnn_forward(inp, consts, hin_list))
    out = jax.block_until_ready(fwd(x))

    # 16 -> 9 -> 5 -> 3 -> 2 -> 2 -> 2 -> 2 -> 2 spatial, 4 channels => (2, 16)
    assert out.shape == (batch, 16), out.shape
    assert bool(jnp.all(jnp.isfinite(out)))

    ref = jax.block_until_ready(reference_forward(x, raw_params))
    max_err = float(jnp.max(jnp.abs(out - ref)))
    # Loose tolerance: conv matmuls use bf16 MXU operands vs the f32 reference.
    assert max_err < 0.1 + 0.1 * float(jnp.max(jnp.abs(ref))), max_err

    print("KERNEL_OK")
</pallas_src>

<mosaic_0001>
module attributes {stable_mosaic.version = 11 : i64} {
  func.func @kernel(%arg0: i32, %arg1: memref<160x128xf32, #tpu.memory_space<vmem>>, %arg2: memref<3x128x216xbf16, #tpu.memory_space<vmem>>, %arg3: memref<3x204x264xbf16, #tpu.memory_space<vmem>>, %arg4: memref<3x240x252xbf16, #tpu.memory_space<vmem>>, %arg5: memref<3x216x240xbf16, #tpu.memory_space<vmem>>, %arg6: memref<3x192x144xbf16, #tpu.memory_space<vmem>>, %arg7: memref<3x108x96xbf16, #tpu.memory_space<vmem>>, %arg8: memref<3x72x48xbf16, #tpu.memory_space<vmem>>, %arg9: memref<3x36x16xbf16, #tpu.memory_space<vmem>>, %arg10: memref<1x216xf32, #tpu.memory_space<vmem>>, %arg11: memref<1x264xf32, #tpu.memory_space<vmem>>, %arg12: memref<1x252xf32, #tpu.memory_space<vmem>>, %arg13: memref<1x240xf32, #tpu.memory_space<vmem>>, %arg14: memref<1x144xf32, #tpu.memory_space<vmem>>, %arg15: memref<1x96xf32, #tpu.memory_space<vmem>>, %arg16: memref<1x48xf32, #tpu.memory_space<vmem>>, %arg17: memref<1x16xf32, #tpu.memory_space<vmem>>, %arg18: memref<104x136xbf16, #tpu.memory_space<vmem>>, %arg19: memref<72x80xbf16, #tpu.memory_space<vmem>>, %arg20: memref<56x48xbf16, #tpu.memory_space<vmem>>, %arg21: memref<48x32xbf16, #tpu.memory_space<vmem>>, %arg22: memref<48x24xbf16, #tpu.memory_space<vmem>>, %arg23: memref<48x24xbf16, #tpu.memory_space<vmem>>, %arg24: memref<48x24xbf16, #tpu.memory_space<vmem>>, %arg25: memref<16x24xf32, #tpu.memory_space<vmem>>, %arg26: memref<12x8xf32, #tpu.memory_space<vmem>>, %arg27: memref<16x8xf32, #tpu.memory_space<vmem>>) attributes {dimension_semantics = [#tpu.dimension_semantics<parallel>], iteration_bounds = array<i64: 1>, scalar_prefetch = 0 : i64, scratch_operands = 0 : i64, tpu.core_type = #tpu.core_type<tc>, window_params = [{transform_indices = @transform_0, window_bounds = array<i64: 160, 128>}, {pipeline_mode = #tpu.pipeline_mode<synchronous>, transform_indices = @transform_1, window_bounds = array<i64: 3, 128, 216>}, {pipeline_mode = #tpu.pipeline_mode<synchronous>, transform_indices = @transform_2, window_bounds = array<i64: 3, 204, 264>}, {pipeline_mode = #tpu.pipeline_mode<synchronous>, transform_indices = @transform_3, window_bounds = array<i64: 3, 240, 252>}, {pipeline_mode = #tpu.pipeline_mode<synchronous>, transform_indices = @transform_4, window_bounds = array<i64: 3, 216, 240>}, {pipeline_mode = #tpu.pipeline_mode<synchronous>, transform_indices = @transform_5, window_bounds = array<i64: 3, 192, 144>}, {pipeline_mode = #tpu.pipeline_mode<synchronous>, transform_indices = @transform_6, window_bounds = array<i64: 3, 108, 96>}, {pipeline_mode = #tpu.pipeline_mode<synchronous>, transform_indices = @transform_7, window_bounds = array<i64: 3, 72, 48>}, {pipeline_mode = #tpu.pipeline_mode<synchronous>, transform_indices = @transform_8, window_bounds = array<i64: 3, 36, 16>}, {pipeline_mode = #tpu.pipeline_mode<synchronous>, transform_indices = @transform_9, window_bounds = array<i64: 1, 216>}, {pipeline_mode = #tpu.pipeline_mode<synchronous>, transform_indices = @transform_10, window_bounds = array<i64: 1, 264>}, {pipeline_mode = #tpu.pipeline_mode<synchronous>, transform_indices = @transform_11, window_bounds = array<i64: 1, 252>}, {pipeline_mode = #tpu.pipeline_mode<synchronous>, transform_indices = @transform_12, window_bounds = array<i64: 1, 240>}, {pipeline_mode = #tpu.pipeline_mode<synchronous>, transform_indices = @transform_13, window_bounds = array<i64: 1, 144>}, {pipeline_mode = #tpu.pipeline_mode<synchronous>, transform_indices = @transform_14, window_bounds = array<i64: 1, 96>}, {pipeline_mode = #tpu.pipeline_mode<synchronous>, transform_indices = @transform_15, window_bounds = array<i64: 1, 48>}, {pipeline_mode = #tpu.pipeline_mode<synchronous>, transform_indices = @transform_16, window_bounds = array<i64: 1, 16>}, {pipeline_mode = #tpu.pipeline_mode<synchronous>, transform_indices = @transform_17, window_bounds = array<i64: 104, 136>}, {pipeline_mode = #tpu.pipeline_mode<synchronous>, transform_indices = @transform_18, window_bounds = array<i64: 72, 80>}, {pipeline_mode = #tpu.pipeline_mode<synchronous>, transform_indices = @transform_19, window_bounds = array<i64: 56, 48>}, {pipeline_mode = #tpu.pipeline_mode<synchronous>, transform_indices = @transform_20, window_bounds = array<i64: 48, 32>}, {pipeline_mode = #tpu.pipeline_mode<synchronous>, transform_indices = @transform_21, window_bounds = array<i64: 48, 24>}, {pipeline_mode = #tpu.pipeline_mode<synchronous>, transform_indices = @transform_22, window_bounds = array<i64: 48, 24>}, {pipeline_mode = #tpu.pipeline_mode<synchronous>, transform_indices = @transform_23, window_bounds = array<i64: 48, 24>}, {pipeline_mode = #tpu.pipeline_mode<synchronous>, transform_indices = @transform_24, window_bounds = array<i64: 16, 24>}, {pipeline_mode = #tpu.pipeline_mode<synchronous>, transform_indices = @transform_25, window_bounds = array<i64: 12, 8>}, {transform_indices = @transform_26, window_bounds = array<i64: 16, 8>}]} {
    %c0 = arith.constant 0 : index
    %c0_0 = arith.constant 0 : index
    %0 = vector.load %arg1[%c0, %c0_0] : memref<160x128xf32, #tpu.memory_space<vmem>>, vector<160x128xf32>
    %1 = arith.truncf %0 : vector<160x128xf32> to vector<160x128xbf16>
    %2 = vector.extract_strided_slice %1 {offsets = [0, 0], sizes = [144, 128], strides = [1, 1]} : vector<160x128xbf16> to vector<144x128xbf16>
    %c0_1 = arith.constant 0 : index
    %c0_2 = arith.constant 0 : index
    %c0_3 = arith.constant 0 : index
    %3 = vector.load %arg2[%c0_1, %c0_2, %c0_3] : memref<3x128x216xbf16, #tpu.memory_space<vmem>>, vector<1x128x216xbf16>
    %4 = vector.shape_cast %3 : vector<1x128x216xbf16> to vector<128x216xbf16>
    %cst = arith.constant dense<0.000000e+00> : vector<144x216xf32>
    %5 = tpu.matmul %2, %4, %cst {dimension_numbers = #tpu.dot_dimension_numbers<[1], [0], [0], [1], [0, 0, 1, 1], [], []>} : vector<144x128xbf16>, vector<128x216xbf16>, vector<144x216xf32> -> vector<144x216xf32>
    %6 = vector.extract_strided_slice %1 {offsets = [8, 0], sizes = [144, 128], strides = [1, 1]} : vector<160x128xbf16> to vector<144x128xbf16>
    %c1 = arith.constant 1 : index
    %c0_4 = arith.constant 0 : index
    %c0_5 = arith.constant 0 : index
    %7 = vector.load %arg2[%c1, %c0_4, %c0_5] : memref<3x128x216xbf16, #tpu.memory_space<vmem>>, vector<1x128x216xbf16>
    %8 = vector.shape_cast %7 : vector<1x128x216xbf16> to vector<128x216xbf16>
    %cst_6 = arith.constant dense<0.000000e+00> : vector<144x216xf32>
    %9 = tpu.matmul %6, %8, %cst_6 {dimension_numbers = #tpu.dot_dimension_numbers<[1], [0], [0], [1], [0, 0, 1, 1], [], []>} : vector<144x128xbf16>, vector<128x216xbf16>, vector<144x216xf32> -> vector<144x216xf32>
    %10 = arith.addf %5, %9 : vector<144x216xf32>
    %11 = vector.extract_strided_slice %1 {offsets = [16, 0], sizes = [144, 128], strides = [1, 1]} : vector<160x128xbf16> to vector<144x128xbf16>
    %c2 = arith.constant 2 : index
    %c0_7 = arith.constant 0 : index
    %c0_8 = arith.constant 0 : index
    %12 = vector.load %arg2[%c2, %c0_7, %c0_8] : memref<3x128x216xbf16, #tpu.memory_space<vmem>>, vector<1x128x216xbf16>
    %13 = vector.shape_cast %12 : vector<1x128x216xbf16> to vector<128x216xbf16>
    %cst_9 = arith.constant dense<0.000000e+00> : vector<144x216xf32>
    %14 = tpu.matmul %11, %13, %cst_9 {dimension_numbers = #tpu.dot_dimension_numbers<[1], [0], [0], [1], [0, 0, 1, 1], [], []>} : vector<144x128xbf16>, vector<128x216xbf16>, vector<144x216xf32> -> vector<144x216xf32>
    %15 = arith.addf %10, %14 : vector<144x216xf32>
    %c0_10 = arith.constant 0 : index
    %c0_11 = arith.constant 0 : index
    %16 = vector.load %arg10[%c0_10, %c0_11] : memref<1x216xf32, #tpu.memory_space<vmem>>, vector<1x216xf32>
    %17 = vector.broadcast %16 : vector<1x216xf32> to vector<144x216xf32>
    %18 = arith.addf %15, %17 : vector<144x216xf32>
    %cst_12 = arith.constant 0.000000e+00 : f32
    %19 = vector.broadcast %cst_12 : f32 to vector<144x216xf32>
    %20 = arith.maximumf %18, %19 : vector<144x216xf32>
    %21 = vector.extract_strided_slice %20 {offsets = [0, 0], sizes = [136, 216], strides = [1, 1]} : vector<144x216xf32> to vector<136x216xf32>
    %22 = vector.extract_strided_slice %20 {offsets = [8, 0], sizes = [136, 216], strides = [1, 1]} : vector<144x216xf32> to vector<136x216xf32>
    %23 = arith.maximumf %21, %22 : vector<136x216xf32>
    %24 = vector.extract_strided_slice %23 {offsets = [0, 0], sizes = [136, 204], strides = [1, 1]} : vector<136x216xf32> to vector<136x204xf32>
    %25 = vector.extract_strided_slice %23 {offsets = [0, 12], sizes = [136, 204], strides = [1, 1]} : vector<136x216xf32> to vector<136x204xf32>
    %26 = arith.maximumf %24, %25 : vector<136x204xf32>
    %c0_13 = arith.constant 0 : index
    %c0_14 = arith.constant 0 : index
    %27 = vector.load %arg18[%c0_13, %c0_14] : memref<104x136xbf16, #tpu.memory_space<vmem>>, vector<104x136xbf16>
    %28 = arith.truncf %26 : vector<136x204xf32> to vector<136x204xbf16>
    %cst_15 = arith.constant dense<0.000000e+00> : vector<104x204xf32>
    %29 = tpu.matmul %27, %28, %cst_15 {dimension_numbers = #tpu.dot_dimension_numbers<[1], [0], [0], [1], [0, 0, 1, 1], [], []>} : vector<104x136xbf16>, vector<136x204xbf16>, vector<104x204xf32> -> vector<104x204xf32>
    %30 = arith.truncf %29 : vector<104x204xf32> to vector<104x204xbf16>
    %31 = vector.extract_strided_slice %30 {offsets = [0, 0], sizes = [88, 204], strides = [1, 1]} : vector<104x204xbf16> to vector<88x204xbf16>
    %c0_16 = arith.constant 0 : index
    %c0_17 = arith.constant 0 : index
    %c0_18 = arith.constant 0 : index
    %32 = vector.load %arg3[%c0_16, %c0_17, %c0_18] : memref<3x204x264xbf16, #tpu.memory_space<vmem>>, vector<1x204x264xbf16>
    %33 = vector.shape_cast %32 : vector<1x204x264xbf16> to vector<204x264xbf16>
    %cst_19 = arith.constant dense<0.000000e+00> : vector<88x264xf32>
    %34 = tpu.matmul %31, %33, %cst_19 {dimension_numbers = #tpu.dot_dimension_numbers<[1], [0], [0], [1], [0, 0, 1, 1], [], []>} : vector<88x204xbf16>, vector<204x264xbf16>, vector<88x264xf32> -> vector<88x264xf32>
    %35 = vector.extract_strided_slice %30 {offsets = [8, 0], sizes = [88, 204], strides = [1, 1]} : vector<104x204xbf16> to vector<88x204xbf16>
    %c1_20 = arith.constant 1 : index
    %c0_21 = arith.constant 0 : index
    %c0_22 = arith.constant 0 : index
    %36 = vector.load %arg3[%c1_20, %c0_21, %c0_22] : memref<3x204x264xbf16, #tpu.memory_space<vmem>>, vector<1x204x264xbf16>
    %37 = vector.shape_cast %36 : vector<1x204x264xbf16> to vector<204x264xbf16>
    %cst_23 = arith.constant dense<0.000000e+00> : vector<88x264xf32>
    %38 = tpu.matmul %35, %37, %cst_23 {dimension_numbers = #tpu.dot_dimension_numbers<[1], [0], [0], [1], [0, 0, 1, 1], [], []>} : vector<88x204xbf16>, vector<204x264xbf16>, vector<88x264xf32> -> vector<88x264xf32>
    %39 = arith.addf %34, %38 : vector<88x264xf32>
    %40 = vector.extract_strided_slice %30 {offsets = [16, 0], sizes = [88, 204], strides = [1, 1]} : vector<104x204xbf16> to vector<88x204xbf16>
    %c2_24 = arith.constant 2 : index
    %c0_25 = arith.constant 0 : index
    %c0_26 = arith.constant 0 : index
    %41 = vector.load %arg3[%c2_24, %c0_25, %c0_26] : memref<3x204x264xbf16, #tpu.memory_space<vmem>>, vector<1x204x264xbf16>
    %42 = vector.shape_cast %41 : vector<1x204x264xbf16> to vector<204x264xbf16>
    %cst_27 = arith.constant dense<0.000000e+00> : vector<88x264xf32>
    %43 = tpu.matmul %40, %42, %cst_27 {dimension_numbers = #tpu.dot_dimension_numbers<[1], [0], [0], [1], [0, 0, 1, 1], [], []>} : vector<88x204xbf16>, vector<204x264xbf16>, vector<88x264xf32> -> vector<88x264xf32>
    %44 = arith.addf %39, %43 : vector<88x264xf32>
    %c0_28 = arith.constant 0 : index
    %c0_29 = arith.constant 0 : index
    %45 = vector.load %arg11[%c0_28, %c0_29] : memref<1x264xf32, #tpu.memory_space<vmem>>, vector<1x264xf32>
    %46 = vector.broadcast %45 : vector<1x264xf32> to vector<88x264xf32>
    %47 = arith.addf %44, %46 : vector<88x264xf32>
    %cst_30 = arith.constant 0.000000e+00 : f32
    %48 = vector.broadcast %cst_30 : f32 to vector<88x264xf32>
    %49 = arith.maximumf %47, %48 : vector<88x264xf32>
    %50 = vector.extract_strided_slice %49 {offsets = [0, 0], sizes = [80, 264], strides = [1, 1]} : vector<88x264xf32> to vector<80x264xf32>
    %51 = vector.extract_strided_slice %49 {offsets = [8, 0], sizes = [80, 264], strides = [1, 1]} : vector<88x264xf32> to vector<80x264xf32>
    %52 = arith.maximumf %50, %51 : vector<80x264xf32>
    %53 = vector.extract_strided_slice %52 {offsets = [0, 0], sizes = [80, 240], strides = [1, 1]} : vector<80x264xf32> to vector<80x240xf32>
    %54 = vector.extract_strided_slice %52 {offsets = [0, 24], sizes = [80, 240], strides = [1, 1]} : vector<80x264xf32> to vector<80x240xf32>
    %55 = arith.maximumf %53, %54 : vector<80x240xf32>
    %c0_31 = arith.constant 0 : index
    %c0_32 = arith.constant 0 : index
    %56 = vector.load %arg19[%c0_31, %c0_32] : memref<72x80xbf16, #tpu.memory_space<vmem>>, vector<72x80xbf16>
    %57 = arith.truncf %55 : vector<80x240xf32> to vector<80x240xbf16>
    %cst_33 = arith.constant dense<0.000000e+00> : vector<72x240xf32>
    %58 = tpu.matmul %56, %57, %cst_33 {dimension_numbers = #tpu.dot_dimension_numbers<[1], [0], [0], [1], [0, 0, 1, 1], [], []>} : vector<72x80xbf16>, vector<80x240xbf16>, vector<72x240xf32> -> vector<72x240xf32>
    %59 = arith.truncf %58 : vector<72x240xf32> to vector<72x240xbf16>
    %60 = vector.extract_strided_slice %59 {offsets = [0, 0], sizes = [56, 240], strides = [1, 1]} : vector<72x240xbf16> to vector<56x240xbf16>
    %c0_34 = arith.constant 0 : index
    %c0_35 = arith.constant 0 : index
    %c0_36 = arith.constant 0 : index
    %61 = vector.load %arg4[%c0_34, %c0_35, %c0_36] : memref<3x240x252xbf16, #tpu.memory_space<vmem>>, vector<1x240x252xbf16>
    %62 = vector.shape_cast %61 : vector<1x240x252xbf16> to vector<240x252xbf16>
    %cst_37 = arith.constant dense<0.000000e+00> : vector<56x252xf32>
    %63 = tpu.matmul %60, %62, %cst_37 {dimension_numbers = #tpu.dot_dimension_numbers<[1], [0], [0], [1], [0, 0, 1, 1], [], []>} : vector<56x240xbf16>, vector<240x252xbf16>, vector<56x252xf32> -> vector<56x252xf32>
    %64 = vector.extract_strided_slice %59 {offsets = [8, 0], sizes = [56, 240], strides = [1, 1]} : vector<72x240xbf16> to vector<56x240xbf16>
    %c1_38 = arith.constant 1 : index
    %c0_39 = arith.constant 0 : index
    %c0_40 = arith.constant 0 : index
    %65 = vector.load %arg4[%c1_38, %c0_39, %c0_40] : memref<3x240x252xbf16, #tpu.memory_space<vmem>>, vector<1x240x252xbf16>
    %66 = vector.shape_cast %65 : vector<1x240x252xbf16> to vector<240x252xbf16>
    %cst_41 = arith.constant dense<0.000000e+00> : vector<56x252xf32>
    %67 = tpu.matmul %64, %66, %cst_41 {dimension_numbers = #tpu.dot_dimension_numbers<[1], [0], [0], [1], [0, 0, 1, 1], [], []>} : vector<56x240xbf16>, vector<240x252xbf16>, vector<56x252xf32> -> vector<56x252xf32>
    %68 = arith.addf %63, %67 : vector<56x252xf32>
    %69 = vector.extract_strided_slice %59 {offsets = [16, 0], sizes = [56, 240], strides = [1, 1]} : vector<72x240xbf16> to vector<56x240xbf16>
    %c2_42 = arith.constant 2 : index
    %c0_43 = arith.constant 0 : index
    %c0_44 = arith.constant 0 : index
    %70 = vector.load %arg4[%c2_42, %c0_43, %c0_44] : memref<3x240x252xbf16, #tpu.memory_space<vmem>>, vector<1x240x252xbf16>
    %71 = vector.shape_cast %70 : vector<1x240x252xbf16> to vector<240x252xbf16>
    %cst_45 = arith.constant dense<0.000000e+00> : vector<56x252xf32>
    %72 = tpu.matmul %69, %71, %cst_45 {dimension_numbers = #tpu.dot_dimension_numbers<[1], [0], [0], [1], [0, 0, 1, 1], [], []>} : vector<56x240xbf16>, vector<240x252xbf16>, vector<56x252xf32> -> vector<56x252xf32>
    %73 = arith.addf %68, %72 : vector<56x252xf32>
    %c0_46 = arith.constant 0 : index
    %c0_47 = arith.constant 0 : index
    %74 = vector.load %arg12[%c0_46, %c0_47] : memref<1x252xf32, #tpu.memory_space<vmem>>, vector<1x252xf32>
    %75 = vector.broadcast %74 : vector<1x252xf32> to vector<56x252xf32>
    %76 = arith.addf %73, %75 : vector<56x252xf32>
    %cst_48 = arith.constant 0.000000e+00 : f32
    %77 = vector.broadcast %cst_48 : f32 to vector<56x252xf32>
    %78 = arith.maximumf %76, %77 : vector<56x252xf32>
    %79 = vector.extract_strided_slice %78 {offsets = [0, 0], sizes = [48, 252], strides = [1, 1]} : vector<56x252xf32> to vector<48x252xf32>
    %80 = vector.extract_strided_slice %78 {offsets = [8, 0], sizes = [48, 252], strides = [1, 1]} : vector<56x252xf32> to vector<48x252xf32>
    %81 = arith.maximumf %79, %80 : vector<48x252xf32>
    %82 = vector.extract_strided_slice %81 {offsets = [0, 0], sizes = [48, 216], strides = [1, 1]} : vector<48x252xf32> to vector<48x216xf32>
    %83 = vector.extract_strided_slice %81 {offsets = [0, 36], sizes = [48, 216], strides = [1, 1]} : vector<48x252xf32> to vector<48x216xf32>
    %84 = arith.maximumf %82, %83 : vector<48x216xf32>
    %c0_49 = arith.constant 0 : index
    %c0_50 = arith.constant 0 : index
    %85 = vector.load %arg20[%c0_49, %c0_50] : memref<56x48xbf16, #tpu.memory_space<vmem>>, vector<56x48xbf16>
    %86 = arith.truncf %84 : vector<48x216xf32> to vector<48x216xbf16>
    %cst_51 = arith.constant dense<0.000000e+00> : vector<56x216xf32>
    %87 = tpu.matmul %85, %86, %cst_51 {dimension_numbers = #tpu.dot_dimension_numbers<[1], [0], [0], [1], [0, 0, 1, 1], [], []>} : vector<56x48xbf16>, vector<48x216xbf16>, vector<56x216xf32> -> vector<56x216xf32>
    %88 = arith.truncf %87 : vector<56x216xf32> to vector<56x216xbf16>
    %89 = vector.extract_strided_slice %88 {offsets = [0, 0], sizes = [40, 216], strides = [1, 1]} : vector<56x216xbf16> to vector<40x216xbf16>
    %c0_52 = arith.constant 0 : index
    %c0_53 = arith.constant 0 : index
    %c0_54 = arith.constant 0 : index
    %90 = vector.load %arg5[%c0_52, %c0_53, %c0_54] : memref<3x216x240xbf16, #tpu.memory_space<vmem>>, vector<1x216x240xbf16>
    %91 = vector.shape_cast %90 : vector<1x216x240xbf16> to vector<216x240xbf16>
    %cst_55 = arith.constant dense<0.000000e+00> : vector<40x240xf32>
    %92 = tpu.matmul %89, %91, %cst_55 {dimension_numbers = #tpu.dot_dimension_numbers<[1], [0], [0], [1], [0, 0, 1, 1], [], []>} : vector<40x216xbf16>, vector<216x240xbf16>, vector<40x240xf32> -> vector<40x240xf32>
    %93 = vector.extract_strided_slice %88 {offsets = [8, 0], sizes = [40, 216], strides = [1, 1]} : vector<56x216xbf16> to vector<40x216xbf16>
    %c1_56 = arith.constant 1 : index
    %c0_57 = arith.constant 0 : index
    %c0_58 = arith.constant 0 : index
    %94 = vector.load %arg5[%c1_56, %c0_57, %c0_58] : memref<3x216x240xbf16, #tpu.memory_space<vmem>>, vector<1x216x240xbf16>
    %95 = vector.shape_cast %94 : vector<1x216x240xbf16> to vector<216x240xbf16>
    %cst_59 = arith.constant dense<0.000000e+00> : vector<40x240xf32>
    %96 = tpu.matmul %93, %95, %cst_59 {dimension_numbers = #tpu.dot_dimension_numbers<[1], [0], [0], [1], [0, 0, 1, 1], [], []>} : vector<40x216xbf16>, vector<216x240xbf16>, vector<40x240xf32> -> vector<40x240xf32>
    %97 = arith.addf %92, %96 : vector<40x240xf32>
    %98 = vector.extract_strided_slice %88 {offsets = [16, 0], sizes = [40, 216], strides = [1, 1]} : vector<56x216xbf16> to vector<40x216xbf16>
    %c2_60 = arith.constant 2 : index
    %c0_61 = arith.constant 0 : index
    %c0_62 = arith.constant 0 : index
    %99 = vector.load %arg5[%c2_60, %c0_61, %c0_62] : memref<3x216x240xbf16, #tpu.memory_space<vmem>>, vector<1x216x240xbf16>
    %100 = vector.shape_cast %99 : vector<1x216x240xbf16> to vector<216x240xbf16>
    %cst_63 = arith.constant dense<0.000000e+00> : vector<40x240xf32>
    %101 = tpu.matmul %98, %100, %cst_63 {dimension_numbers = #tpu.dot_dimension_numbers<[1], [0], [0], [1], [0, 0, 1, 1], [], []>} : vector<40x216xbf16>, vector<216x240xbf16>, vector<40x240xf32> -> vector<40x240xf32>
    %102 = arith.addf %97, %101 : vector<40x240xf32>
    %c0_64 = arith.constant 0 : index
    %c0_65 = arith.constant 0 : index
    %103 = vector.load %arg13[%c0_64, %c0_65] : memref<1x240xf32, #tpu.memory_space<vmem>>, vector<1x240xf32>
    %104 = vector.broadcast %103 : vector<1x240xf32> to vector<40x240xf32>
    %105 = arith.addf %102, %104 : vector<40x240xf32>
    %cst_66 = arith.constant 0.000000e+00 : f32
    %106 = vector.broadcast %cst_66 : f32 to vector<40x240xf32>
    %107 = arith.maximumf %105, %106 : vector<40x240xf32>
    %108 = vector.extract_strided_slice %107 {offsets = [0, 0], sizes = [32, 240], strides = [1, 1]} : vector<40x240xf32> to vector<32x240xf32>
    %109 = vector.extract_strided_slice %107 {offsets = [8, 0], sizes = [32, 240], strides = [1, 1]} : vector<40x240xf32> to vector<32x240xf32>
    %110 = arith.maximumf %108, %109 : vector<32x240xf32>
    %111 = vector.extract_strided_slice %110 {offsets = [0, 0], sizes = [32, 192], strides = [1, 1]} : vector<32x240xf32> to vector<32x192xf32>
    %112 = vector.extract_strided_slice %110 {offsets = [0, 48], sizes = [32, 192], strides = [1, 1]} : vector<32x240xf32> to vector<32x192xf32>
    %113 = arith.maximumf %111, %112 : vector<32x192xf32>
    %c0_67 = arith.constant 0 : index
    %c0_68 = arith.constant 0 : index
    %114 = vector.load %arg21[%c0_67, %c0_68] : memref<48x32xbf16, #tpu.memory_space<vmem>>, vector<48x32xbf16>
    %115 = arith.truncf %113 : vector<32x192xf32> to vector<32x192xbf16>
    %cst_69 = arith.constant dense<0.000000e+00> : vector<48x192xf32>
    %116 = tpu.matmul %114, %115, %cst_69 {dimension_numbers = #tpu.dot_dimension_numbers<[1], [0], [0], [1], [0, 0, 1, 1], [], []>} : vector<48x32xbf16>, vector<32x192xbf16>, vector<48x192xf32> -> vector<48x192xf32>
    %117 = arith.truncf %116 : vector<48x192xf32> to vector<48x192xbf16>
    %118 = vector.extract_strided_slice %117 {offsets = [0, 0], sizes = [32, 192], strides = [1, 1]} : vector<48x192xbf16> to vector<32x192xbf16>
    %c0_70 = arith.constant 0 : index
    %c0_71 = arith.constant 0 : index
    %c0_72 = arith.constant 0 : index
    %119 = vector.load %arg6[%c0_70, %c0_71, %c0_72] : memref<3x192x144xbf16, #tpu.memory_space<vmem>>, vector<1x192x144xbf16>
    %120 = vector.shape_cast %119 : vector<1x192x144xbf16> to vector<192x144xbf16>
    %cst_73 = arith.constant dense<0.000000e+00> : vector<32x144xf32>
    %121 = tpu.matmul %118, %120, %cst_73 {dimension_numbers = #tpu.dot_dimension_numbers<[1], [0], [0], [1], [0, 0, 1, 1], [], []>} : vector<32x192xbf16>, vector<192x144xbf16>, vector<32x144xf32> -> vector<32x144xf32>
    %122 = vector.extract_strided_slice %117 {offsets = [8, 0], sizes = [32, 192], strides = [1, 1]} : vector<48x192xbf16> to vector<32x192xbf16>
    %c1_74 = arith.constant 1 : index
    %c0_75 = arith.constant 0 : index
    %c0_76 = arith.constant 0 : index
    %123 = vector.load %arg6[%c1_74, %c0_75, %c0_76] : memref<3x192x144xbf16, #tpu.memory_space<vmem>>, vector<1x192x144xbf16>
    %124 = vector.shape_cast %123 : vector<1x192x144xbf16> to vector<192x144xbf16>
    %cst_77 = arith.constant dense<0.000000e+00> : vector<32x144xf32>
    %125 = tpu.matmul %122, %124, %cst_77 {dimension_numbers = #tpu.dot_dimension_numbers<[1], [0], [0], [1], [0, 0, 1, 1], [], []>} : vector<32x192xbf16>, vector<192x144xbf16>, vector<32x144xf32> -> vector<32x144xf32>
    %126 = arith.addf %121, %125 : vector<32x144xf32>
    %127 = vector.extract_strided_slice %117 {offsets = [16, 0], sizes = [32, 192], strides = [1, 1]} : vector<48x192xbf16> to vector<32x192xbf16>
    %c2_78 = arith.constant 2 : index
    %c0_79 = arith.constant 0 : index
    %c0_80 = arith.constant 0 : index
    %128 = vector.load %arg6[%c2_78, %c0_79, %c0_80] : memref<3x192x144xbf16, #tpu.memory_space<vmem>>, vector<1x192x144xbf16>
    %129 = vector.shape_cast %128 : vector<1x192x144xbf16> to vector<192x144xbf16>
    %cst_81 = arith.constant dense<0.000000e+00> : vector<32x144xf32>
    %130 = tpu.matmul %127, %129, %cst_81 {dimension_numbers = #tpu.dot_dimension_numbers<[1], [0], [0], [1], [0, 0, 1, 1], [], []>} : vector<32x192xbf16>, vector<192x144xbf16>, vector<32x144xf32> -> vector<32x144xf32>
    %131 = arith.addf %126, %130 : vector<32x144xf32>
    %c0_82 = arith.constant 0 : index
    %c0_83 = arith.constant 0 : index
    %132 = vector.load %arg14[%c0_82, %c0_83] : memref<1x144xf32, #tpu.memory_space<vmem>>, vector<1x144xf32>
    %133 = vector.broadcast %132 : vector<1x144xf32> to vector<32x144xf32>
    %134 = arith.addf %131, %133 : vector<32x144xf32>
    %cst_84 = arith.constant 0.000000e+00 : f32
    %135 = vector.broadcast %cst_84 : f32 to vector<32x144xf32>
    %136 = arith.maximumf %134, %135 : vector<32x144xf32>
    %137 = vector.extract_strided_slice %136 {offsets = [0, 0], sizes = [24, 144], strides = [1, 1]} : vector<32x144xf32> to vector<24x144xf32>
    %138 = vector.extract_strided_slice %136 {offsets = [8, 0], sizes = [24, 144], strides = [1, 1]} : vector<32x144xf32> to vector<24x144xf32>
    %139 = arith.maximumf %137, %138 : vector<24x144xf32>
    %140 = vector.extract_strided_slice %139 {offsets = [0, 0], sizes = [24, 108], strides = [1, 1]} : vector<24x144xf32> to vector<24x108xf32>
    %141 = vector.extract_strided_slice %139 {offsets = [0, 36], sizes = [24, 108], strides = [1, 1]} : vector<24x144xf32> to vector<24x108xf32>
    %142 = arith.maximumf %140, %141 : vector<24x108xf32>
    %c0_85 = arith.constant 0 : index
    %c0_86 = arith.constant 0 : index
    %143 = vector.load %arg22[%c0_85, %c0_86] : memref<48x24xbf16, #tpu.memory_space<vmem>>, vector<48x24xbf16>
    %144 = arith.truncf %142 : vector<24x108xf32> to vector<24x108xbf16>
    %cst_87 = arith.constant dense<0.000000e+00> : vector<48x108xf32>
    %145 = tpu.matmul %143, %144, %cst_87 {dimension_numbers = #tpu.dot_dimension_numbers<[1], [0], [0], [1], [0, 0, 1, 1], [], []>} : vector<48x24xbf16>, vector<24x108xbf16>, vector<48x108xf32> -> vector<48x108xf32>
    %146 = arith.truncf %145 : vector<48x108xf32> to vector<48x108xbf16>
    %147 = vector.extract_strided_slice %146 {offsets = [0, 0], sizes = [32, 108], strides = [1, 1]} : vector<48x108xbf16> to vector<32x108xbf16>
    %c0_88 = arith.constant 0 : index
    %c0_89 = arith.constant 0 : index
    %c0_90 = arith.constant 0 : index
    %148 = vector.load %arg7[%c0_88, %c0_89, %c0_90] : memref<3x108x96xbf16, #tpu.memory_space<vmem>>, vector<1x108x96xbf16>
    %149 = vector.shape_cast %148 : vector<1x108x96xbf16> to vector<108x96xbf16>
    %cst_91 = arith.constant dense<0.000000e+00> : vector<32x96xf32>
    %150 = tpu.matmul %147, %149, %cst_91 {dimension_numbers = #tpu.dot_dimension_numbers<[1], [0], [0], [1], [0, 0, 1, 1], [], []>} : vector<32x108xbf16>, vector<108x96xbf16>, vector<32x96xf32> -> vector<32x96xf32>
    %151 = vector.extract_strided_slice %146 {offsets = [8, 0], sizes = [32, 108], strides = [1, 1]} : vector<48x108xbf16> to vector<32x108xbf16>
    %c1_92 = arith.constant 1 : index
    %c0_93 = arith.constant 0 : index
    %c0_94 = arith.constant 0 : index
    %152 = vector.load %arg7[%c1_92, %c0_93, %c0_94] : memref<3x108x96xbf16, #tpu.memory_space<vmem>>, vector<1x108x96xbf16>
    %153 = vector.shape_cast %152 : vector<1x108x96xbf16> to vector<108x96xbf16>
    %cst_95 = arith.constant dense<0.000000e+00> : vector<32x96xf32>
    %154 = tpu.matmul %151, %153, %cst_95 {dimension_numbers = #tpu.dot_dimension_numbers<[1], [0], [0], [1], [0, 0, 1, 1], [], []>} : vector<32x108xbf16>, vector<108x96xbf16>, vector<32x96xf32> -> vector<32x96xf32>
    %155 = arith.addf %150, %154 : vector<32x96xf32>
    %156 = vector.extract_strided_slice %146 {offsets = [16, 0], sizes = [32, 108], strides = [1, 1]} : vector<48x108xbf16> to vector<32x108xbf16>
    %c2_96 = arith.constant 2 : index
    %c0_97 = arith.constant 0 : index
    %c0_98 = arith.constant 0 : index
    %157 = vector.load %arg7[%c2_96, %c0_97, %c0_98] : memref<3x108x96xbf16, #tpu.memory_space<vmem>>, vector<1x108x96xbf16>
    %158 = vector.shape_cast %157 : vector<1x108x96xbf16> to vector<108x96xbf16>
    %cst_99 = arith.constant dense<0.000000e+00> : vector<32x96xf32>
    %159 = tpu.matmul %156, %158, %cst_99 {dimension_numbers = #tpu.dot_dimension_numbers<[1], [0], [0], [1], [0, 0, 1, 1], [], []>} : vector<32x108xbf16>, vector<108x96xbf16>, vector<32x96xf32> -> vector<32x96xf32>
    %160 = arith.addf %155, %159 : vector<32x96xf32>
    %c0_100 = arith.constant 0 : index
    %c0_101 = arith.constant 0 : index
    %161 = vector.load %arg15[%c0_100, %c0_101] : memref<1x96xf32, #tpu.memory_space<vmem>>, vector<1x96xf32>
    %162 = vector.broadcast %161 : vector<1x96xf32> to vector<32x96xf32>
    %163 = arith.addf %160, %162 : vector<32x96xf32>
    %cst_102 = arith.constant 0.000000e+00 : f32
    %164 = vector.broadcast %cst_102 : f32 to vector<32x96xf32>
    %165 = arith.maximumf %163, %164 : vector<32x96xf32>
    %166 = vector.extract_strided_slice %165 {offsets = [0, 0], sizes = [24, 96], strides = [1, 1]} : vector<32x96xf32> to vector<24x96xf32>
    %167 = vector.extract_strided_slice %165 {offsets = [8, 0], sizes = [24, 96], strides = [1, 1]} : vector<32x96xf32> to vector<24x96xf32>
    %168 = arith.maximumf %166, %167 : vector<24x96xf32>
    %169 = vector.extract_strided_slice %168 {offsets = [0, 0], sizes = [24, 72], strides = [1, 1]} : vector<24x96xf32> to vector<24x72xf32>
    %170 = vector.extract_strided_slice %168 {offsets = [0, 24], sizes = [24, 72], strides = [1, 1]} : vector<24x96xf32> to vector<24x72xf32>
    %171 = arith.maximumf %169, %170 : vector<24x72xf32>
    %c0_103 = arith.constant 0 : index
    %c0_104 = arith.constant 0 : index
    %172 = vector.load %arg23[%c0_103, %c0_104] : memref<48x24xbf16, #tpu.memory_space<vmem>>, vector<48x24xbf16>
    %173 = arith.truncf %171 : vector<24x72xf32> to vector<24x72xbf16>
    %cst_105 = arith.constant dense<0.000000e+00> : vector<48x72xf32>
    %174 = tpu.matmul %172, %173, %cst_105 {dimension_numbers = #tpu.dot_dimension_numbers<[1], [0], [0], [1], [0, 0, 1, 1], [], []>} : vector<48x24xbf16>, vector<24x72xbf16>, vector<48x72xf32> -> vector<48x72xf32>
    %175 = arith.truncf %174 : vector<48x72xf32> to vector<48x72xbf16>
    %176 = vector.extract_strided_slice %175 {offsets = [0, 0], sizes = [32, 72], strides = [1, 1]} : vector<48x72xbf16> to vector<32x72xbf16>
    %c0_106 = arith.constant 0 : index
    %c0_107 = arith.constant 0 : index
    %c0_108 = arith.constant 0 : index
    %177 = vector.load %arg8[%c0_106, %c0_107, %c0_108] : memref<3x72x48xbf16, #tpu.memory_space<vmem>>, vector<1x72x48xbf16>
    %178 = vector.shape_cast %177 : vector<1x72x48xbf16> to vector<72x48xbf16>
    %cst_109 = arith.constant dense<0.000000e+00> : vector<32x48xf32>
    %179 = tpu.matmul %176, %178, %cst_109 {dimension_numbers = #tpu.dot_dimension_numbers<[1], [0], [0], [1], [0, 0, 1, 1], [], []>} : vector<32x72xbf16>, vector<72x48xbf16>, vector<32x48xf32> -> vector<32x48xf32>
    %180 = vector.extract_strided_slice %175 {offsets = [8, 0], sizes = [32, 72], strides = [1, 1]} : vector<48x72xbf16> to vector<32x72xbf16>
    %c1_110 = arith.constant 1 : index
    %c0_111 = arith.constant 0 : index
    %c0_112 = arith.constant 0 : index
    %181 = vector.load %arg8[%c1_110, %c0_111, %c0_112] : memref<3x72x48xbf16, #tpu.memory_space<vmem>>, vector<1x72x48xbf16>
    %182 = vector.shape_cast %181 : vector<1x72x48xbf16> to vector<72x48xbf16>
    %cst_113 = arith.constant dense<0.000000e+00> : vector<32x48xf32>
    %183 = tpu.matmul %180, %182, %cst_113 {dimension_numbers = #tpu.dot_dimension_numbers<[1], [0], [0], [1], [0, 0, 1, 1], [], []>} : vector<32x72xbf16>, vector<72x48xbf16>, vector<32x48xf32> -> vector<32x48xf32>
    %184 = arith.addf %179, %183 : vector<32x48xf32>
    %185 = vector.extract_strided_slice %175 {offsets = [16, 0], sizes = [32, 72], strides = [1, 1]} : vector<48x72xbf16> to vector<32x72xbf16>
    %c2_114 = arith.constant 2 : index
    %c0_115 = arith.constant 0 : index
    %c0_116 = arith.constant 0 : index
    %186 = vector.load %arg8[%c2_114, %c0_115, %c0_116] : memref<3x72x48xbf16, #tpu.memory_space<vmem>>, vector<1x72x48xbf16>
    %187 = vector.shape_cast %186 : vector<1x72x48xbf16> to vector<72x48xbf16>
    %cst_117 = arith.constant dense<0.000000e+00> : vector<32x48xf32>
    %188 = tpu.matmul %185, %187, %cst_117 {dimension_numbers = #tpu.dot_dimension_numbers<[1], [0], [0], [1], [0, 0, 1, 1], [], []>} : vector<32x72xbf16>, vector<72x48xbf16>, vector<32x48xf32> -> vector<32x48xf32>
    %189 = arith.addf %184, %188 : vector<32x48xf32>
    %c0_118 = arith.constant 0 : index
    %c0_119 = arith.constant 0 : index
    %190 = vector.load %arg16[%c0_118, %c0_119] : memref<1x48xf32, #tpu.memory_space<vmem>>, vector<1x48xf32>
    %191 = vector.broadcast %190 : vector<1x48xf32> to vector<32x48xf32>
    %192 = arith.addf %189, %191 : vector<32x48xf32>
    %cst_120 = arith.constant 0.000000e+00 : f32
    %193 = vector.broadcast %cst_120 : f32 to vector<32x48xf32>
    %194 = arith.maximumf %192, %193 : vector<32x48xf32>
    %195 = vector.extract_strided_slice %194 {offsets = [0, 0], sizes = [24, 48], strides = [1, 1]} : vector<32x48xf32> to vector<24x48xf32>
    %196 = vector.extract_strided_slice %194 {offsets = [8, 0], sizes = [24, 48], strides = [1, 1]} : vector<32x48xf32> to vector<24x48xf32>
    %197 = arith.maximumf %195, %196 : vector<24x48xf32>
    %198 = vector.extract_strided_slice %197 {offsets = [0, 0], sizes = [24, 36], strides = [1, 1]} : vector<24x48xf32> to vector<24x36xf32>
    %199 = vector.extract_strided_slice %197 {offsets = [0, 12], sizes = [24, 36], strides = [1, 1]} : vector<24x48xf32> to vector<24x36xf32>
    %200 = arith.maximumf %198, %199 : vector<24x36xf32>
    %c0_121 = arith.constant 0 : index
    %c0_122 = arith.constant 0 : index
    %201 = vector.load %arg24[%c0_121, %c0_122] : memref<48x24xbf16, #tpu.memory_space<vmem>>, vector<48x24xbf16>
    %202 = arith.truncf %200 : vector<24x36xf32> to vector<24x36xbf16>
    %cst_123 = arith.constant dense<0.000000e+00> : vector<48x36xf32>
    %203 = tpu.matmul %201, %202, %cst_123 {dimension_numbers = #tpu.dot_dimension_numbers<[1], [0], [0], [1], [0, 0, 1, 1], [], []>} : vector<48x24xbf16>, vector<24x36xbf16>, vector<48x36xf32> -> vector<48x36xf32>
    %204 = arith.truncf %203 : vector<48x36xf32> to vector<48x36xbf16>
    %205 = vector.extract_strided_slice %204 {offsets = [0, 0], sizes = [32, 36], strides = [1, 1]} : vector<48x36xbf16> to vector<32x36xbf16>
    %c0_124 = arith.constant 0 : index
    %c0_125 = arith.constant 0 : index
    %c0_126 = arith.constant 0 : index
    %206 = vector.load %arg9[%c0_124, %c0_125, %c0_126] : memref<3x36x16xbf16, #tpu.memory_space<vmem>>, vector<1x36x16xbf16>
    %207 = vector.shape_cast %206 : vector<1x36x16xbf16> to vector<36x16xbf16>
    %cst_127 = arith.constant dense<0.000000e+00> : vector<32x16xf32>
    %208 = tpu.matmul %205, %207, %cst_127 {dimension_numbers = #tpu.dot_dimension_numbers<[1], [0], [0], [1], [0, 0, 1, 1], [], []>} : vector<32x36xbf16>, vector<36x16xbf16>, vector<32x16xf32> -> vector<32x16xf32>
    %209 = vector.extract_strided_slice %204 {offsets = [8, 0], sizes = [32, 36], strides = [1, 1]} : vector<48x36xbf16> to vector<32x36xbf16>
    %c1_128 = arith.constant 1 : index
    %c0_129 = arith.constant 0 : index
    %c0_130 = arith.constant 0 : index
    %210 = vector.load %arg9[%c1_128, %c0_129, %c0_130] : memref<3x36x16xbf16, #tpu.memory_space<vmem>>, vector<1x36x16xbf16>
    %211 = vector.shape_cast %210 : vector<1x36x16xbf16> to vector<36x16xbf16>
    %cst_131 = arith.constant dense<0.000000e+00> : vector<32x16xf32>
    %212 = tpu.matmul %209, %211, %cst_131 {dimension_numbers = #tpu.dot_dimension_numbers<[1], [0], [0], [1], [0, 0, 1, 1], [], []>} : vector<32x36xbf16>, vector<36x16xbf16>, vector<32x16xf32> -> vector<32x16xf32>
    %213 = arith.addf %208, %212 : vector<32x16xf32>
    %214 = vector.extract_strided_slice %204 {offsets = [16, 0], sizes = [32, 36], strides = [1, 1]} : vector<48x36xbf16> to vector<32x36xbf16>
    %c2_132 = arith.constant 2 : index
    %c0_133 = arith.constant 0 : index
    %c0_134 = arith.constant 0 : index
    %215 = vector.load %arg9[%c2_132, %c0_133, %c0_134] : memref<3x36x16xbf16, #tpu.memory_space<vmem>>, vector<1x36x16xbf16>
    %216 = vector.shape_cast %215 : vector<1x36x16xbf16> to vector<36x16xbf16>
    %cst_135 = arith.constant dense<0.000000e+00> : vector<32x16xf32>
    %217 = tpu.matmul %214, %216, %cst_135 {dimension_numbers = #tpu.dot_dimension_numbers<[1], [0], [0], [1], [0, 0, 1, 1], [], []>} : vector<32x36xbf16>, vector<36x16xbf16>, vector<32x16xf32> -> vector<32x16xf32>
    %218 = arith.addf %213, %217 : vector<32x16xf32>
    %c0_136 = arith.constant 0 : index
    %c0_137 = arith.constant 0 : index
    %219 = vector.load %arg17[%c0_136, %c0_137] : memref<1x16xf32, #tpu.memory_space<vmem>>, vector<1x16xf32>
    %220 = vector.broadcast %219 : vector<1x16xf32> to vector<32x16xf32>
    %221 = arith.addf %218, %220 : vector<32x16xf32>
    %cst_138 = arith.constant 0.000000e+00 : f32
    %222 = vector.broadcast %cst_138 : f32 to vector<32x16xf32>
    %223 = arith.maximumf %221, %222 : vector<32x16xf32>
    %224 = vector.extract_strided_slice %223 {offsets = [0, 0], sizes = [24, 16], strides = [1, 1]} : vector<32x16xf32> to vector<24x16xf32>
    %225 = vector.extract_strided_slice %223 {offsets = [8, 0], sizes = [24, 16], strides = [1, 1]} : vector<32x16xf32> to vector<24x16xf32>
    %226 = arith.maximumf %224, %225 : vector<24x16xf32>
    %227 = vector.extract_strided_slice %226 {offsets = [0, 0], sizes = [24, 12], strides = [1, 1]} : vector<24x16xf32> to vector<24x12xf32>
    %228 = vector.extract_strided_slice %226 {offsets = [0, 4], sizes = [24, 12], strides = [1, 1]} : vector<24x16xf32> to vector<24x12xf32>
    %229 = arith.maximumf %227, %228 : vector<24x12xf32>
    %c0_139 = arith.constant 0 : index
    %c0_140 = arith.constant 0 : index
    %230 = vector.load %arg26[%c0_139, %c0_140] : memref<12x8xf32, #tpu.memory_space<vmem>>, vector<12x8xf32>
    %cst_141 = arith.constant dense<0.000000e+00> : vector<24x8xf32>
    %231 = tpu.matmul %229, %230, %cst_141 {dimension_numbers = #tpu.dot_dimension_numbers<[1], [0], [0], [1], [0, 0, 1, 1], [], []>} : vector<24x12xf32>, vector<12x8xf32>, vector<24x8xf32> -> vector<24x8xf32>
    %c0_142 = arith.constant 0 : index
    %c0_143 = arith.constant 0 : index
    %232 = vector.load %arg25[%c0_142, %c0_143] : memref<16x24xf32, #tpu.memory_space<vmem>>, vector<16x24xf32>
    %cst_144 = arith.constant dense<0.000000e+00> : vector<16x8xf32>
    %233 = tpu.matmul %232, %231, %cst_144 {dimension_numbers = #tpu.dot_dimension_numbers<[1], [0], [0], [1], [0, 0, 1, 1], [], []>} : vector<16x24xf32>, vector<24x8xf32>, vector<16x8xf32> -> vector<16x8xf32>
    %c0_145 = arith.constant 0 : index
    %c0_146 = arith.constant 0 : index
    %234 = vector.load %arg27[%c0_145, %c0_146] : memref<16x8xf32, #tpu.memory_space<vmem>>, vector<16x8xf32>
    tpu.vector_store %arg27[%c0_145, %c0_146], %233 {strides = array<i32>} : memref<16x8xf32, #tpu.memory_space<vmem>>, vector<16x8xf32>,
    return
  }
  func.func @transform_0(%arg0: i32) -> (i32, i32) {
    %c0_i32 = arith.constant 0 : i32
    %c0_i32_0 = arith.constant 0 : i32
    return %arg0, %c0_i32 : i32, i32
  }
  func.func @transform_1(%arg0: i32) -> (i32, i32, i32) {
    %c0_i32 = arith.constant 0 : i32
    %c0_i32_0 = arith.constant 0 : i32
    %c0_i32_1 = arith.constant 0 : i32
    %c0_i32_2 = arith.constant 0 : i32
    return %c0_i32, %c0_i32_0, %c0_i32_1 : i32, i32, i32
  }
  func.func @transform_2(%arg0: i32) -> (i32, i32, i32) {
    %c0_i32 = arith.constant 0 : i32
    %c0_i32_0 = arith.constant 0 : i32
    %c0_i32_1 = arith.constant 0 : i32
    %c0_i32_2 = arith.constant 0 : i32
    return %c0_i32, %c0_i32_0, %c0_i32_1 : i32, i32, i32
  }
  func.func @transform_3(%arg0: i32) -> (i32, i32, i32) {
    %c0_i32 = arith.constant 0 : i32
    %c0_i32_0 = arith.constant 0 : i32
    %c0_i32_1 = arith.constant 0 : i32
    %c0_i32_2 = arith.constant 0 : i32
    return %c0_i32, %c0_i32_0, %c0_i32_1 : i32, i32, i32
  }
  func.func @transform_4(%arg0: i32) -> (i32, i32, i32) {
    %c0_i32 = arith.constant 0 : i32
    %c0_i32_0 = arith.constant 0 : i32
    %c0_i32_1 = arith.constant 0 : i32
    %c0_i32_2 = arith.constant 0 : i32
    return %c0_i32, %c0_i32_0, %c0_i32_1 : i32, i32, i32
  }
  func.func @transform_5(%arg0: i32) -> (i32, i32, i32) {
    %c0_i32 = arith.constant 0 : i32
    %c0_i32_0 = arith.constant 0 : i32
    %c0_i32_1 = arith.constant 0 : i32
    %c0_i32_2 = arith.constant 0 : i32
    return %c0_i32, %c0_i32_0, %c0_i32_1 : i32, i32, i32
  }
  func.func @transform_6(%arg0: i32) -> (i32, i32, i32) {
    %c0_i32 = arith.constant 0 : i32
    %c0_i32_0 = arith.constant 0 : i32
    %c0_i32_1 = arith.constant 0 : i32
    %c0_i32_2 = arith.constant 0 : i32
    return %c0_i32, %c0_i32_0, %c0_i32_1 : i32, i32, i32
  }
  func.func @transform_7(%arg0: i32) -> (i32, i32, i32) {
    %c0_i32 = arith.constant 0 : i32
    %c0_i32_0 = arith.constant 0 : i32
    %c0_i32_1 = arith.constant 0 : i32
    %c0_i32_2 = arith.constant 0 : i32
    return %c0_i32, %c0_i32_0, %c0_i32_1 : i32, i32, i32
  }
  func.func @transform_8(%arg0: i32) -> (i32, i32, i32) {
    %c0_i32 = arith.constant 0 : i32
    %c0_i32_0 = arith.constant 0 : i32
    %c0_i32_1 = arith.constant 0 : i32
    %c0_i32_2 = arith.constant 0 : i32
    return %c0_i32, %c0_i32_0, %c0_i32_1 : i32, i32, i32
  }
  func.func @transform_9(%arg0: i32) -> (i32, i32) {
    %c0_i32 = arith.constant 0 : i32
    %c0_i32_0 = arith.constant 0 : i32
    %c0_i32_1 = arith.constant 0 : i32
    return %c0_i32, %c0_i32_0 : i32, i32
  }
  func.func @transform_10(%arg0: i32) -> (i32, i32) {
    %c0_i32 = arith.constant 0 : i32
    %c0_i32_0 = arith.constant 0 : i32
    %c0_i32_1 = arith.constant 0 : i32
    return %c0_i32, %c0_i32_0 : i32, i32
  }
  func.func @transform_11(%arg0: i32) -> (i32, i32) {
    %c0_i32 = arith.constant 0 : i32
    %c0_i32_0 = arith.constant 0 : i32
    %c0_i32_1 = arith.constant 0 : i32
    return %c0_i32, %c0_i32_0 : i32, i32
  }
  func.func @transform_12(%arg0: i32) -> (i32, i32) {
    %c0_i32 = arith.constant 0 : i32
    %c0_i32_0 = arith.constant 0 : i32
    %c0_i32_1 = arith.constant 0 : i32
    return %c0_i32, %c0_i32_0 : i32, i32
  }
  func.func @transform_13(%arg0: i32) -> (i32, i32) {
    %c0_i32 = arith.constant 0 : i32
    %c0_i32_0 = arith.constant 0 : i32
    %c0_i32_1 = arith.constant 0 : i32
    return %c0_i32, %c0_i32_0 : i32, i32
  }
  func.func @transform_14(%arg0: i32) -> (i32, i32) {
    %c0_i32 = arith.constant 0 : i32
    %c0_i32_0 = arith.constant 0 : i32
    %c0_i32_1 = arith.constant 0 : i32
    return %c0_i32, %c0_i32_0 : i32, i32
  }
  func.func @transform_15(%arg0: i32) -> (i32, i32) {
    %c0_i32 = arith.constant 0 : i32
    %c0_i32_0 = arith.constant 0 : i32
    %c0_i32_1 = arith.constant 0 : i32
    return %c0_i32, %c0_i32_0 : i32, i32
  }
  func.func @transform_16(%arg0: i32) -> (i32, i32) {
    %c0_i32 = arith.constant 0 : i32
    %c0_i32_0 = arith.constant 0 : i32
    %c0_i32_1 = arith.constant 0 : i32
    return %c0_i32, %c0_i32_0 : i32, i32
  }
  func.func @transform_17(%arg0: i32) -> (i32, i32) {
    %c0_i32 = arith.constant 0 : i32
    %c0_i32_0 = arith.constant 0 : i32
    %c0_i32_1 = arith.constant 0 : i32
    return %c0_i32, %c0_i32_0 : i32, i32
  }
  func.func @transform_18(%arg0: i32) -> (i32, i32) {
    %c0_i32 = arith.constant 0 : i32
    %c0_i32_0 = arith.constant 0 : i32
    %c0_i32_1 = arith.constant 0 : i32
    return %c0_i32, %c0_i32_0 : i32, i32
  }
  func.func @transform_19(%arg0: i32) -> (i32, i32) {
    %c0_i32 = arith.constant 0 : i32
    %c0_i32_0 = arith.constant 0 : i32
    %c0_i32_1 = arith.constant 0 : i32
    return %c0_i32, %c0_i32_0 : i32, i32
  }
  func.func @transform_20(%arg0: i32) -> (i32, i32) {
    %c0_i32 = arith.constant 0 : i32
    %c0_i32_0 = arith.constant 0 : i32
    %c0_i32_1 = arith.constant 0 : i32
    return %c0_i32, %c0_i32_0 : i32, i32
  }
  func.func @transform_21(%arg0: i32) -> (i32, i32) {
    %c0_i32 = arith.constant 0 : i32
    %c0_i32_0 = arith.constant 0 : i32
    %c0_i32_1 = arith.constant 0 : i32
    return %c0_i32, %c0_i32_0 : i32, i32
  }
  func.func @transform_22(%arg0: i32) -> (i32, i32) {
    %c0_i32 = arith.constant 0 : i32
    %c0_i32_0 = arith.constant 0 : i32
    %c0_i32_1 = arith.constant 0 : i32
    return %c0_i32, %c0_i32_0 : i32, i32
  }
  func.func @transform_23(%arg0: i32) -> (i32, i32) {
    %c0_i32 = arith.constant 0 : i32
    %c0_i32_0 = arith.constant 0 : i32
    %c0_i32_1 = arith.constant 0 : i32
    return %c0_i32, %c0_i32_0 : i32, i32
  }
  func.func @transform_24(%arg0: i32) -> (i32, i32) {
    %c0_i32 = arith.constant 0 : i32
    %c0_i32_0 = arith.constant 0 : i32
    %c0_i32_1 = arith.constant 0 : i32
    return %c0_i32, %c0_i32_0 : i32, i32
  }
  func.func @transform_25(%arg0: i32) -> (i32, i32) {
    %c0_i32 = arith.constant 0 : i32
    %c0_i32_0 = arith.constant 0 : i32
    %c0_i32_1 = arith.constant 0 : i32
    return %c0_i32, %c0_i32_0 : i32, i32
  }
  func.func @transform_26(%arg0: i32) -> (i32, i32) {
    %c0_i32 = arith.constant 0 : i32
    %c0_i32_0 = arith.constant 0 : i32
    return %arg0, %c0_i32 : i32, i32
  }
}

</mosaic_0001>

<bundles_post_ra>
// kernel: _lambda_.1
= control target key start
LH: loop header
LB: loop body
LE: loop exit
PB: predicated region body
PF: predicated region fallthrough
CT: control target
= control target key end

     0   :  { %v12717_v1 = vmov 0   ;;  %vm157_vm0 = vcmask 1043456   ;;  %vm1245_vm1 = vcmask 64512   ;;  %vm1068_vm2 = vcmask 949248   ;;  %s12682_s1 = inlined_call_operand.vmem [shape: bf16[3,128,216], index: 1, kind: input, shape index: {}]   ;;  %s12683_s0 = inlined_call_operand.vmem [shape: f32[160,128], index: 0, kind: input, shape index: {}]   ;;  %s12684_s9 = inlined_call_operand.vmem [shape: f32[1,216], index: 9, kind: input, shape index: {}]   ;;  %s12685_s17 = inlined_call_operand.vmem [shape: bf16[104,136], index: 17, kind: input, shape index: {}]   ;;  %s12686_s2 = inlined_call_operand.vmem [shape: bf16[3,204,264], index: 2, kind: input, shape index: {}]   ;;  %s12687_s10 = inlined_call_operand.vmem [shape: f32[1,264], index: 10, kind: input, shape index: {}]   ;;  %s12688_s18 = inlined_call_operand.vmem [shape: bf16[72,80], index: 18, kind: input, shape index: {}]   ;;  %s12689_s3 = inlined_call_operand.vmem [shape: bf16[3,240,252], index: 3, kind: input, shape index: {}]   ;;  %s12690_s11 = inlined_call_operand.vmem [shape: f32[1,252], index: 11, kind: input, shape index: {}]   ;;  %s12691_s19 = inlined_call_operand.vmem [shape: bf16[56,48], index: 19, kind: input, shape index: {}]   ;;  %s12692_s4 = inlined_call_operand.vmem [shape: bf16[3,216,240], index: 4, kind: input, shape index: {}]   ;;  %s12693_s12 = inlined_call_operand.vmem [shape: f32[1,240], index: 12, kind: input, shape index: {}]   ;;  %s12694_s20 = inlined_call_operand.vmem [shape: bf16[48,32], index: 20, kind: input, shape index: {}]   ;;  %s12695_s5 = inlined_call_operand.vmem [shape: bf16[3,192,144], index: 5, kind: input, shape index: {}]   ;;  %s12696_s13 = inlined_call_operand.vmem [shape: f32[1,144], index: 13, kind: input, shape index: {}]   ;;  %s12697_s21 = inlined_call_operand.vmem [shape: bf16[48,24], index: 21, kind: input, shape index: {}, may-alias: {21,22,23}]   ;;  %s12698_s6 = inlined_call_operand.vmem [shape: bf16[3,108,96], index: 6, kind: input, shape index: {}]   ;;  %s12699_s14 = inlined_call_operand.vmem [shape: f32[1,96], index: 14, kind: input, shape index: {}]   ;;  %s12700_s22 = inlined_call_operand.vmem [shape: bf16[48,24], index: 22, kind: input, shape index: {}, may-alias: {21,22,23}]   ;;  %s12701_s7 = inlined_call_operand.vmem [shape: bf16[3,72,48], index: 7, kind: input, shape index: {}]   ;;  %s12702_s15 = inlined_call_operand.vmem [shape: f32[1,48], index: 15, kind: input, shape index: {}]   ;;  %s12703_s23 = inlined_call_operand.vmem [shape: bf16[48,24], index: 23, kind: input, shape index: {}, may-alias: {21,22,23}]   ;;  %s12704_s8 = inlined_call_operand.vmem [shape: bf16[3,36,16], index: 8, kind: input, shape index: {}]   ;;  %s12705_s25 = inlined_call_operand.vmem [shape: f32[12,8], index: 25, kind: input, shape index: {}]   ;;  %s12706_s16 = inlined_call_operand.vmem [shape: f32[1,16], index: 16, kind: input, shape index: {}]   ;;  %s12707_s24 = inlined_call_operand.vmem [shape: f32[16,24], index: 24, kind: input, shape index: {}]   ;;  %s12708_s26 = inlined_call_operand.vmem [shape: f32[16,8], index: 26, kind: output, shape index: {}]  }
   0x1   :  { %12730 = sst [smem:[#allocation19_spill]] %s12682_s1  ;;  %298 = vmatprep.mubr.bf16.mxu0 %v12717_v1  ;;  %501 = vmatprep.mubr.bf16.mxu1 %v12717_v1  ;;  %vm1758_vm3 = vcmask 1045504   ;;  %vm1739_vm4 = vcmask 621568   ;;  %vm3019_vm5 = vcmask 850944   ;;  %vm3122_vm6 = vcmask 654336  }
   0x2   :  { %12731 = sst [smem:[#allocation20_spill]] %s12683_s0  ;;  %vm3466_vm7 = vcmask 916480   ;;  %vm4140_vm8 = vcmask 752640   ;;  %vm4202_vm9 = vcmask 392192   ;;  %vm4503_vm10 = vcmask 719872  }
   0x3   :  { %12732 = sst [smem:[#allocation21_spill]] %s12684_s9  ;;  %vm5143_vm11 = vcmask 261120   ;;  %vm5409_vm12 = vcmask 523264   ;;  %vm9571_vm13 = vmmov 0   ;;  %vm5941_vm14 = vcmask 195584  }
   0x4   :  { %12733 = sst [smem:[#allocation22_spill]] %s12685_s17  ;;  %vm6092_vm15 = vcmask 883712  }
   0x5   :  { %12734 = sst [smem:[#allocation23_spill]] %s12686_s2  ;;  %s9566_s2 = smov 116  }
   0x6   :  { %12735 = sst [smem:[#allocation24_spill]] %s12687_s10 }
   0x7   :  { %12736 = sst [smem:[#allocation25_spill]] %s12688_s18 }
   0x8   :  { %12737 = sst [smem:[#allocation26_spill]] %s12689_s3 }
   0x9   :  { %12738 = sst [smem:[#allocation27_spill]] %s12690_s11 }
   0xa   :  { %12739 = sst [smem:[#allocation28_spill]] %s12691_s19 }
   0xb   :  { %12740 = sst [smem:[#allocation29_spill]] %s12692_s4 }
   0xc   :  { %s12741_s17 = sld [smem:[#allocation19_spill]] }
   0xd   :  { %s12742_s18 = sld [smem:[#allocation20_spill]] }
   0xe   :  { %s12748_s11 = sld [smem:[#allocation21_spill]] }
   0xf   :  { %s12776_s1 = sld [smem:[#allocation22_spill]] }
  0x10   :  { %s12777_s4 = sld [smem:[#allocation23_spill]] }
  0x11   :  { %s12789_s3 = sld [smem:[#allocation24_spill]] }
  0x12   :  { %v8885_v0 = vld [vmem:[%s12741_s17 + $0xf4] ss:$8 sps:$4 sm:$0xff]   ;;  %v8889_v3 = vld [vmem:[%s12741_s17 + $0xf0] ss:$8 sps:$4 sm:$0xff]   ;;  %v8891_v5 = vld [vmem:[%s12741_s17 + $0xe4] ss:$8 sps:$4 sm:$0xff]  }
  0x13   :  { %v8887_v2 = vld [vmem:[%s12741_s17 + $0x74] ss:$8 sps:$4 sm:$0xff]   ;;  %266 = vmatprep.subr.bf16.mxu0 %v8885_v0  ;;  %v8890_v4 = vld [vmem:[%s12741_s17 + $0x70] ss:$8 sps:$4 sm:$0xff]   ;;  %v8893_v6 = vld [vmem:[%s12741_s17 + $0x64] ss:$8 sps:$4 sm:$0xff]  }
  0x14   :  { %469 = vmatprep.subr.bf16.mxu1 %v8887_v2  ;;  %267 = vmatpush1.bf16.msra.mxu0 %v8889_v3  ;;  %v8895_v7 = vld [vmem:[%s12741_s17 + $0xe0] ss:$8 sps:$4 sm:$0xff]   ;;  %v8897_v9 = vld [vmem:[%s12741_s17 + $0xd4] ss:$8 sps:$4 sm:$0xff]   ;;  %v8901_v11 = vld [vmem:[%s12741_s17 + $0xd0] ss:$8 sps:$4 sm:$0xff]  }
  0x15   :  { %470 = vmatpush1.bf16.msra.mxu1 %v8890_v4  ;;  %268 = vmatprep.subr.bf16.mxu0 %v8891_v5  ;;  %v8896_v8 = vld [vmem:[%s12741_s17 + $0x60] ss:$8 sps:$4 sm:$0xff]   ;;  %v8899_v10 = vld [vmem:[%s12741_s17 + $0x54] ss:$8 sps:$4 sm:$0xff]   ;;  %v8902_v12 = vld [vmem:[%s12741_s17 + $0x50] ss:$8 sps:$4 sm:$0xff]  }
  0x16   :  { %471 = vmatprep.subr.bf16.mxu1 %v8893_v6  ;;  %v8903_v13 = vld [vmem:[%s12741_s17 + $0xc4] ss:$8 sps:$4 sm:$0xff]   ;;  %v8907_v15 = vld [vmem:[%s12741_s17 + $0xc0] ss:$8 sps:$4 sm:$0xff]   ;;  %v8909_v17 = vld [vmem:[%s12741_s17 + $0xb4] ss:$8 sps:$4 sm:$0xff]  }
  0x17   :  { %v8905_v14 = vld [vmem:[%s12741_s17 + $0x44] ss:$8 sps:$4 sm:$0xff]   ;;  %v8908_v16 = vld [vmem:[%s12741_s17 + $0x40] ss:$8 sps:$4 sm:$0xff]   ;;  %v8911_v18 = vld [vmem:[%s12741_s17 + $0x34] ss:$8 sps:$4 sm:$0xff]  }
  0x18   :  { %269 = vmatpush1.bf16.msra.mxu0 %v8895_v7  ;;  %v8913_v19 = vld [vmem:[%s12741_s17 + $0xb0] ss:$8 sps:$4 sm:$0xff]   ;;  %v8915_v21 = vld [vmem:[%s12741_s17 + $0xa4] ss:$8 sps:$4 sm:$0xff]   ;;  %v8919_v23 = vld [vmem:[%s12741_s17 + $0xa0] ss:$8 sps:$4 sm:$0xff]  }
  0x19   :  { %472 = vmatpush1.bf16.msra.mxu1 %v8896_v8  ;;  %270 = vmatprep.subr.bf16.mxu0 %v8897_v9  ;;  %v8914_v20 = vld [vmem:[%s12741_s17 + $0x30] ss:$8 sps:$4 sm:$0xff]   ;;  %v8917_v22 = vld [vmem:[%s12741_s17 + $0x24] ss:$8 sps:$4 sm:$0xff]   ;;  %v8920_v24 = vld [vmem:[%s12741_s17 + $0x20] ss:$8 sps:$4 sm:$0xff]  }
  0x1a   :  { %473 = vmatprep.subr.bf16.mxu1 %v8899_v10  ;;  %v8921_v25 = vld [vmem:[%s12741_s17 + $0x94] ss:$8 sps:$4 sm:$0xff]   ;;  %v84_v27 = vld [vmem:[%s12742_s18] sm:$0xff]  ;;  %v85_v28 = vld [vmem:[%s12742_s18 + $0x8] sm:$0xff]  ;;  %s12806_s28 = sld [smem:[#allocation26_spill]] }
  0x1b   :  { %v8923_v26 = vld [vmem:[%s12741_s17 + $0x14] ss:$8 sps:$4 sm:$0xff]   ;;  %v8925_v31 = vld [vmem:[%s12741_s17 + $0x90] ss:$8 sps:$4 sm:$0xff]   ;;  %v8927_v33 = vld [vmem:[%s12741_s17 + $0x84] ss:$8 sps:$4 sm:$0xff]   ;;  %v104_v34 = vpack.c.bf16 %v85_v28, %v84_v27 }
  0x1c   :  { %271 = vmatpush1.bf16.msra.mxu0 %v8901_v11  ;;  %v86_v29 = vld [vmem:[%s12742_s18 + $0x10] sm:$0xff]  ;;  %v87_v30 = vld [vmem:[%s12742_s18 + $0x18] sm:$0xff]  ;;  %v8929_v36 = vld [vmem:[%s12741_s17 + $0x4] ss:$8 sps:$4 sm:$0xff]   ;;  %s12807_s9 = sld [smem:[#allocation25_spill]] }
  0x1d   :  { %474 = vmatpush1.bf16.msra.mxu1 %v8902_v12  ;;  %272 = vmatprep.subr.bf16.mxu0 %v8903_v13  ;;  %v8926_v32 = vld [vmem:[%s12741_s17 + $0x10] ss:$8 sps:$4 sm:$0xff]   ;;  %v9809_v35 = vpack.c.bf16 %v87_v30, %v86_v29  ;;  %v8931_v37 = vld [vmem:[%s12741_s17 + $0x80] ss:$8 sps:$4 sm:$0xff]   ;;  %v158_v39 = vrot.slane %v104_v34, 4  ;;  %s12809_s29 = sld [smem:[#allocation27_spill]] }
  0x1e   :  { %475 = vmatprep.subr.bf16.mxu1 %v8905_v14  ;;  %v8932_v38 = vld [vmem:[%s12741_s17] ss:$8 sps:$4 sm:$0xff]   ;;  %v8935_v43 = vld [vmem:[%s12741_s17 + $0x174] ss:$8 sps:$4 sm:$0xff]   ;;  %v8933_v46 = vld [vmem:[%s12741_s17 + $0x170] ss:$8 sps:$4 sm:$0xff]  }
  0x1f   :  { %v159_v40 = vrot.slane %v9809_v35, 4  ;;  %v88_v41 = vld [vmem:[%s12742_s18 + $0x20] sm:$0xff]  ;;  %v89_v42 = vld [vmem:[%s12742_s18 + $0x28] sm:$0xff]  ;;  %v90_v49 = vld [vmem:[%s12742_s18 + $0x30] sm:$0xff]  ;;  %s12811_s10 = sld [smem:[#allocation29_spill]] }
  0x20   :  { %273 = vmatpush1.bf16.msra.mxu0 %v8907_v15  ;;  %v9831_v45 = vpack.c.bf16 %v89_v42, %v88_v41  ;;  %v8938_v47 = vld [vmem:[%s12741_s17 + $0x164] ss:$8 sps:$4 sm:$0xff]   ;;  %v91_v50 = vld [vmem:[%s12742_s18 + $0x38] sm:$0xff]  ;;  %v8936_v51 = vld [vmem:[%s12741_s17 + $0x160] ss:$8 sps:$4 sm:$0xff]  }
  0x21   :  { %476 = vmatpush1.bf16.msra.mxu1 %v8908_v16  ;;  %274 = vmatprep.subr.bf16.mxu0 %v8909_v17  ;;  %v160_v44 = vsel %vm157_vm0, %v158_v39, %v159_v40  ;;  %v8941_v52 = vld [vmem:[%s12741_s17 + $0x154] ss:$8 sps:$4 sm:$0xff]   ;;  %v9855_v54 = vpack.c.bf16 %v91_v50, %v90_v49  ;;  %v8939_v55 = vld [vmem:[%s12741_s17 + $0x150] ss:$8 sps:$4 sm:$0xff]   ;;  %v8944_v56 = vld [vmem:[%s12741_s17 + $0x144] ss:$8 sps:$4 sm:$0xff]  }
  0x22   :  { %477 = vmatprep.subr.bf16.mxu1 %v8911_v18  ;;  %v161_v48 = vrot.slane %v9831_v45, 4  ;;  %v92_v58 = vld [vmem:[%s12742_s18 + $0x40] sm:$0xff]  ;;  %v93_v59 = vld [vmem:[%s12742_s18 + $0x48] sm:$0xff]  ;;  %v8947_v61 = vld [vmem:[%s12741_s17 + $0x134] ss:$8 sps:$4 sm:$0xff]  }
  0x23   :  { %v163_v57 = vrot.slane %v9855_v54, 4  ;;  %v8942_v60 = vld [vmem:[%s12741_s17 + $0x140] ss:$8 sps:$4 sm:$0xff]   ;;  %v9880_v63 = vpack.c.bf16 %v93_v59, %v92_v58  ;;  %v8945_v0 = vld [vmem:[%s12741_s17 + $0x130] ss:$8 sps:$4 sm:$0xff]  }
  0x24   :  { %275 = vmatpush1.bf16.msra.mxu0 %v8913_v19  ;;  %v162_v53 = vsel %vm157_vm0, %v159_v40, %v161_v48  ;;  %v8950_v2 = vld [vmem:[%s12741_s17 + $0x124] ss:$8 sps:$4 sm:$0xff]   ;;  %v94_v4 = vld [vmem:[%s12742_s18 + $0x50] sm:$0xff]  ;;  %v95_v5 = vld [vmem:[%s12742_s18 + $0x58] sm:$0xff] }
  0x25   :  { %478 = vmatpush1.bf16.msra.mxu1 %v8914_v20  ;;  %276 = vmatprep.subr.bf16.mxu0 %v8915_v21  ;;  %v164_v62 = vsel %vm157_vm0, %v161_v48, %v163_v57  ;;  %v165_v3 = vrot.slane %v9880_v63, 4  ;;  %v8948_v6 = vld [vmem:[%s12741_s17 + $0x120] ss:$8 sps:$4 sm:$0xff]   ;;  %v8953_v7 = vld [vmem:[%s12741_s17 + $0x114] ss:$8 sps:$4 sm:$0xff]   ;;  %v109_v9 = vpack.c.bf16 %v95_v5, %v94_v4 }
  0x26   :  { %479 = vmatprep.subr.bf16.mxu1 %v8917_v22  ;;  %v8951_v10 = vld [vmem:[%s12741_s17 + $0x110] ss:$8 sps:$4 sm:$0xff]   ;;  %v8956_v11 = vld [vmem:[%s12741_s17 + $0x104] ss:$8 sps:$4 sm:$0xff]   ;;  %v8954_v15 = vld [vmem:[%s12741_s17 + $0x100] ss:$8 sps:$4 sm:$0xff]  }
  0x27   :  { %v166_v8 = vsel %vm157_vm0, %v163_v57, %v165_v3  ;;  %v167_v12 = vrot.slane %v109_v9, 4  ;;  %v96_v13 = vld [vmem:[%s12742_s18 + $0x60] sm:$0xff]  ;;  %v97_v14 = vld [vmem:[%s12742_s18 + $0x68] sm:$0xff]  ;;  %v98_v19 = vld [vmem:[%s12742_s18 + $0x70] sm:$0xff]  ;;  %s9568_s17 = smov 92  }
  0x28   :  { %277 = vmatpush1.bf16.msra.mxu0 %v8919_v23  ;;  %v110_v17 = vpack.c.bf16 %v97_v14, %v96_v13  ;;  %v99_v20 = vld [vmem:[%s12742_s18 + $0x78] sm:$0xff]  ;;  %v102_v29 = vld [vmem:[%s12742_s18 + $0x90] sm:$0xff] }
  0x29   :  { %480 = vmatpush1.bf16.msra.mxu1 %v8920_v24  ;;  %278 = vmatprep.subr.bf16.mxu0 %v8921_v25  ;;  %v168_v16 = vsel %vm157_vm0, %v165_v3, %v167_v12  ;;  %v111_v22 = vpack.c.bf16 %v99_v20, %v98_v19  ;;  %v100_v24 = vld [vmem:[%s12742_s18 + $0x80] sm:$0xff]  ;;  %v101_v25 = vld [vmem:[%s12742_s18 + $0x88] sm:$0xff]  ;;  %v103_v30 = vld [vmem:[%s12742_s18 + $0x98] sm:$0xff] }
  0x2a   :  { %481 = vmatprep.subr.bf16.mxu1 %v8923_v26  ;;  %v169_v18 = vrot.slane %v110_v17, 4  ;;  %v112_v27 = vpack.c.bf16 %v101_v25, %v100_v24 }
  0x2b   :  { %v171_v23 = vrot.slane %v111_v22, 4 }
  0x2c   :  { %279 = vmatpush1.bf16.msra.mxu0 %v8925_v31  ;;  %v170_v21 = vsel %vm157_vm0, %v167_v12, %v169_v18  ;;  %v173_v28 = vrot.slane %v112_v27, 4 }
  0x2d   :  { %482 = vmatpush1.bf16.msra.mxu1 %v8926_v32  ;;  %280 = vmatprep.subr.bf16.mxu0 %v8927_v33  ;;  %v172_v26 = vsel %vm157_vm0, %v169_v18, %v171_v23  ;;  %v113_v32 = vpack.c.bf16 %v103_v30, %v102_v29 }
  0x2e   :  { %483 = vmatprep.subr.bf16.mxu1 %v8929_v36  ;;  %v174_v31 = vsel %vm157_vm0, %v171_v23, %v173_v28 }
  0x2f   :  { %v175_v33 = vrot.slane %v113_v32, 4 }
  0x30   :  { %281 = vmatpush1.bf16.msra.mxu0 %v8931_v37 }
  0x31   :  { %484 = vmatpush1.bf16.msra.mxu1 %v8932_v38  ;;  %689 = vmatprep.subr.bf16.mxu0 %v8935_v43 }
  0x33   :  { %299 = vmatmul.mubr.bf16.vlgmr.msra.gmra.mxu0 %v160_v44 }
  0x34   :  { %502 = vmatmul.mubr.bf16.vlgmr.msra.gmra.mxu1 %v104_v34  ;;  %308 = vmatprep.mubr.bf16.mxu0 %v12717_v1  ;;  %v176_v34 = vsel %vm157_vm0, %v173_v28, %v175_v33 }
  0x35   :  { %511 = vmatprep.mubr.bf16.mxu1 %v12717_v1  ;;  %690 = vmatpush1.bf16.msra.mxu0 %v8933_v46 }
  0x36   :  { %691 = vmatprep.subr.bf16.mxu0 %v8938_v47 }
  0x39   :  { %692 = vmatpush1.bf16.msra.mxu0 %v8936_v51 }
  0x3a   :  { %693 = vmatprep.subr.bf16.mxu0 %v8941_v52 }
  0x3b   :  { %309 = vmatmul.mubr.bf16.gmra.mxu0 %v162_v53 }
  0x3c   :  { %512 = vmatmul.mubr.bf16.gmra.mxu1 %v9809_v35  ;;  %318 = vmatprep.mubr.bf16.mxu0 %v12717_v1 }
  0x3d   :  { %521 = vmatprep.mubr.bf16.mxu1 %v12717_v1  ;;  %694 = vmatpush1.bf16.msra.mxu0 %v8939_v55 }
  0x3e   :  { %695 = vmatprep.subr.bf16.mxu0 %v8944_v56 }
  0x41   :  { %696 = vmatpush1.bf16.msra.mxu0 %v8942_v60 }
  0x42   :  { %697 = vmatprep.subr.bf16.mxu0 %v8947_v61 }
  0x43   :  { %319 = vmatmul.mubr.bf16.gmra.mxu0 %v164_v62 }
  0x44   :  { %522 = vmatmul.mubr.bf16.gmra.mxu1 %v9831_v45  ;;  %328 = vmatprep.mubr.bf16.mxu0 %v12717_v1 }
  0x45   :  { %531 = vmatprep.mubr.bf16.mxu1 %v12717_v1  ;;  %698 = vmatpush1.bf16.msra.mxu0 %v8945_v0 }
  0x46   :  { %699 = vmatprep.subr.bf16.mxu0 %v8950_v2 }
  0x49   :  { %700 = vmatpush1.bf16.msra.mxu0 %v8948_v6 }
  0x4a   :  { %701 = vmatprep.subr.bf16.mxu0 %v8953_v7 }
  0x4b   :  { %329 = vmatmul.mubr.bf16.gmra.mxu0 %v166_v8 }
  0x4c   :  { %532 = vmatmul.mubr.bf16.gmra.mxu1 %v9855_v54  ;;  %338 = vmatprep.mubr.bf16.mxu0 %v12717_v1 }
  0x4d   :  { %541 = vmatprep.mubr.bf16.mxu1 %v12717_v1  ;;  %702 = vmatpush1.bf16.msra.mxu0 %v8951_v10 }
  0x4e   :  { %703 = vmatprep.subr.bf16.mxu0 %v8956_v11 }
  0x51   :  { %704 = vmatpush1.bf16.msra.mxu0 %v8954_v15 }
  0x52   :  { %1859 = vmatprep.subr.bf16.mxu0 %v12717_v1 }
  0x53   :  { %339 = vmatmul.mubr.bf16.gmra.mxu0 %v168_v16 }
  0x54   :  { %542 = vmatmul.mubr.bf16.gmra.mxu1 %v9880_v63  ;;  %348 = vmatprep.mubr.bf16.mxu0 %v12717_v1 }
  0x55   :  { %551 = vmatprep.mubr.bf16.mxu1 %v12717_v1 }
  0x5b   :  { %349 = vmatmul.mubr.bf16.gmra.mxu0 %v170_v21 }
  0x5c   :  { %552 = vmatmul.mubr.bf16.gmra.mxu1 %v109_v9  ;;  %358 = vmatprep.mubr.bf16.mxu0 %v12717_v1 }
  0x5d   :  { %561 = vmatprep.mubr.bf16.mxu1 %v12717_v1 }
  0x63   :  { %359 = vmatmul.mubr.bf16.gmra.mxu0 %v172_v26  ;;  %v850_v26 = vlaneseq }
  0x64   :  { %562 = vmatmul.mubr.bf16.gmra.mxu1 %v110_v17  ;;  %368 = vmatprep.mubr.bf16.mxu0 %v12717_v1 }
  0x65   :  { %571 = vmatprep.mubr.bf16.mxu1 %v12717_v1  ;;  %v10059_v30 = vshrl.u32 %v850_v26, 7 }
  0x67   :  { %12745 = vst [vmem:[#allocation4_spill] sm:$0xff] %v10059_v30 }
  0x6b   :  { %369 = vmatmul.mubr.bf16.gmra.mxu0 %v174_v31 }
  0x6c   :  { %572 = vmatmul.mubr.bf16.gmra.mxu1 %v111_v22  ;;  %378 = vmatprep.mubr.bf16.mxu0 %v12717_v1 }
  0x6d   :  { %581 = vmatprep.mubr.bf16.mxu1 %v12717_v1 }
  0x73   :  { %379 = vmatmul.mubr.bf16.gmra.mxu0 %v176_v34  ;;  %v10068_v34 = vsub.s32 0, %v10059_v30 }
  0x74   :  { %582 = vmatmul.mubr.bf16.gmra.mxu1 %v112_v27  ;;  %721 = vmatprep.mubr.bf16.mxu0 %v12717_v1 }
  0x75   :  { %12746 = vst [vmem:[#allocation5_spill] sm:$0xff] %v10068_v34 }
  0x7b   :  { %722 = vmatmul.mubr.bf16.vlgmr.msra.gmra.mxu0 %v9809_v35 }
  0x7c   :  { %731 = vmatprep.mubr.bf16.mxu0 %v12717_v1 }
  0x83   :  { %732 = vmatmul.mubr.bf16.gmra.mxu0 %v9831_v45 }
  0x84   :  { %741 = vmatprep.mubr.bf16.mxu0 %v12717_v1 }
  0x8b   :  { %742 = vmatmul.mubr.bf16.gmra.mxu0 %v9855_v54 }
  0x8c   :  { %751 = vmatprep.mubr.bf16.mxu0 %v12717_v1 }
  0x93   :  { %752 = vmatmul.mubr.bf16.gmra.mxu0 %v9880_v63 }
  0x94   :  { %761 = vmatprep.mubr.bf16.mxu0 %v12717_v1 }
  0x9b   :  { %762 = vmatmul.mubr.bf16.gmra.mxu0 %v109_v9 }
  0x9c   :  { %771 = vmatprep.mubr.bf16.mxu0 %v12717_v1 }
  0xa3   :  { %772 = vmatmul.mubr.bf16.gmra.mxu0 %v110_v17 }
  0xa4   :  { %781 = vmatprep.mubr.bf16.mxu0 %v12717_v1 }
  0xab   :  { %782 = vmatmul.mubr.bf16.gmra.mxu0 %v111_v22 }
  0xac   :  { %791 = vmatprep.mubr.bf16.mxu0 %v12717_v1 }
  0xb3   :  { %792 = vmatmul.mubr.bf16.gmra.mxu0 %v112_v27 }
  0xb4   :  { %801 = vmatprep.mubr.bf16.mxu0 %v12717_v1 }
  0xbb   :  { %802 = vmatmul.mubr.bf16.gmra.mxu0 %v113_v32 }
  0xf3   :  { %v300_v35 = vpop.f32.mrf.mxu0 }
  0xf4   :  { %v503_v36 = vpop.f32.mrf.mxu1 }
  0xf5   :  { %v9969_v37 = vadd.f32 %v503_v36, %v300_v35  ;;  %v302_v38 = vpop.f32.mrf.mxu0  ;;  %v10075_v36 = vld [vmem:[%s12748_s11] sm:$0x3] }
  0xf6   :  { %v505_v39 = vpop.f32.mrf.mxu1 }
  0xf7   :  { %v9971_v40 = vadd.f32 %v505_v39, %v302_v38  ;;  %v304_v41 = vpop.f32.mrf.mxu0 }
  0xf8   :  { %v507_v42 = vpop.f32.mrf.mxu1 }
  0xf9   :  { %v9973_v43 = vadd.f32 %v507_v42, %v304_v41  ;;  %v9975_v44 = vpop.f32.mrf.mxu0  ;;  %v10082_v42 = vrot.slane %v10075_v36, %v10068_v34 }
  0xfa   :  { %12743 = vst [vmem:[#allocation2_spill] sm:$0xff] %v9975_v44  ;;  %v9977_v45 = vpop.f32.mrf.mxu1 }
  0xfb   :  { %12744 = vst [vmem:[#allocation3_spill] sm:$0xff] %v9977_v45  ;;  %v310_v46 = vpop.f32.mrf.mxu0 }
  0xfc   :  { %v513_v47 = vpop.f32.mrf.mxu1 }
  0xfd   :  { %v9979_v48 = vadd.f32 %v513_v47, %v310_v46  ;;  %v312_v49 = vpop.f32.mrf.mxu0 }
  0xfe   :  { %v515_v50 = vpop.f32.mrf.mxu1 }
  0xff   :  { %v9981_v51 = vadd.f32 %v515_v50, %v312_v49  ;;  %v314_v52 = vpop.f32.mrf.mxu0 }
 0x100   :  { %v517_v53 = vpop.f32.mrf.mxu1 }
 0x101   :  { %v9983_v54 = vadd.f32 %v517_v53, %v314_v52  ;;  %v9985_v55 = vpop.f32.mrf.mxu0 }
 0x102   :  { %v9997_v61 = vpop.f32.mrf.mxu1 }
 0x103   :  { %v9987_v56 = vpop.f32.mrf.mxu0 }
 0x104   :  { %v10003_v0 = vpop.f32.mrf.mxu1 }
 0x105   :  { %v9989_v57 = vpop.f32.mrf.mxu0 }
 0x106   :  { %v10009_v4 = vpop.f32.mrf.mxu1 }
 0x107   :  { %v9991_v58 = vpop.f32.mrf.mxu0 }
 0x108   :  { %v10015_v7 = vpop.f32.mrf.mxu1 }
 0x109   :  { %v9993_v59 = vpop.f32.mrf.mxu0 }
 0x10a   :  { %v10021_v10 = vpop.f32.mrf.mxu1 }
 0x10b   :  { %v9995_v60 = vpop.f32.mrf.mxu0 }
 0x10c   :  { %v10027_v13 = vpop.f32.mrf.mxu1 }
 0x10d   :  { %v9999_v62 = vpop.f32.mrf.mxu0 }
 0x10e   :  { %v10033_v16 = vpop.f32.mrf.mxu1 }
 0x10f   :  { %v10001_v63 = vpop.f32.mrf.mxu0 }
 0x110   :  { %v10039_v19 = vpop.f32.mrf.mxu1 }
 0x111   :  { %v10005_v2 = vpop.f32.mrf.mxu0 }
 0x112   :  { %v10045_v22 = vpop.f32.mrf.mxu1 }
 0x113   :  { %v10007_v3 = vpop.f32.mrf.mxu0 }
 0x114   :  { %v10051_v25 = vpop.f32.mrf.mxu1 }
 0x115   :  { %v10011_v5 = vpop.f32.mrf.mxu0 }
 0x116   :  { %v10057_v29 = vpop.f32.mrf.mxu1 }
 0x117   :  { %v10013_v6 = vpop.f32.mrf.mxu0 }
 0x118   :  { %v10065_v33 = vpop.f32.mrf.mxu1 }
 0x119   :  { %v10017_v8 = vpop.f32.mrf.mxu0 }
 0x11a   :  { %v10077_v39 = vpop.f32.mrf.mxu1 }
 0x11b   :  { %v10019_v9 = vpop.f32.mrf.mxu0 }
 0x11c   :  { %v10087_v50 = vpop.f32.mrf.mxu1 }
 0x11d   :  { %v10023_v11 = vpop.f32.mrf.mxu0 }
 0x11f   :  { %v10025_v12 = vpop.f32.mrf.mxu0 }
 0x121   :  { %v10029_v14 = vpop.f32.mrf.mxu0 }
 0x123   :  { %v10031_v15 = vpop.f32.mrf.mxu0 }
 0x125   :  { %v10035_v17 = vpop.f32.mrf.mxu0 }
 0x127   :  { %v10037_v18 = vpop.f32.mrf.mxu0 }
 0x129   :  { %v10041_v20 = vpop.f32.mrf.mxu0 }
 0x12b   :  { %v10043_v21 = vpop.f32.mrf.mxu0 }
 0x12d   :  { %v10047_v23 = vpop.f32.mrf.mxu0 }
 0x12f   :  { %v10049_v24 = vpop.f32.mrf.mxu0 }
 0x131   :  { %v10053_v27 = vpop.f32.mrf.mxu0 }
 0x133   :  { %v10055_v28 = vpop.f32.mrf.mxu0 }
 0x135   :  { %v10061_v31 = vpop.f32.mrf.mxu0 }
 0x137   :  { %v10063_v32 = vpop.f32.mrf.mxu0 }
 0x139   :  { %v10070_v35 = vpop.f32.mrf.mxu0 }
 0x13a   :  { %12747 = vst [vmem:[#allocation6_spill] sm:$0xff] %v10070_v35 }
 0x13b   :  { %v723_v38 = vpop.f32.mrf.mxu0 }
 0x13c   :  { %v812_v41 = vadd.f32 %v723_v38, %v9969_v37  ;;  %v10094_v38 = vpop.f32.mrf.mxu1 }
 0x13d   :  { %v725_v46 = vpop.f32.mrf.mxu0 }
 0x13e   :  { %v10085_v47 = vadd.f32 %v725_v46, %v9971_v40  ;;  %v860_v52 = vadd.f32 %v10082_v42, %v812_v41 }
 0x13f   :  { %v727_v49 = vpop.f32.mrf.mxu0 }
 0x140   :  { %12749 = vst [vmem:[#allocation7_spill] sm:$0xff] %v10085_v47  ;;  %v814_v53 = vadd.f32 %v727_v49, %v9973_v43  ;;  %v896_v34 = vmax.f32 %v860_v52, 0.0  ;;  %v557_v49 = vpop.f32.mrf.mxu1 }
 0x141   :  { %v10091_v26 = vpop.f32.mrf.mxu0 }
 0x142   :  { %12750 = vst [vmem:[#allocation8_spill] sm:$0xff] %v10091_v26  ;;  %v862_v1 = vadd.f32 %v10082_v42, %v814_v53 }
 0x143   :  { %v733_v37 = vpop.f32.mrf.mxu0 }
 0x144   :  { %v898_v35 = vmax.f32 %v862_v1, 0.0  ;;  %v816_v45 = vadd.f32 %v733_v37, %v9979_v48  ;;  %v524_v1 = vadd.f32 %v10003_v0, %v9987_v56  ;;  %v10111_v37 = vpop.f32.mrf.mxu1 }
 0x145   :  { %v735_v40 = vpop.f32.mrf.mxu0 }
 0x146   :  { %v10097_v46 = vmax.f32 %v896_v34, %v898_v35  ;;  %v864_v47 = vadd.f32 %v10082_v42, %v816_v45  ;;  %v10101_v41 = vadd.f32 %v735_v40, %v9981_v51  ;;  %v563_v56 = vpop.f32.mrf.mxu1 }
 0x147   :  { %v737_v43 = vpop.f32.mrf.mxu0 }
 0x148   :  { %12751 = vst [vmem:[#allocation9_spill] sm:$0xff] %v10097_v46  ;;  %12752 = vst [vmem:[#allocation10_spill] sm:$0xff] %v10101_v41  ;;  %v900_v26 = vmax.f32 %v864_v47, 0.0  ;;  %v818_v53 = vadd.f32 %v737_v43, %v9983_v54  ;;  %v528_v47 = vadd.f32 %v10015_v7, %v9991_v58  ;;  %v565_v41 = vpop.f32.mrf.mxu1 }
 0x149   :  { %v10104_v44 = vpop.f32.mrf.mxu0 }
 0x14a   :  { %12753 = vst [vmem:[#allocation11_spill] sm:$0xff] %v10104_v44  ;;  %v10108_v52 = vmax.f32 %v898_v35, %v900_v26  ;;  %v866_v48 = vadd.f32 %v10082_v42, %v818_v53  ;;  %v534_v53 = vadd.f32 %v10027_v13, %v9995_v60 }
 0x14b   :  { %v743_v34 = vpop.f32.mrf.mxu0 }
 0x14c   :  { %12754 = vst [vmem:[#allocation12_spill] sm:$0xff] %v10108_v52  ;;  %v902_v45 = vmax.f32 %v866_v48, 0.0  ;;  %v820_v51 = vadd.f32 %v743_v34, %v524_v1 }
 0x14d   :  { %v10113_v40 = vpop.f32.mrf.mxu0 }
 0x14e   :  { %v10117_v54 = vmax.f32 %v900_v26, %v902_v45  ;;  %v868_v43 = vadd.f32 %v10082_v42, %v820_v51  ;;  %v538_v51 = vadd.f32 %v10039_v19, %v10001_v63 }
 0x14f   :  { %v747_v46 = vpop.f32.mrf.mxu0 }
 0x150   :  { %12755 = vst [vmem:[#allocation13_spill] sm:$0xff] %v10117_v54  ;;  %v904_v0 = vmax.f32 %v868_v43, 0.0  ;;  %v822_v35 = vadd.f32 %v747_v46, %v528_v47  ;;  %v567_v54 = vpop.f32.mrf.mxu1 }
 0x151   :  { %v10120_v52 = vpop.f32.mrf.mxu0 }
 0x152   :  { %12756 = vst [vmem:[#allocation14_spill] sm:$0xff] %v10120_v52  ;;  %v10124_v48 = vmax.f32 %v902_v45, %v904_v0  ;;  %v870_v1 = vadd.f32 %v10082_v42, %v822_v35  ;;  %v544_v35 = vadd.f32 %v10051_v25, %v10007_v3 }
 0x153   :  { %v753_v34 = vpop.f32.mrf.mxu0 }
 0x154   :  { %12757 = vst [vmem:[#allocation15_spill] sm:$0xff] %v10124_v48  ;;  %v906_v58 = vmax.f32 %v870_v1, 0.0  ;;  %v824_v7 = vadd.f32 %v753_v34, %v534_v53  ;;  %v569_v48 = vpop.f32.mrf.mxu1 }
 0x155   :  { %v10127_v26 = vpop.f32.mrf.mxu0 }
 0x156   :  { %v10131_v43 = vmax.f32 %v904_v0, %v906_v58  ;;  %v872_v46 = vadd.f32 %v10082_v42, %v824_v7  ;;  %v548_v7 = vadd.f32 %v10065_v33, %v10013_v6 }
 0x157   :  { %v757_v47 = vpop.f32.mrf.mxu0 }
 0x158   :  { %12758 = vst [vmem:[#allocation16_spill] sm:$0xff] %v10131_v43  ;;  %v908_v60 = vmax.f32 %v872_v46, 0.0  ;;  %v826_v13 = vadd.f32 %v757_v47, %v538_v51  ;;  %v573_v43 = vpop.f32.mrf.mxu1 }
 0x159   :  { %v10134_v45 = vpop.f32.mrf.mxu0 }
 0x15a   :  { %v10138_v1 = vmax.f32 %v906_v58, %v908_v60  ;;  %v874_v53 = vadd.f32 %v10082_v42, %v826_v13  ;;  %v554_v13 = vadd.f32 %v10087_v50, %v10019_v9  ;;  %v564_v50 = vadd.f32 %v563_v56, %v10031_v15 }
 0x15b   :  { %v763_v34 = vpop.f32.mrf.mxu0 }
 0x15c   :  { %12759 = vst [vmem:[#allocation17_spill] sm:$0xff] %v10138_v1  ;;  %v910_v63 = vmax.f32 %v874_v53, 0.0  ;;  %v828_v19 = vadd.f32 %v763_v34, %v544_v35  ;;  %v575_v1 = vpop.f32.mrf.mxu1 }
 0x15d   :  { %v10141_v0 = vpop.f32.mrf.mxu0 }
 0x15e   :  { %v10145_v46 = vmax.f32 %v908_v60, %v910_v63  ;;  %v876_v51 = vadd.f32 %v10082_v42, %v828_v19  ;;  %v558_v19 = vadd.f32 %v557_v49, %v10025_v12  ;;  %v566_v12 = vadd.f32 %v565_v41, %v10035_v17 }
 0x15f   :  { %v767_v47 = vpop.f32.mrf.mxu0 }
 0x160   :  { %12760 = vst [vmem:[#allocation18_spill] sm:$0xff] %v10145_v46  ;;  %v912_v3 = vmax.f32 %v876_v51, 0.0  ;;  %v830_v25 = vadd.f32 %v767_v47, %v548_v7  ;;  %v577_v47 = vpop.f32.mrf.mxu1 }
 0x161   :  { %v10148_v58 = vpop.f32.mrf.mxu0 }
 0x162   :  { %v10152_v53 = vmax.f32 %v910_v63, %v912_v3  ;;  %v878_v35 = vadd.f32 %v10082_v42, %v830_v25  ;;  %v579_v49 = vpop.f32.mrf.mxu1 }
 0x163   :  { %v773_v34 = vpop.f32.mrf.mxu0 }
 0x164   :  { %v914_v6 = vmax.f32 %v878_v35, 0.0  ;;  %v832_v33 = vadd.f32 %v773_v34, %v554_v13  ;;  %v10164_v13 = vsub.s32 1, %v10059_v30  ;;  %v583_v30 = vpop.f32.mrf.mxu1 }
 0x165   :  { %v775_v60 = vpop.f32.mrf.mxu0 }
 0x166   :  { %v10156_v46 = vmax.f32 %v912_v3, %v914_v6  ;;  %v880_v7 = vadd.f32 %v10082_v42, %v832_v33 }
 0x167   :  { %v777_v51 = vpop.f32.mrf.mxu0 }
 0x168   :  { %v916_v44 = vmax.f32 %v880_v7, 0.0  ;;  %v834_v52 = vadd.f32 %v777_v51, %v558_v19  ;;  %v568_v7 = vadd.f32 %v567_v54, %v10037_v18  ;;  %v570_v51 = vadd.f32 %v569_v48, %v10041_v20 }
 0x169   :  { %v779_v9 = vpop.f32.mrf.mxu0 }
 0x16a   :  { %v10160_v63 = vmax.f32 %v914_v6, %v916_v44  ;;  %v882_v25 = vadd.f32 %v10082_v42, %v834_v52  ;;  %v10173_v52 = vrot.slane %v10075_v36, %v10164_v13  ;;  %v574_v36 = vadd.f32 %v573_v43, %v10043_v21  ;;  %v585_v43 = vpop.f32.mrf.mxu1 }
 0x16b   :  { %v783_v35 = vpop.f32.mrf.mxu0  ;;  %v576_v21 = vadd.f32 %v575_v1, %v10047_v23  ;;  %v546_v23 = vadd.f32 %v10057_v29, %v10011_v5  ;;  %v550_v1 = vadd.f32 %v10077_v39, %v10017_v8 }
 0x16c   :  { %v918_v3 = vmax.f32 %v882_v25, 0.0  ;;  %v836_v34 = vadd.f32 %v783_v35, %v564_v50  ;;  %v10178_v50 = vadd.f32 %v9997_v61, %v9985_v55  ;;  %v10193_v35 = vadd.f32 %v10021_v10, %v9993_v59 }
 0x16d   :  { %v785_v33 = vpop.f32.mrf.mxu0  ;;  %v536_v55 = vadd.f32 %v10033_v16, %v9999_v62  ;;  %v560_v61 = vadd.f32 %v10111_v37, %v10029_v14  ;;  %v556_v59 = vadd.f32 %v10094_v38, %v10023_v11  ;;  %v578_v10 = vadd.f32 %v577_v47, %v10049_v24  ;;  %v587_v47 = vpop.f32.mrf.mxu1 }
 0x16e   :  { %v10168_v19 = vmax.f32 %v916_v44, %v918_v3  ;;  %v884_v15 = vadd.f32 %v10082_v42, %v836_v34  ;;  %v837_v56 = vadd.f32 %v785_v33, %v566_v12  ;;  %v10182_v44 = vadd.f32 %v10009_v4, %v9989_v57 }
 0x16f   :  { %v787_v6 = vpop.f32.mrf.mxu0  ;;  %v540_v57 = vadd.f32 %v10045_v22, %v10005_v2  ;;  %v835_v62 = vadd.f32 %v779_v9, %v560_v61  ;;  %v580_v11 = vadd.f32 %v579_v49, %v10053_v27  ;;  %v833_v38 = vadd.f32 %v775_v60, %v556_v59 }
 0x170   :  { %v920_v17 = vmax.f32 %v884_v15, 0.0  ;;  %v838_v41 = vadd.f32 %v787_v6, %v568_v7  ;;  %v10185_v18 = vadd.f32 %v10173_v52, %v837_v56  ;;  %v584_v6 = vadd.f32 %v583_v30, %v10055_v28 }
 0x171   :  { %v789_v54 = vpop.f32.mrf.mxu0  ;;  %v831_v5 = vadd.f32 %v10148_v58, %v550_v1  ;;  %v10222_v29 = vadd.f32 %v10173_v52, %v835_v62  ;;  %v881_v28 = vadd.f32 %v10173_v52, %v833_v38 }
 0x172   :  { %v10188_v25 = vmax.f32 %v918_v3, %v920_v17  ;;  %v886_v20 = vadd.f32 %v10082_v42, %v838_v41  ;;  %v839_v48 = vadd.f32 %v789_v54, %v570_v51  ;;  %v921_v16 = vmax.f32 %v10185_v18, 0.0 }
 0x173   :  { %v793_v4 = vpop.f32.mrf.mxu0  ;;  %v586_v51 = vadd.f32 %v585_v43, %v10061_v31  ;;  %v829_v41 = vadd.f32 %v10141_v0, %v546_v23  ;;  %v919_v0 = vmax.f32 %v10222_v29, 0.0 }
 0x174   :  { %v922_v12 = vmax.f32 %v886_v20, 0.0  ;;  %v887_v3 = vadd.f32 %v10173_v52, %v839_v48  ;;  %v840_v34 = vadd.f32 %v793_v4, %v574_v36  ;;  %v825_v20 = vadd.f32 %v10127_v26, %v536_v55 }
 0x175   :  { %v795_v2 = vpop.f32.mrf.mxu0  ;;  %v827_v48 = vadd.f32 %v10134_v45, %v540_v57  ;;  %v917_v26 = vmax.f32 %v881_v28, 0.0  ;;  %v10244_v55 = vmax.f32 %v919_v0, %v921_v16  ;;  %v12765_v28 = vld [vmem:[#allocation8_spill] sm:$0xff] }
 0x176   :  { %v923_v22 = vmax.f32 %v887_v3, 0.0  ;;  %v888_v14 = vadd.f32 %v10082_v42, %v840_v34  ;;  %v841_v37 = vadd.f32 %v795_v2, %v576_v21  ;;  %v10208_v33 = vmax.f32 %v920_v17, %v922_v12 }
 0x177   :  { %v797_v24 = vpop.f32.mrf.mxu0  ;;  %v588_v17 = vadd.f32 %v587_v47, %v10063_v32  ;;  %v879_v32 = vadd.f32 %v10173_v52, %v831_v5  ;;  %v877_v3 = vadd.f32 %v10173_v52, %v829_v41  ;;  %v821_v2 = vadd.f32 %v10113_v40, %v10182_v44  ;;  %v12764_v5 = vld [vmem:[#allocation3_spill] sm:$0xff] }
 0x178   :  { %v924_v9 = vmax.f32 %v888_v14, 0.0  ;;  %v889_v7 = vadd.f32 %v10173_v52, %v841_v37  ;;  %v842_v15 = vadd.f32 %v797_v24, %v578_v10  ;;  %v10216_v56 = vmax.f32 %v921_v16, %v923_v22 }
 0x179   :  { %v799_v8 = vpop.f32.mrf.mxu0  ;;  %v875_v37 = vadd.f32 %v10173_v52, %v827_v48  ;;  %v915_v16 = vmax.f32 %v879_v32, 0.0  ;;  %v873_v23 = vadd.f32 %v10173_v52, %v825_v20  ;;  %v913_v24 = vmax.f32 %v877_v3, 0.0 }
 0x17a   :  { %v10224_v27 = vmax.f32 %v922_v12, %v924_v9  ;;  %v925_v39 = vmax.f32 %v889_v7, 0.0  ;;  %v890_v60 = vadd.f32 %v10082_v42, %v842_v15  ;;  %v843_v49 = vadd.f32 %v799_v8, %v580_v11  ;;  %v12762_v7 = vld [vmem:[#allocation11_spill] sm:$0xff] }
 0x17b   :  { %v803_v30 = vpop.f32.mrf.mxu0  ;;  %v8660_v31 = vpack.i.bf16 %v10216_v56, %v10208_v33  ;;  %v10264_v47 = vmax.f32 %v915_v16, %v917_v26  ;;  %v8675_v40 = vpack.i.bf16 %v10244_v55, %v10188_v25  ;;  %v819_v15 = vadd.f32 %v12762_v7, %v10178_v50  ;;  %v12771_v7 = vld [vmem:[#allocation7_spill] sm:$0xff] }
 0x17c   :  { %v10232_v58 = vmax.f32 %v923_v22, %v925_v39  ;;  %v926_v18 = vmax.f32 %v890_v60, 0.0  ;;  %v891_v54 = vadd.f32 %v10173_v52, %v843_v49  ;;  %v844_v36 = vadd.f32 %v803_v30, %v584_v6  ;;  %v12761_v22 = vld [vmem:[#allocation14_spill] sm:$0xff] }
 0x17d   :  { %8661 = vrot.lane.b32.xlu1 %v8660_v31, %s9566_s2  ;;  %v805_v61 = vpop.f32.mrf.mxu0  ;;  %v823_v14 = vadd.f32 %v12761_v22, %v10193_v35  ;;  %v869_v8 = vadd.f32 %v10173_v52, %v821_v2  ;;  %v909_v49 = vmax.f32 %v873_v23, 0.0  ;;  %v8685_v50 = vpack.i.bf16 %v10264_v47, %v10160_v63 }
 0x17e   :  { %v927_v4 = vmax.f32 %v891_v54, 0.0  ;;  %v892_v21 = vadd.f32 %v10082_v42, %v844_v36  ;;  %v845_v43 = vadd.f32 %v805_v61, %v586_v51  ;;  %v8665_v12 = vpack.i.bf16 %v10232_v58, %v10224_v27  ;;  %v12763_v51 = vld [vmem:[#allocation2_spill] sm:$0xff] }
 0x17f   :  { %v807_v45 = vpop.f32.mrf.mxu0  ;;  %v10246_v57 = vmax.f32 %v924_v9, %v926_v18  ;;  %v871_v6 = vadd.f32 %v10173_v52, %v823_v14  ;;  %v510_v29 = vadd.f32 %v12764_v5, %v12763_v51  ;;  %v10290_v41 = vmax.f32 %v917_v26, %v919_v0  ;;  %v12766_v54 = vld [vmem:[#allocation10_spill] sm:$0xff]  ;;  %v12767_v26 = vld [vmem:[#allocation17_spill] sm:$0xff]  ;;  %v12773_v5 = vld [vmem:[#allocation16_spill] sm:$0xff] }
 0x180   :  { %v928_v34 = vmax.f32 %v892_v21, 0.0  ;;  %v10249_v59 = vadd.f32 %v10173_v52, %v845_v43  ;;  %v846_v10 = vadd.f32 %v807_v45, %v588_v17  ;;  %v10251_v62 = vmax.f32 %v925_v39, %v927_v4  ;;  %v589_v43 = vpop.f32.mrf.mxu1  ;;  %v12768_v14 = vld [vmem:[#allocation6_spill] sm:$0xff] }
 0x181   :  { %8666 = vrot.lane.b32.xlu1 %v8665_v12, %s9566_s2  ;;  %v815_v30 = vadd.f32 %v12765_v28, %v510_v29  ;;  %v867_v31 = vadd.f32 %v10173_v52, %v819_v15  ;;  %v865_v36 = vadd.f32 %v10173_v52, %v12766_v54  ;;  %v905_v20 = vmax.f32 %v869_v8, 0.0  ;;  %v809_v22 = vpop.f32.mrf.mxu0 }
 0x182   :  { %v10260_v1 = vmax.f32 %v926_v18, %v928_v34  ;;  %v929_v11 = vmax.f32 %v10249_v59, 0.0  ;;  %v894_v38 = vadd.f32 %v10082_v42, %v846_v10  ;;  %v8650_v44 = vpack.i.bf16 %v10251_v62, %v10246_v57  ;;  %v8980_v59 = vld [vmem:[%s12777_s4 + $0x1e8] ss:$12 sps:$4 sm:$0xff]  }
 0x183   :  { %v911_v42 = vmax.f32 %v875_v37, 0.0  ;;  %v907_v18 = vmax.f32 %v871_v6, 0.0  ;;  %v8670_v0 = vpack.i.bf16 %v10290_v41, %v10168_v19  ;;  %v10304_v61 = vmax.f32 %v913_v24, %v915_v16  ;;  %1860 = vmatpush1.bf16.msra.mxu0 %v8980_v59 }
 0x184   :  { %v10272_v35 = vmax.f32 %v927_v4, %v929_v11  ;;  %v930_v9 = vmax.f32 %v894_v38, 0.0  ;;  %8651 = vrot.lane.b32.xlu0 %v8650_v44, %s9566_s2  ;;  %v863_v4 = vadd.f32 %v10173_v52, %v815_v30  ;;  %v903_v21 = vmax.f32 %v867_v31, 0.0  ;;  %v12769_v38 = vld [vmem:[#allocation15_spill] sm:$0xff] }
 0x185   :  { %8676 = vrot.lane.b32.xlu1 %v8675_v40, %s9566_s2  ;;  %v10286_v17 = vmax.f32 %v911_v42, %v913_v24  ;;  %v10298_v48 = vmax.f32 %v907_v18, %v909_v49  ;;  %v901_v12 = vmax.f32 %v865_v36, 0.0  ;;  %v10315_v10 = vmax.f32 %v909_v49, %v911_v42  ;;  %v12770_v40 = vld [vmem:[#allocation18_spill] sm:$0xff]  ;;  %v12772_v42 = vld [vmem:[#allocation12_spill] sm:$0xff] }
 0x186   :  { %v10282_v39 = vmax.f32 %v928_v34, %v930_v9  ;;  %v8655_v60 = vpack.i.bf16 %v10272_v35, %v10260_v1  ;;  %v10309_v3 = vmax.f32 %v903_v21, %v905_v20  ;;  %v8680_v34 = vpack.i.bf16 %v10304_v61, %v10156_v46  ;;  %v8959_v36 = vld [vmem:[%s12776_s1 + $0x4] ss:$8 sps:$4 sm:$0xff]  }
 0x187   :  { %v8695_v32 = vpack.i.bf16 %v10286_v17, %v10152_v53  ;;  %v8705_v45 = vpack.i.bf16 %v10298_v48, %v12767_v26  ;;  %v899_v2 = vmax.f32 %v863_v4, 0.0  ;;  %v590_v37 = vadd.f32 %v589_v43, %v12768_v14  ;;  %7474 = vmatprep.mubr.msk.bf16.mxu1 %vm1245_vm1, %v8959_v36  ;;  %v8996_v4 = vld [vmem:[%s12777_s4 + $0x188] ss:$12 sps:$4 sm:$0xff]   ;;  %v9004_v43 = vld [vmem:[%s12777_s4 + $0x158] ss:$12 sps:$4 sm:$0xff]  }
 0x188   :  { %8656 = vrot.lane.b32.xlu0 %v8655_v60, %s9566_s2  ;;  %v8715_v24 = vpack.i.bf16 %v10309_v3, %v12769_v38  ;;  %v8690_v44 = vpack.i.bf16 %v10315_v10, %v12770_v40  ;;  %v10326_v9 = vmax.f32 %v905_v20, %v907_v18  ;;  %v861_v15 = vadd.f32 %v10173_v52, %v12771_v7 }
 0x189   :  { %8686 = vrot.lane.b32.xlu1 %v8685_v50, %s9566_s2  ;;  %v10320_v16 = vmax.f32 %v899_v2, %v901_v12  ;;  %v847_v23 = vadd.f32 %v809_v22, %v590_v37  ;;  %v10337_v8 = vmax.f32 %v901_v12, %v903_v21  ;;  %v12774_v50 = vld [vmem:[#allocation13_spill] sm:$0xff]  ;;  %v12778_v20 = vmov 0  }
 0x18a   :  { %v8700_v29 = vpack.i.bf16 %v10326_v9, %v12773_v5  ;;  %v897_v60 = vmax.f32 %v861_v15, 0.0  ;;  %1861 = vmatprep.subr.bf16.mxu0 %v12778_v20  ;;  %v9000_v21 = vld [vmem:[%s12777_s4 + $0x170] ss:$12 sps:$4 sm:$0xff]  }
 0x18b   :  { %v895_v6 = vadd.f32 %v10173_v52, %v847_v23  ;;  %v8725_v51 = vpack.i.bf16 %v10320_v16, %v12772_v42  ;;  %v8710_v28 = vpack.i.bf16 %v10337_v8, %v12774_v50  ;;  %v12775_v52 = vld [vmem:[#allocation9_spill] sm:$0xff] }
 0x18c   :  { %8671 = vrot.lane.b32.xlu0 %v8670_v0, %s9566_s2  ;;  %v10343_v30 = vmax.f32 %v897_v60, %v899_v2  ;;  %v8992_v0 = vld [vmem:[%s12777_s4 + $0x1a0] ss:$12 sps:$4 sm:$0xff]  }
 0x18d   :  { %8696 = vrot.lane.b32.xlu1 %v8695_v32, %s9566_s2  ;;  %v931_v49 = vmax.f32 %v895_v6, 0.0  ;;  %v8988_v32 = vld [vmem:[%s12777_s4 + $0x1b8] ss:$12 sps:$4 sm:$0xff]  }
 0x18e   :  { %v8720_v31 = vpack.i.bf16 %v10343_v30, %v12775_v52 }
 0x18f   :  { %v10350_v18 = vmax.f32 %v929_v11, %v931_v49  ;;  %v8984_v11 = vld [vmem:[%s12777_s4 + $0x1d0] ss:$12 sps:$4 sm:$0xff]  }
 0x190   :  { %8681 = vrot.lane.b32.xlu0 %v8680_v34, %s9566_s2  ;;  %1862 = vmatpush1.bf16.msra.mxu0 %v8984_v11 }
 0x191   :  { %8706 = vrot.lane.b32.xlu1 %v8705_v45, %s9566_s2  ;;  %v8730_v54 = vpack.i.bf16 %v10350_v18, %v10282_v39  ;;  %1863 = vmatprep.subr.bf16.mxu0 %v12778_v20  ;;  %v9008_v45 = vld [vmem:[%s12777_s4 + $0x140] ss:$12 sps:$4 sm:$0xff]  }
 0x194   :  { %8691 = vrot.lane.b32.xlu0 %v8690_v44, %s9566_s2  ;;  %1864 = vmatpush1.bf16.msra.mxu0 %v8988_v32 }
 0x195   :  { %8716 = vrot.lane.b32.xlu1 %v8715_v24, %s9566_s2  ;;  %1865 = vmatprep.subr.bf16.mxu0 %v12778_v20 }
 0x198   :  { %8701 = vrot.lane.b32.xlu0 %v8700_v29, %s9566_s2  ;;  %1866 = vmatpush1.bf16.msra.mxu0 %v8992_v0 }
 0x199   :  { %8726 = vrot.lane.b32.xlu1 %v8725_v51, %s9566_s2  ;;  %1867 = vmatprep.subr.bf16.mxu0 %v12778_v20 }
 0x19c   :  { %8711 = vrot.lane.b32.xlu0 %v8710_v28, %s9566_s2  ;;  %1868 = vmatpush1.bf16.msra.mxu0 %v8996_v4 }
 0x19d   :  { %1869 = vmatprep.subr.bf16.mxu0 %v12778_v20 }
 0x1a0   :  { %8721 = vrot.lane.b32.xlu0 %v8720_v31, %s9566_s2  ;;  %1870 = vmatpush1.bf16.msra.mxu0 %v9000_v21 }
 0x1a1   :  { %1871 = vmatprep.subr.bf16.mxu0 %v12778_v20 }
 0x1a4   :  { %8731 = vrot.lane.b32.xlu0 %v8730_v54, %s9566_s2  ;;  %1872 = vmatpush1.bf16.msra.mxu0 %v9004_v43 }
 0x1a5   :  { %1873 = vmatprep.subr.bf16.mxu0 %v12778_v20 }
 0x1a8   :  { %1874 = vmatpush1.bf16.msra.mxu0 %v9008_v45 }
 0x1a9   :  { %1881 = vmatprep.subr.bf16.mxu0 %v12778_v20 }
 0x1ef   :  { %v8662_v12 = vpop.permute.xlu1 %8661 }
 0x1f0   :  { %v8664_v24 = vunpack.i.h.bf16 %v8662_v12  ;;  %v8663_v6 = vunpack.i.l.bf16 %v8662_v12 }
 0x1f2   :  { %v1145_v0 = vmax.f32 %v10216_v56, %v8664_v24  ;;  %v1081_v4 = vsel %vm1068_vm2, %v8663_v6, %v8664_v24 }
 0x1f3   :  { %v8667_v34 = vpop.permute.xlu1 %8666  ;;  %v1144_v56 = vmax.f32 %v10208_v33, %v1081_v4 }
 0x1f4   :  { %v8669_v23 = vunpack.i.h.bf16 %v8667_v34  ;;  %v8668_v44 = vunpack.i.l.bf16 %v8667_v34 }
 0x1f6   :  { %v8652_v22 = vpop.permute.xlu0 %8651  ;;  %v1147_v49 = vmax.f32 %v10232_v58, %v8669_v23  ;;  %v1082_v54 = vsel %vm1068_vm2, %v8668_v44, %v8669_v23 }
 0x1f7   :  { %v8677_v2 = vpop.permute.xlu1 %8676  ;;  %v8654_v14 = vunpack.i.h.bf16 %v8652_v22  ;;  %v8653_v37 = vunpack.i.l.bf16 %v8652_v22  ;;  %v1146_v22 = vmax.f32 %v10224_v27, %v1082_v54 }
 0x1f8   :  { %v8679_v12 = vunpack.i.h.bf16 %v8677_v2 }
 0x1f9   :  { %v1083_v51 = vsel %vm1068_vm2, %v8653_v37, %v8654_v14  ;;  %v1149_v36 = vmax.f32 %v10251_v62, %v8654_v14  ;;  %v1180_v14 = vpack.c.bf16 %v1147_v49, %v1145_v0  ;;  %v1179_v6 = vpack.c.bf16 %v1146_v22, %v1144_v56 }
 0x1fa   :  { %v8657_v15 = vpop.permute.xlu0 %8656  ;;  %v1148_v59 = vmax.f32 %v10246_v57, %v1083_v51  ;;  %v1143_v24 = vmax.f32 %v10244_v55, %v8679_v12 }
 0x1fb   :  { %v8687_v7 = vpop.permute.xlu1 %8686  ;;  %v8659_v29 = vunpack.i.h.bf16 %v8657_v15  ;;  %v8658_v60 = vunpack.i.l.bf16 %v8657_v15 }
 0x1fc   :  { %v8689_v44 = vunpack.i.h.bf16 %v8687_v7  ;;  %v8688_v15 = vunpack.i.l.bf16 %v8687_v7 }
 0x1fd   :  { %v1151_v28 = vmax.f32 %v10272_v35, %v8659_v29  ;;  %v1084_v31 = vsel %vm1068_vm2, %v8658_v60, %v8659_v29  ;;  %v8678_v35 = vunpack.i.l.bf16 %v8677_v2 }
 0x1fe   :  { %v1150_v11 = vmax.f32 %v10260_v1, %v1084_v31  ;;  %v8672_v32 = vpop.permute.xlu0 %8671  ;;  %v1139_v55 = vmax.f32 %v10264_v47, %v8689_v44  ;;  %v1078_v7 = vsel %vm1068_vm2, %v8688_v15, %v8689_v44 }
 0x1ff   :  { %v8697_v21 = vpop.permute.xlu1 %8696  ;;  %v8674_v43 = vunpack.i.h.bf16 %v8672_v32  ;;  %v8673_v58 = vunpack.i.l.bf16 %v8672_v32  ;;  %v1182_v45 = vpack.c.bf16 %v1151_v28, %v1149_v36  ;;  %v1080_v2 = vsel %vm1068_vm2, %v8678_v35, %v8679_v12 }
 0x200   :  { %v1181_v34 = vpack.c.bf16 %v1150_v11, %v1148_v59  ;;  %v1142_v49 = vmax.f32 %v10188_v25, %v1080_v2  ;;  %v8699_v54 = vunpack.i.h.bf16 %v8697_v21  ;;  %v8698_v36 = vunpack.i.l.bf16 %v8697_v21 }
 0x201   :  { %v1141_v62 = vmax.f32 %v10290_v41, %v8674_v43  ;;  %v1079_v57 = vsel %vm1068_vm2, %v8673_v58, %v8674_v43  ;;  %1274 = vmatprep.subr.bf16.mxu1 %v1182_v45  ;;  %v1138_v25 = vmax.f32 %v10160_v63, %v1078_v7 }
 0x202   :  { %v8682_v1 = vpop.permute.xlu0 %8681  ;;  %1275 = vmatpush1.bf16.msra.mxu1 %v1181_v34  ;;  %v1140_v27 = vmax.f32 %v10168_v19, %v1079_v57  ;;  %v1135_v47 = vmax.f32 %v10286_v17, %v8699_v54  ;;  %v1076_v21 = vsel %vm1068_vm2, %v8698_v36, %v8699_v54 }
 0x203   :  { %v8684_v37 = vunpack.i.h.bf16 %v8682_v1  ;;  %v8683_v23 = vunpack.i.l.bf16 %v8682_v1  ;;  %1276 = vmatprep.subr.bf16.mxu1 %v1180_v14  ;;  %v8707_v41 = vpop.permute.xlu1 %8706  ;;  %v1178_v33 = vpack.c.bf16 %v1143_v24, %v1141_v62  ;;  %v1134_v62 = vmax.f32 %v10152_v53, %v1076_v21  ;;  %v8991_v21 = vld [vmem:[%s12777_s4 + $0x19c] ss:$12 sps:$4 sm:$0xff]  }
 0x204   :  { %v1177_v59 = vpack.c.bf16 %v1142_v49, %v1140_v27  ;;  %v8709_v12 = vunpack.i.h.bf16 %v8707_v41  ;;  %v8708_v35 = vunpack.i.l.bf16 %v8707_v41 }
 0x205   :  { %v1137_v51 = vmax.f32 %v10304_v61, %v8684_v37  ;;  %v1077_v29 = vsel %vm1068_vm2, %v8683_v23, %v8684_v37 }
 0x206   :  { %v8692_v60 = vpop.permute.xlu0 %8691  ;;  %1277 = vmatpush1.bf16.msra.mxu1 %v1179_v6  ;;  %v1136_v19 = vmax.f32 %v10156_v46, %v1077_v29  ;;  %v1131_v17 = vmax.f32 %v10298_v48, %v8709_v12  ;;  %v1074_v14 = vsel %vm1068_vm2, %v8708_v35, %v8709_v12  ;;  %v8989_v12 = vld [vmem:[%s12777_s4 + $0x198] ss:$12 sps:$4 sm:$0xff]  }
 0x207   :  { %v8694_v28 = vunpack.i.h.bf16 %v8692_v60  ;;  %v8693_v31 = vunpack.i.l.bf16 %v8692_v60  ;;  %1278 = vmatprep.subr.bf16.mxu1 %v1178_v33  ;;  %v1176_v0 = vpack.c.bf16 %v1139_v55, %v1137_v51  ;;  %v8717_v4 = vpop.permute.xlu1 %8716  ;;  %v1130_v15 = vmax.f32 %v12767_v26, %v1074_v14  ;;  %v8995_v35 = vld [vmem:[%s12777_s4 + $0x184] ss:$12 sps:$4 sm:$0xff]  }
 0x208   :  { %v8719_v56 = vunpack.i.h.bf16 %v8717_v4  ;;  %v8718_v37 = vunpack.i.l.bf16 %v8717_v4  ;;  %v8987_v4 = vld [vmem:[%s12777_s4 + $0x1b4] ss:$12 sps:$4 sm:$0xff]   ;;  %v9005_v14 = vld [vmem:[%s12777_s4 + $0x138] ss:$12 sps:$4 sm:$0xff]  }
 0x209   :  { %v1133_v61 = vmax.f32 %v10315_v10, %v8694_v28  ;;  %v1075_v11 = vsel %vm1068_vm2, %v8693_v31, %v8694_v28  ;;  %v1175_v10 = vpack.c.bf16 %v1138_v25, %v1136_v19  ;;  %v8981_v25 = vld [vmem:[%s12777_s4 + $0x1c8] ss:$12 sps:$4 sm:$0xff]  }
 0x20a   :  { %v8702_v32 = vpop.permute.xlu0 %8701  ;;  %1279 = vmatpush1.bf16.msra.mxu1 %v1177_v59  ;;  %v1132_v46 = vmax.f32 %v12770_v40, %v1075_v11  ;;  %v1127_v48 = vmax.f32 %v10309_v3, %v8719_v56  ;;  %v1072_v6 = vsel %vm1068_vm2, %v8718_v37, %v8719_v56  ;;  %v8971_v56 = vld [vmem:[%s12776_s1 + $0x40] ss:$8 sps:$4 sm:$0xff]   ;;  %v8972_v37 = vld [vmem:[%s12776_s1 + $0x54] ss:$8 sps:$4 sm:$0xff]  }
 0x20b   :  { %v8704_v43 = vunpack.i.h.bf16 %v8702_v32  ;;  %v8703_v58 = vunpack.i.l.bf16 %v8702_v32  ;;  %1280 = vmatprep.subr.bf16.mxu1 %v1176_v0  ;;  %v1174_v63 = vpack.c.bf16 %v1135_v47, %v1133_v61  ;;  %v8727_v40 = vpop.permute.xlu1 %8726  ;;  %v1126_v26 = vmax.f32 %v12769_v38, %v1072_v6  ;;  %v8983_v0 = vld [vmem:[%s12777_s4 + $0x1cc] ss:$12 sps:$4 sm:$0xff]   ;;  %v8985_v47 = vld [vmem:[%s12777_s4 + $0x1b0] ss:$12 sps:$4 sm:$0xff]   ;;  %v9016_v6 = vld [vmem:[%s12777_s4 + $0x248] ss:$12 sps:$4 sm:$0xff]  }
 0x20c   :  { %v8729_v51 = vunpack.i.h.bf16 %v8727_v40  ;;  %v8728_v29 = vunpack.i.l.bf16 %v8727_v40  ;;  %v1166_v40 = vld [vmem:[%s12776_s1 + $0x60] sm:$0xff] }
 0x20d   :  { %v1129_v45 = vmax.f32 %v10326_v9, %v8704_v43  ;;  %v1073_v34 = vsel %vm1068_vm2, %v8703_v58, %v8704_v43  ;;  %v1173_v9 = vpack.c.bf16 %v1134_v62, %v1132_v46  ;;  %v8962_v43 = vld [vmem:[%s12776_s1 + $0x10] ss:$8 sps:$4 sm:$0xff]   ;;  %v8963_v58 = vld [vmem:[%s12776_s1 + $0x24] ss:$8 sps:$4 sm:$0xff]   ;;  %v8965_v46 = vld [vmem:[%s12776_s1 + $0x20] ss:$8 sps:$4 sm:$0xff]  }
 0x20e   :  { %v8712_v22 = vpop.permute.xlu0 %8711  ;;  %1281 = vmatpush1.bf16.msra.mxu1 %v1175_v10  ;;  %v1128_v23 = vmax.f32 %v12773_v5, %v1073_v34  ;;  %v1123_v3 = vmax.f32 %v10320_v16, %v8729_v51  ;;  %v1070_v7 = vsel %vm1068_vm2, %v8728_v29, %v8729_v51  ;;  %v8966_v10 = vld [vmem:[%s12776_s1 + $0x34] ss:$8 sps:$4 sm:$0xff]   ;;  %v8999_v34 = vld [vmem:[%s12777_s4 + $0x16c] ss:$12 sps:$4 sm:$0xff]  }
 0x20f   :  { %v8714_v57 = vunpack.i.h.bf16 %v8712_v22  ;;  %v8713_v1 = vunpack.i.l.bf16 %v8712_v22  ;;  %1282 = vmatprep.subr.bf16.mxu1 %v1174_v63  ;;  %v1172_v53 = vpack.c.bf16 %v1131_v17, %v1129_v45  ;;  %v1122_v38 = vmax.f32 %v12772_v42, %v1070_v7  ;;  %v8960_v42 = vld [vmem:[%s12776_s1 + $0x14] ss:$8 sps:$4 sm:$0xff]   ;;  %v8993_v45 = vld [vmem:[%s12777_s4 + $0x180] ss:$12 sps:$4 sm:$0xff]   ;;  %v8968_v62 = vld [vmem:[%s12776_s1 + $0x30] ss:$8 sps:$4 sm:$0xff]  }
 0x210   :  { %v1171_v60 = vpack.c.bf16 %v1130_v15, %v1128_v23  ;;  %v8997_v22 = vld [vmem:[%s12777_s4 + $0x168] ss:$12 sps:$4 sm:$0xff]   ;;  %v8974_v23 = vld [vmem:[%s12776_s1 + $0x50] ss:$8 sps:$4 sm:$0xff]  }
 0x211   :  { %v1125_v24 = vmax.f32 %v10337_v8, %v8714_v57  ;;  %v1071_v2 = vsel %vm1068_vm2, %v8713_v1, %v8714_v57  ;;  %v9003_v63 = vld [vmem:[%s12777_s4 + $0x154] ss:$12 sps:$4 sm:$0xff]   ;;  %v8969_v57 = vld [vmem:[%s12776_s1 + $0x44] ss:$8 sps:$4 sm:$0xff]   ;;  %v9001_v1 = vld [vmem:[%s12777_s4 + $0x150] ss:$12 sps:$4 sm:$0xff]  }
 0x212   :  { %v8722_v44 = vpop.permute.xlu0 %8721  ;;  %1283 = vmatpush1.bf16.msra.mxu1 %v1173_v9  ;;  %v1124_v5 = vmax.f32 %v12774_v50, %v1071_v2  ;;  %v9007_v17 = vld [vmem:[%s12777_s4 + $0x13c] ss:$12 sps:$4 sm:$0xff]   ;;  %v7472_v9 = vcombine.high %v1166_v40, %v1166_v40  ;;  %v9019_v51 = vld [vmem:[%s12777_s4 + $0x22c] ss:$12 sps:$4 sm:$0xff]  }
 0x213   :  { %v8724_v27 = vunpack.i.h.bf16 %v8722_v44  ;;  %v8723_v41 = vunpack.i.l.bf16 %v8722_v44  ;;  %1284 = vmatprep.subr.bf16.mxu1 %v1172_v53  ;;  %v1170_v28 = vpack.c.bf16 %v1127_v48, %v1125_v24  ;;  %v7471_v24 = vcombine.low %v1166_v40, %v1166_v40  ;;  %v9009_v2 = vld [vmem:[%s12777_s4 + $0x25c] ss:$12 sps:$4 sm:$0x3f]   ;;  %v9011_v44 = vld [vmem:[%s12777_s4 + $0x258] ss:$12 sps:$4 sm:$0x3f]  }
 0x214   :  { %v1169_v36 = vpack.c.bf16 %v1126_v26, %v1124_v5  ;;  %v9012_v53 = vld [vmem:[%s12777_s4 + $0x260] ss:$12 sps:$4 sm:$0x3f]   ;;  %v1760_v15 = vsel %vm1758_vm3, %v9011_v44, 0  ;;  %v9017_v29 = vld [vmem:[%s12777_s4 + $0x228] ss:$12 sps:$4 sm:$0xff]  }
 0x215   :  { %v1121_v8 = vmax.f32 %v10343_v30, %v8724_v27  ;;  %v1069_v33 = vsel %vm1068_vm2, %v8723_v41, %v8724_v27  ;;  %v1766_v27 = vsel %vm1758_vm3, %v9012_v53, 0  ;;  %v9015_v41 = vld [vmem:[%s12777_s4 + $0x244] ss:$12 sps:$4 sm:$0xff]   ;;  %v9013_v48 = vld [vmem:[%s12777_s4 + $0x240] ss:$12 sps:$4 sm:$0xff]  }
 0x216   :  { %v8732_v49 = vpop.permute.xlu0 %8731  ;;  %1285 = vmatpush1.bf16.msra.mxu1 %v1171_v60  ;;  %v1120_v54 = vmax.f32 %v12775_v52, %v1069_v33  ;;  %v8979_v52 = vld [vmem:[%s12777_s4 + $0x1e4] ss:$12 sps:$4 sm:$0xff]   ;;  %1882 = vmatpush2.bf16.msra.mxu0 %v1766_v27  ;;  %v9023_v60 = vld [vmem:[%s12777_s4 + $0x214] ss:$12 sps:$4 sm:$0xff]   ;;  %v9047_v44 = vld [vmem:[%s12777_s4 + $0x4c] ss:$12 sps:$4 sm:$0xff]  }
 0x217   :  { %v8734_v31 = vunpack.i.h.bf16 %v8732_v49  ;;  %v8733_v55 = vunpack.i.l.bf16 %v8732_v49  ;;  %1286 = vmatprep.subr.bf16.mxu1 %v1170_v28  ;;  %v1168_v19 = vpack.c.bf16 %v1123_v3, %v1121_v8  ;;  %1883 = vmatprep.subr.bf16.mxu0 %v12778_v20  ;;  %v9020_v5 = vld [vmem:[%s12777_s4 + $0x230] ss:$12 sps:$4 sm:$0xff]   ;;  %v9024_v33 = vld [vmem:[%s12777_s4 + $0x218] ss:$12 sps:$4 sm:$0xff]   ;;  %v9028_v26 = vld [vmem:[%s12777_s4 + $0x200] ss:$12 sps:$4 sm:$0xff]  }
 0x218   :  { %v1167_v61 = vpack.c.bf16 %v1122_v38, %v1120_v54  ;;  %v9021_v8 = vld [vmem:[%s12777_s4 + $0x210] ss:$12 sps:$4 sm:$0xff]   ;;  %v9025_v28 = vld [vmem:[%s12777_s4 + $0x1f8] ss:$12 sps:$4 sm:$0xff]  }
 0x219   :  { %v1085_v50 = vsel %vm1068_vm2, %v8733_v55, %v8734_v31  ;;  %v1153_v30 = vmax.f32 %v10350_v18, %v8734_v31  ;;  %v8977_v18 = vld [vmem:[%s12777_s4 + $0x1e0] ss:$12 sps:$4 sm:$0xff]   ;;  %v9027_v49 = vld [vmem:[%s12777_s4 + $0x1fc] ss:$12 sps:$4 sm:$0xff]   ;;  %vm6547_vm2 = vcmask 588800  }
 0x21a   :  { %v1152_v59 = vmax.f32 %v10282_v39, %v1085_v50  ;;  %1287 = vmatpush1.bf16.msra.mxu1 %v1169_v36  ;;  %v8957_v39 = vld [vmem:[%s12776_s1] ss:$8 sps:$4 sm:$0xff]   ;;  %1884 = vmatpush2.bf16.msra.mxu0 %v9016_v6  ;;  %v9031_v31 = vld [vmem:[%s12777_s4 + $0xac] ss:$12 sps:$4 sm:$0xff]   ;;  %v9048_v6 = vld [vmem:[%s12777_s4 + $0x50] ss:$12 sps:$4 sm:$0xff]  }
 0x21b   :  { %1288 = vmatprep.subr.bf16.mxu1 %v1168_v19  ;;  %v1184_v11 = vpack.c.bf16 %v1153_v30, %v1153_v30  ;;  %1885 = vmatprep.subr.bf16.mxu0 %v12778_v20  ;;  %s9567_s1 = smov 104  }
 0x21c   :  { %v1183_v16 = vpack.c.bf16 %v1152_v59, %v1152_v59 }
 0x21e   :  { %1289 = vmatpush1.bf16.msra.mxu1 %v1167_v61  ;;  %v1269_v32 = vsel %vm157_vm0, %v1183_v16, 0  ;;  %1886 = vmatpush2.bf16.msra.mxu0 %v9020_v5 }
 0x21f   :  { %7473 = vmatprep.subr.msk.bf16.mxu1 %vm157_vm0, %v1184_v11  ;;  %1887 = vmatprep.subr.bf16.mxu0 %v12778_v20 }
 0x222   :  { %1305 = vmatpush2.bf16.msra.mxu1 %v1269_v32  ;;  %1888 = vmatpush2.bf16.msra.mxu0 %v9024_v33 }
 0x223   :  { %1768 = vmatprep.subr.bf16.mxu1 %v8979_v52  ;;  %1889 = vmatprep.subr.bf16.mxu0 %v12778_v20 }
 0x225   :  { %1307 = vmatmul.mubr.bf16.vlgmr.msra.gmra.mxu1 %v8957_v39 }
 0x226   :  { %7475 = vmatprep.mubr.msk.bf16.mxu1 %vm1245_vm1, %v8960_v42  ;;  %1769 = vmatpush1.bf16.msra.mxu1 %v8977_v18 }
 0x227   :  { %1770 = vmatprep.subr.bf16.mxu1 %v8983_v0  ;;  %1890 = vmatpush2.bf16.msra.mxu0 %v9028_v26  ;;  %v9029_v0 = vld [vmem:[%s12777_s4 + $0xa8] ss:$12 sps:$4 sm:$0xff]  }
 0x228   :  { %2262 = vmatprep.subr.bf16.mxu0 %v12778_v20 }
 0x22a   :  { %1771 = vmatpush1.bf16.msra.mxu1 %v8981_v25  ;;  %v9032_v25 = vld [vmem:[%s12777_s4 + $0xb0] ss:$12 sps:$4 sm:$0xff]  }
 0x22b   :  { %1772 = vmatprep.subr.bf16.mxu1 %v8987_v4 }
 0x22d   :  { %1317 = vmatmul.mubr.bf16.gmra.mxu1 %v8962_v43  ;;  %v9035_v43 = vld [vmem:[%s12777_s4 + $0x94] ss:$12 sps:$4 sm:$0xff]  }
 0x22e   :  { %7476 = vmatprep.mubr.msk.bf16.mxu1 %vm1245_vm1, %v8963_v58  ;;  %1773 = vmatpush1.bf16.msra.mxu1 %v8985_v47 }
 0x22f   :  { %1774 = vmatprep.subr.bf16.mxu1 %v8991_v21 }
 0x232   :  { %1775 = vmatpush1.bf16.msra.mxu1 %v8989_v12 }
 0x233   :  { %1776 = vmatprep.subr.bf16.mxu1 %v8995_v35  ;;  %v9033_v35 = vld [vmem:[%s12777_s4 + $0x90] ss:$12 sps:$4 sm:$0xff]  }
 0x235   :  { %1327 = vmatmul.mubr.bf16.gmra.mxu1 %v8965_v46  ;;  %v9036_v46 = vld [vmem:[%s12777_s4 + $0x98] ss:$12 sps:$4 sm:$0xff]  }
 0x236   :  { %7477 = vmatprep.mubr.msk.bf16.mxu1 %vm1245_vm1, %v8966_v10  ;;  %1777 = vmatpush1.bf16.msra.mxu1 %v8993_v45  ;;  %v9039_v45 = vld [vmem:[%s12777_s4 + $0x7c] ss:$12 sps:$4 sm:$0xff]  }
 0x237   :  { %1778 = vmatprep.subr.bf16.mxu1 %v8999_v34 }
 0x23a   :  { %1779 = vmatpush1.bf16.msra.mxu1 %v8997_v22 }
 0x23b   :  { %1780 = vmatprep.subr.bf16.mxu1 %v9003_v63 }
 0x23d   :  { %1337 = vmatmul.mubr.bf16.gmra.mxu1 %v8968_v62 }
 0x23e   :  { %7478 = vmatprep.mubr.msk.bf16.mxu1 %vm1245_vm1, %v8969_v57  ;;  %1781 = vmatpush1.bf16.msra.mxu1 %v9001_v1  ;;  %v9037_v57 = vld [vmem:[%s12777_s4 + $0x78] ss:$12 sps:$4 sm:$0xff]   ;;  %v9040_v1 = vld [vmem:[%s12777_s4 + $0x80] ss:$12 sps:$4 sm:$0xff]  }
 0x23f   :  { %1782 = vmatprep.subr.bf16.mxu1 %v9007_v17 }
 0x242   :  { %1783 = vmatpush1.bf16.msra.mxu1 %v9005_v14  ;;  %v9043_v14 = vld [vmem:[%s12777_s4 + $0x64] ss:$12 sps:$4 sm:$0xff]  }
 0x243   :  { %7572 = vmatprep.subr.msk.bf16.mxu1 %vm1758_vm3, %v9009_v2 }
 0x245   :  { %1347 = vmatmul.mubr.bf16.gmra.mxu1 %v8971_v56 }
 0x246   :  { %7479 = vmatprep.mubr.msk.bf16.mxu1 %vm1245_vm1, %v8972_v37  ;;  %1791 = vmatpush2.bf16.msra.mxu1 %v1760_v15 }
 0x247   :  { %1792 = vmatprep.subr.bf16.mxu1 %v9015_v41 }
 0x24a   :  { %1793 = vmatpush2.bf16.msra.mxu1 %v9013_v48  ;;  %v9045_v48 = vld [vmem:[%s12777_s4 + $0x48] ss:$12 sps:$4 sm:$0xff]  }
 0x24b   :  { %1794 = vmatprep.subr.bf16.mxu1 %v9019_v51 }
 0x24d   :  { %1357 = vmatmul.mubr.bf16.gmra.mxu1 %v8974_v23 }
 0x24e   :  { %7480 = vmatprep.mubr.msk.bf16.mxu1 %vm1245_vm1, %v7472_v9  ;;  %1795 = vmatpush2.bf16.msra.mxu1 %v9017_v29  ;;  %v9041_v9 = vld [vmem:[%s12777_s4 + $0x60] ss:$12 sps:$4 sm:$0xff]  }
 0x24f   :  { %1796 = vmatprep.subr.bf16.mxu1 %v9023_v60  ;;  %v9051_v29 = vld [vmem:[%s12777_s4 + $0x34] ss:$12 sps:$4 sm:$0xff]  }
 0x252   :  { %1797 = vmatpush2.bf16.msra.mxu1 %v9021_v8 }
 0x253   :  { %1798 = vmatprep.subr.bf16.mxu1 %v9027_v49  ;;  %v9049_v49 = vld [vmem:[%s12777_s4 + $0x30] ss:$12 sps:$4 sm:$0xff]  }
 0x255   :  { %1367 = vmatmul.mubr.bf16.gmra.mxu1 %v7471_v24  ;;  %v9044_v24 = vld [vmem:[%s12777_s4 + $0x68] ss:$12 sps:$4 sm:$0xff]  }
 0x256   :  { %1799 = vmatpush2.bf16.msra.mxu1 %v9025_v28  ;;  %v9052_v28 = vld [vmem:[%s12777_s4 + $0x38] ss:$12 sps:$4 sm:$0xff]  }
 0x257   :  { %2171 = vmatprep.subr.bf16.mxu1 %v9031_v31  ;;  %v9055_v31 = vld [vmem:[%s12777_s4 + $0x1c] ss:$12 sps:$4 sm:$0xff]  }
 0x2e5   :  { %v1308_v55 = vpop.f32.mrf.mxu1 }
 0x2e7   :  { %v1310_v3 = vpop.f32.mrf.mxu1 }
 0x2e9   :  { %v1312_v7 = vpop.f32.mrf.mxu1 }
 0x2ea   :  { %v10595_v38 = vpack.c.bf16 %v1312_v7, %v1308_v55 }
 0x2eb   :  { %v1314_v54 = vpop.f32.mrf.mxu1 }
 0x2ec   :  { %v10591_v19 = vpack.c.bf16 %v1314_v54, %v1310_v3  ;;  %v1506_v42 = vrot.slane %v10595_v38, 4 }
 0x2ed   :  { %v1318_v50 = vpop.f32.mrf.mxu1 }
 0x2ee   :  { %v1509_v32 = vrot.slane %v10591_v19, 4 }
 0x2ef   :  { %v1320_v36 = vpop.f32.mrf.mxu1 }
 0x2f1   :  { %v1322_v30 = vpop.f32.mrf.mxu1 }
 0x2f2   :  { %v10593_v59 = vpack.c.bf16 %v1322_v30, %v1318_v50  ;;  %v9053_v50 = vld [vmem:[%s12777_s4 + $0x18] ss:$12 sps:$4 sm:$0xff]  }
 0x2f3   :  { %v1324_v61 = vpop.f32.mrf.mxu1 }
 0x2f4   :  { %v10597_v11 = vpack.c.bf16 %v1324_v61, %v1320_v36  ;;  %v1507_v52 = vrot.slane %v10593_v59, 4  ;;  %v9056_v36 = vld [vmem:[%s12777_s4 + $0x20] ss:$12 sps:$4 sm:$0xff]   ;;  %v9059_v61 = vld [vmem:[%s12777_s4 + $0x4] ss:$12 sps:$4 sm:$0xff]  }
 0x2f5   :  { %v1328_v16 = vpop.f32.mrf.mxu1 }
 0x2f6   :  { %v1510_v39 = vrot.slane %v10597_v11, 4  ;;  %v1508_v47 = vsel %vm157_vm0, %v1506_v42, %v1507_v52 }
 0x2f7   :  { %v1330_v18 = vpop.f32.mrf.mxu1 }
 0x2f8   :  { %v1511_v4 = vsel %vm157_vm0, %v1509_v32, %v1510_v39 }
 0x2f9   :  { %v1332_v58 = vpop.f32.mrf.mxu1  ;;  %7573 = vmatprep.mubr.msk.bf16.mxu1 %vm1739_vm4, %v1511_v4  ;;  %7579 = vmatprep.mubr.msk.bf16.mxu0 %vm1739_vm4, %v1511_v4  ;;  %v9063_v4 = vld [vmem:[%s12777_s4 + $0x120] ss:$12 sps:$4 sm:$0x3f]  }
 0x2fa   :  { %v10616_v21 = vpack.c.bf16 %v1332_v58, %v1328_v16  ;;  %1801 = vmatmul.mubr.bf16.vlgmr.msra.gmra.mxu1 %v1508_v47  ;;  %1892 = vmatmul.mubr.bf16.vlgmr.msra.gmra.mxu0 %v1508_v47 }
 0x2fb   :  { %2172 = vmatpush1.bf16.msra.mxu1 %v9029_v0  ;;  %2263 = vmatpush1.bf16.msra.mxu0 %v9032_v25  ;;  %v1334_v12 = vpop.f32.mrf.mxu1  ;;  %v9061_v0 = vld [vmem:[%s12777_s4 + $0x124] ss:$12 sps:$4 sm:$0x3f]  }
 0x2fc   :  { %v10624_v10 = vpack.c.bf16 %v1334_v12, %v1330_v18  ;;  %2173 = vmatprep.subr.bf16.mxu1 %v9035_v43  ;;  %2264 = vmatprep.subr.bf16.mxu0 %v12778_v20  ;;  %v1512_v22 = vrot.slane %v10616_v21, 4  ;;  %v9060_v18 = vld [vmem:[%s12777_s4 + $0x8] ss:$12 sps:$4 sm:$0xff]  }
 0x2fd   :  { %v1338_v34 = vpop.f32.mrf.mxu1  ;;  %v9064_v43 = vld [vmem:[%s12777_s4 + $0x128] ss:$12 sps:$4 sm:$0x3f]  }
 0x2fe   :  { %v1514_v63 = vrot.slane %v10624_v10, 4  ;;  %v1513_v37 = vsel %vm157_vm0, %v1507_v52, %v1512_v22 }
 0x2ff   :  { %2174 = vmatpush1.bf16.msra.mxu1 %v9033_v35  ;;  %2265 = vmatpush1.bf16.msra.mxu0 %v9036_v46  ;;  %v1340_v62 = vpop.f32.mrf.mxu1 }
 0x300   :  { %v1515_v17 = vsel %vm157_vm0, %v1510_v39, %v1514_v63  ;;  %2175 = vmatprep.subr.bf16.mxu1 %v9039_v45  ;;  %2266 = vmatprep.subr.bf16.mxu0 %v12778_v20  ;;  %v9057_v39 = vld [vmem:[%s12777_s4] ss:$12 sps:$4 sm:$0xff]   ;;  %v2163_v45 = vsel %vm1758_vm3, %v9063_v4, 0 }
 0x301   :  { %v1342_v56 = vpop.f32.mrf.mxu1  ;;  %7574 = vmatprep.mubr.msk.bf16.mxu1 %vm1739_vm4, %v1515_v17  ;;  %7580 = vmatprep.mubr.msk.bf16.mxu0 %vm1739_vm4, %v1515_v17 }
 0x302   :  { %v10646_v40 = vpack.c.bf16 %v1342_v56, %v1338_v34  ;;  %1811 = vmatmul.mubr.bf16.gmra.mxu1 %v1513_v37  ;;  %1900 = vmatmul.mubr.bf16.gmra.mxu0 %v1513_v37  ;;  %v2169_v34 = vsel %vm1758_vm3, %v9064_v43, 0  ;;  %v9069_v56 = vld [vmem:[%s12777_s4 + $0xf0] ss:$12 sps:$4 sm:$0xff]   ;;  %v9072_v37 = vld [vmem:[%s12777_s4 + $0xf8] ss:$12 sps:$4 sm:$0xff]  }
 0x303   :  { %2176 = vmatpush1.bf16.msra.mxu1 %v9037_v57  ;;  %2267 = vmatpush1.bf16.msra.mxu0 %v9040_v1  ;;  %v1344_v23 = vpop.f32.mrf.mxu1  ;;  %v9065_v57 = vld [vmem:[%s12777_s4 + $0x108] ss:$12 sps:$4 sm:$0xff]   ;;  %v9068_v1 = vld [vmem:[%s12777_s4 + $0x110] ss:$12 sps:$4 sm:$0xff]  }
 0x304   :  { %v10654_v2 = vpack.c.bf16 %v1344_v23, %v1340_v62  ;;  %2177 = vmatprep.subr.bf16.mxu1 %v9043_v14  ;;  %2268 = vmatprep.subr.bf16.mxu0 %v12778_v20  ;;  %v1516_v15 = vrot.slane %v10646_v40, 4  ;;  %v9071_v14 = vld [vmem:[%s12777_s4 + $0xf4] ss:$12 sps:$4 sm:$0xff]   ;;  %v9075_v23 = vld [vmem:[%s12777_s4 + $0xdc] ss:$12 sps:$4 sm:$0xff]  }
 0x305   :  { %v1348_v53 = vpop.f32.mrf.mxu1  ;;  %v9119_v43 = vld [vmem:[%s12777_s4 + $0x37c] ss:$12 sps:$4 sm:$0xff]  }
 0x306   :  { %v1518_v27 = vrot.slane %v10654_v2, 4  ;;  %v1517_v60 = vsel %vm157_vm0, %v1512_v22, %v1516_v15  ;;  %v9067_v22 = vld [vmem:[%s12777_s4 + $0x10c] ss:$12 sps:$4 sm:$0xff]  }
 0x307   :  { %2178 = vmatpush1.bf16.msra.mxu1 %v9041_v9  ;;  %2269 = vmatpush1.bf16.msra.mxu0 %v9044_v24  ;;  %v1350_v41 = vpop.f32.mrf.mxu1  ;;  %v9073_v9 = vld [vmem:[%s12777_s4 + $0xd8] ss:$12 sps:$4 sm:$0xff]   ;;  %v9076_v24 = vld [vmem:[%s12777_s4 + $0xe0] ss:$12 sps:$4 sm:$0xff]  }
 0x308   :  { %v1519_v51 = vsel %vm157_vm0, %v1514_v63, %v1518_v27  ;;  %2179 = vmatprep.subr.bf16.mxu1 %v9047_v44  ;;  %2270 = vmatprep.subr.bf16.mxu0 %v12778_v20  ;;  %v9079_v44 = vld [vmem:[%s12777_s4 + $0xc4] ss:$12 sps:$4 sm:$0xff]  }
 0x309   :  { %v1352_v5 = vpop.f32.mrf.mxu1  ;;  %7575 = vmatprep.mubr.msk.bf16.mxu1 %vm1739_vm4, %v1519_v51  ;;  %7581 = vmatprep.mubr.msk.bf16.mxu0 %vm1739_vm4, %v1519_v51  ;;  %v9088_v51 = vld [vmem:[%s12777_s4 + $0x308] ss:$12 sps:$4 sm:$0xff]  }
 0x30a   :  { %v10676_v8 = vpack.c.bf16 %v1352_v5, %v1348_v53  ;;  %1821 = vmatmul.mubr.bf16.gmra.mxu1 %v1517_v60  ;;  %1908 = vmatmul.mubr.bf16.gmra.mxu0 %v1517_v60  ;;  %v9077_v53 = vld [vmem:[%s12777_s4 + $0xc0] ss:$12 sps:$4 sm:$0xff]   ;;  %v9092_v5 = vld [vmem:[%s12777_s4 + $0x2f0] ss:$12 sps:$4 sm:$0xff]  }
 0x30b   :  { %2180 = vmatpush1.bf16.msra.mxu1 %v9045_v48  ;;  %2271 = vmatpush1.bf16.msra.mxu0 %v9048_v6  ;;  %v1354_v33 = vpop.f32.mrf.mxu1  ;;  %v9087_v48 = vld [vmem:[%s12777_s4 + $0x304] ss:$12 sps:$4 sm:$0xff]   ;;  %v9085_v6 = vld [vmem:[%s12777_s4 + $0x300] ss:$12 sps:$4 sm:$0xff]  }
 0x30c   :  { %v10684_v26 = vpack.c.bf16 %v1354_v33, %v1350_v41  ;;  %2181 = vmatprep.subr.bf16.mxu1 %v9051_v29  ;;  %2272 = vmatprep.subr.bf16.mxu0 %v12778_v20  ;;  %v1520_v3 = vrot.slane %v10676_v8, 4  ;;  %v9084_v41 = vld [vmem:[%s12777_s4 + $0x320] ss:$12 sps:$4 sm:$0xff]   ;;  %v9089_v29 = vld [vmem:[%s12777_s4 + $0x2e8] ss:$12 sps:$4 sm:$0xff]  }
 0x30d   :  { %v1358_v55 = vpop.f32.mrf.mxu1  ;;  %v9095_v60 = vld [vmem:[%s12777_s4 + $0x2d4] ss:$12 sps:$4 sm:$0xff]   ;;  %v9093_v33 = vld [vmem:[%s12777_s4 + $0x2d0] ss:$12 sps:$4 sm:$0xff]  }
 0x30e   :  { %v1522_v7 = vrot.slane %v10684_v26, 4  ;;  %v1521_v52 = vsel %vm157_vm0, %v1516_v15, %v1520_v3  ;;  %v9080_v15 = vld [vmem:[%s12777_s4 + $0xc8] ss:$12 sps:$4 sm:$0xff]  }
 0x30f   :  { %2182 = vmatpush1.bf16.msra.mxu1 %v9049_v49  ;;  %2273 = vmatpush1.bf16.msra.mxu0 %v9052_v28  ;;  %v1360_v54 = vpop.f32.mrf.mxu1  ;;  %v9096_v49 = vld [vmem:[%s12777_s4 + $0x2d8] ss:$12 sps:$4 sm:$0xff]   ;;  %v9099_v28 = vld [vmem:[%s12777_s4 + $0x2bc] ss:$12 sps:$4 sm:$0xff]  }
 0x310   :  { %v1523_v30 = vsel %vm157_vm0, %v1518_v27, %v1522_v7  ;;  %2183 = vmatprep.subr.bf16.mxu1 %v9055_v31  ;;  %2274 = vmatprep.subr.bf16.mxu0 %v12778_v20  ;;  %v9081_v27 = vld [vmem:[%s12777_s4 + $0x318] ss:$12 sps:$4 sm:$0xff]  }
 0x311   :  { %v1362_v16 = vpop.f32.mrf.mxu1  ;;  %7576 = vmatprep.mubr.msk.bf16.mxu1 %vm1739_vm4, %v1523_v30  ;;  %7582 = vmatprep.mubr.msk.bf16.mxu0 %vm1739_vm4, %v1523_v30  ;;  %v9097_v31 = vld [vmem:[%s12777_s4 + $0x2b8] ss:$12 sps:$4 sm:$0xff]   ;;  %v9108_v30 = vld [vmem:[%s12777_s4 + $0x290] ss:$12 sps:$4 sm:$0xff]  }
 0x312   :  { %v10706_v32 = vpack.c.bf16 %v1362_v16, %v1358_v55  ;;  %1831 = vmatmul.mubr.bf16.gmra.mxu1 %v1521_v52  ;;  %1916 = vmatmul.mubr.bf16.gmra.mxu0 %v1521_v52  ;;  %v9100_v55 = vld [vmem:[%s12777_s4 + $0x2c0] ss:$12 sps:$4 sm:$0xff]   ;;  %v9109_v16 = vld [vmem:[%s12777_s4 + $0x270] ss:$12 sps:$4 sm:$0xff]   ;;  %v9112_v52 = vld [vmem:[%s12777_s4 + $0x278] ss:$12 sps:$4 sm:$0xff]  }
 0x313   :  { %2184 = vmatpush1.bf16.msra.mxu1 %v9053_v50  ;;  %2275 = vmatpush1.bf16.msra.mxu0 %v9056_v36  ;;  %v1364_v42 = vpop.f32.mrf.mxu1  ;;  %v9107_v50 = vld [vmem:[%s12777_s4 + $0x28c] ss:$12 sps:$4 sm:$0xff]   ;;  %v9105_v36 = vld [vmem:[%s12777_s4 + $0x288] ss:$12 sps:$4 sm:$0xff]  }
 0x314   :  { %v10717_v25 = vpack.c.bf16 %v1364_v42, %v1360_v54  ;;  %2185 = vmatprep.subr.bf16.mxu1 %v9059_v61  ;;  %2276 = vmatprep.subr.bf16.mxu0 %v12778_v20  ;;  %v1524_v58 = vrot.slane %v10706_v32, 4  ;;  %v9104_v54 = vld [vmem:[%s12777_s4 + $0x2a8] ss:$12 sps:$4 sm:$0xff]   ;;  %v9115_v42 = vld [vmem:[%s12777_s4 + $0x390] ss:$12 sps:$4 sm:$0x3f]  }
 0x315   :  { %v10727_v47 = vpop.f32.mrf.mxu1  ;;  %v9111_v61 = vld [vmem:[%s12777_s4 + $0x274] ss:$12 sps:$4 sm:$0xff]  }
 0x316   :  { %v1526_v12 = vrot.slane %v10717_v25, 4  ;;  %v1525_v63 = vsel %vm157_vm0, %v1520_v3, %v1524_v58  ;;  %v9103_v3 = vld [vmem:[%s12777_s4 + $0x2a4] ss:$12 sps:$4 sm:$0xff]  }
 0x317   :  { %2186 = vmatpush1.bf16.msra.mxu1 %v9057_v39  ;;  %2277 = vmatpush1.bf16.msra.mxu0 %v9060_v18  ;;  %v10730_v35 = vpop.f32.mrf.mxu1  ;;  %v9113_v39 = vld [vmem:[%s12777_s4 + $0x394] ss:$12 sps:$4 sm:$0x3f]   ;;  %v9116_v18 = vld [vmem:[%s12777_s4 + $0x398] ss:$12 sps:$4 sm:$0x3f]  }
 0x318   :  { %v1527_v46 = vsel %vm157_vm0, %v1522_v7, %v1526_v12  ;;  %7624 = vmatprep.subr.msk.bf16.mxu1 %vm1758_vm3, %v9061_v0  ;;  %2284 = vmatprep.subr.bf16.mxu0 %v12778_v20  ;;  %v9101_v7 = vld [vmem:[%s12777_s4 + $0x2a0] ss:$12 sps:$4 sm:$0xff]   ;;  %v2604_v0 = vsel %vm1758_vm3, %v9115_v42, 0  ;;  %v2610_v4 = vsel %vm1758_vm3, %v9116_v18, 0 }
 0x319   :  { %7577 = vmatprep.mubr.msk.bf16.mxu1 %vm1739_vm4, %v1527_v46  ;;  %7583 = vmatprep.mubr.msk.bf16.mxu0 %vm1739_vm4, %v1527_v46  ;;  %v1372_v62 = vpop.f32.mrf.mxu1  ;;  %v9123_v46 = vld [vmem:[%s12777_s4 + $0x364] ss:$12 sps:$4 sm:$0xff]  }
 0x31a   :  { %1841 = vmatmul.mubr.bf16.gmra.mxu1 %v1525_v63  ;;  %1924 = vmatmul.mubr.bf16.gmra.mxu0 %v1525_v63  ;;  %v9125_v63 = vld [vmem:[%s12777_s4 + $0x348] ss:$12 sps:$4 sm:$0xff]   ;;  %v9128_v62 = vld [vmem:[%s12777_s4 + $0x350] ss:$12 sps:$4 sm:$0xff]  }
 0x31b   :  { %2194 = vmatpush2.bf16.msra.mxu1 %v2163_v45  ;;  %2285 = vmatpush2.bf16.msra.mxu0 %v2169_v34  ;;  %v1373_v17 = vpop.f32.mrf.mxu1  ;;  %v9121_v45 = vld [vmem:[%s12777_s4 + $0x360] ss:$12 sps:$4 sm:$0xff]   ;;  %v9124_v34 = vld [vmem:[%s12777_s4 + $0x368] ss:$12 sps:$4 sm:$0xff]  }
 0x31c   :  { %2195 = vmatprep.subr.bf16.mxu1 %v9067_v22  ;;  %2286 = vmatprep.subr.bf16.mxu0 %v12778_v20  ;;  %v9127_v22 = vld [vmem:[%s12777_s4 + $0x34c] ss:$12 sps:$4 sm:$0xff]  }
 0x31d   :  { %7578 = vmatprep.mubr.msk.bf16.mxu1 %vm1739_vm4, %v1526_v12  ;;  %7584 = vmatprep.mubr.msk.bf16.mxu0 %vm1739_vm4, %v1526_v12  ;;  %v9120_v12 = vld [vmem:[%s12777_s4 + $0x380] ss:$12 sps:$4 sm:$0xff]  }
 0x31f   :  { %2196 = vmatpush2.bf16.msra.mxu1 %v9065_v57  ;;  %2287 = vmatpush2.bf16.msra.mxu0 %v9068_v1  ;;  %v9131_v57 = vld [vmem:[%s12777_s4 + $0x334] ss:$12 sps:$4 sm:$0xff]   ;;  %v9132_v1 = vld [vmem:[%s12777_s4 + $0x338] ss:$12 sps:$4 sm:$0xff]  }
 0x320   :  { %2197 = vmatprep.subr.bf16.mxu1 %v9071_v14  ;;  %2288 = vmatprep.subr.bf16.mxu0 %v12778_v20 }
 0x322   :  { %1851 = vmatmul.mubr.bf16.gmra.mxu1 %v1524_v58  ;;  %1932 = vmatmul.mubr.bf16.gmra.mxu0 %v1524_v58  ;;  %v9117_v58 = vld [vmem:[%s12777_s4 + $0x378] ss:$12 sps:$4 sm:$0xff]  }
 0x323   :  { %2198 = vmatpush2.bf16.msra.mxu1 %v9069_v56  ;;  %2289 = vmatpush2.bf16.msra.mxu0 %v9072_v37 }
 0x324   :  { %7625 = vmatprep.mubr.msk.bf16.mxu1 %vm1739_vm4, %v10591_v19  ;;  %7631 = vmatprep.mubr.msk.bf16.mxu0 %vm1739_vm4, %v10591_v19  ;;  %v9083_v19 = vld [vmem:[%s12777_s4 + $0x31c] ss:$12 sps:$4 sm:$0xff]  }
 0x325   :  { %2199 = vmatprep.subr.bf16.mxu1 %v9075_v23  ;;  %2290 = vmatprep.subr.bf16.mxu0 %v12778_v20 }
 0x327   :  { %2200 = vmatpush2.bf16.msra.mxu1 %v9073_v9  ;;  %2291 = vmatpush2.bf16.msra.mxu0 %v9076_v24 }
 0x328   :  { %2201 = vmatprep.subr.bf16.mxu1 %v9079_v44  ;;  %2292 = vmatprep.subr.bf16.mxu0 %v12778_v20 }
 0x32b   :  { %2202 = vmatpush2.bf16.msra.mxu1 %v9077_v53  ;;  %2293 = vmatpush2.bf16.msra.mxu0 %v9080_v15 }
 0x32c   :  { %2612 = vmatprep.subr.bf16.mxu1 %v9083_v19  ;;  %2703 = vmatprep.subr.bf16.mxu0 %v12778_v20 }
 0x32e   :  { %2204 = vmatmul.mubr.bf16.vlgmr.msra.gmra.mxu1 %v10595_v38  ;;  %2295 = vmatmul.mubr.bf16.vlgmr.msra.gmra.mxu0 %v10595_v38  ;;  %v9091_v38 = vld [vmem:[%s12777_s4 + $0x2ec] ss:$12 sps:$4 sm:$0xff]  }
 0x32f   :  { %7626 = vmatprep.mubr.msk.bf16.mxu1 %vm1739_vm4, %v10597_v11  ;;  %7632 = vmatprep.mubr.msk.bf16.mxu0 %vm1739_vm4, %v10597_v11 }
 0x330   :  { %2613 = vmatpush1.bf16.msra.mxu1 %v9081_v27  ;;  %2704 = vmatpush1.bf16.msra.mxu0 %v9084_v41 }
 0x331   :  { %2614 = vmatprep.subr.bf16.mxu1 %v9087_v48  ;;  %2705 = vmatprep.subr.bf16.mxu0 %v12778_v20 }
 0x334   :  { %2615 = vmatpush1.bf16.msra.mxu1 %v9085_v6  ;;  %2706 = vmatpush1.bf16.msra.mxu0 %v9088_v51 }
 0x335   :  { %2616 = vmatprep.subr.bf16.mxu1 %v9091_v38  ;;  %2707 = vmatprep.subr.bf16.mxu0 %v12778_v20 }
 0x336   :  { %2214 = vmatmul.mubr.bf16.gmra.mxu1 %v10593_v59  ;;  %2303 = vmatmul.mubr.bf16.gmra.mxu0 %v10593_v59 }
 0x337   :  { %7627 = vmatprep.mubr.msk.bf16.mxu1 %vm1739_vm4, %v10624_v10  ;;  %7633 = vmatprep.mubr.msk.bf16.mxu0 %vm1739_vm4, %v10624_v10 }
 0x338   :  { %2617 = vmatpush1.bf16.msra.mxu1 %v9089_v29  ;;  %2708 = vmatpush1.bf16.msra.mxu0 %v9092_v5 }
 0x339   :  { %2618 = vmatprep.subr.bf16.mxu1 %v9095_v60  ;;  %2709 = vmatprep.subr.bf16.mxu0 %v12778_v20 }
 0x33c   :  { %2619 = vmatpush1.bf16.msra.mxu1 %v9093_v33  ;;  %2710 = vmatpush1.bf16.msra.mxu0 %v9096_v49 }
 0x33d   :  { %2620 = vmatprep.subr.bf16.mxu1 %v9099_v28  ;;  %2711 = vmatprep.subr.bf16.mxu0 %v12778_v20 }
 0x33e   :  { %2224 = vmatmul.mubr.bf16.gmra.mxu1 %v10616_v21  ;;  %2311 = vmatmul.mubr.bf16.gmra.mxu0 %v10616_v21 }
 0x33f   :  { %7628 = vmatprep.mubr.msk.bf16.mxu1 %vm1739_vm4, %v10654_v2  ;;  %7634 = vmatprep.mubr.msk.bf16.mxu0 %vm1739_vm4, %v10654_v2 }
 0x340   :  { %2621 = vmatpush1.bf16.msra.mxu1 %v9097_v31  ;;  %2712 = vmatpush1.bf16.msra.mxu0 %v9100_v55 }
 0x341   :  { %2622 = vmatprep.subr.bf16.mxu1 %v9103_v3  ;;  %2713 = vmatprep.subr.bf16.mxu0 %v12778_v20 }
 0x344   :  { %2623 = vmatpush1.bf16.msra.mxu1 %v9101_v7  ;;  %2714 = vmatpush1.bf16.msra.mxu0 %v9104_v54 }
 0x345   :  { %2624 = vmatprep.subr.bf16.mxu1 %v9107_v50  ;;  %2715 = vmatprep.subr.bf16.mxu0 %v12778_v20 }
 0x346   :  { %2234 = vmatmul.mubr.bf16.gmra.mxu1 %v10646_v40  ;;  %2319 = vmatmul.mubr.bf16.gmra.mxu0 %v10646_v40 }
 0x347   :  { %7629 = vmatprep.mubr.msk.bf16.mxu1 %vm1739_vm4, %v10684_v26  ;;  %7635 = vmatprep.mubr.msk.bf16.mxu0 %vm1739_vm4, %v10684_v26 }
 0x348   :  { %2625 = vmatpush1.bf16.msra.mxu1 %v9105_v36  ;;  %2716 = vmatpush1.bf16.msra.mxu0 %v9108_v30 }
 0x349   :  { %2626 = vmatprep.subr.bf16.mxu1 %v9111_v61  ;;  %2717 = vmatprep.subr.bf16.mxu0 %v12778_v20 }
 0x34c   :  { %2627 = vmatpush1.bf16.msra.mxu1 %v9109_v16  ;;  %2718 = vmatpush1.bf16.msra.mxu0 %v9112_v52 }
 0x34d   :  { %7728 = vmatprep.subr.msk.bf16.mxu1 %vm1758_vm3, %v9113_v39  ;;  %2725 = vmatprep.subr.bf16.mxu0 %v12778_v20 }
 0x34e   :  { %2244 = vmatmul.mubr.bf16.gmra.mxu1 %v10676_v8  ;;  %2327 = vmatmul.mubr.bf16.gmra.mxu0 %v10676_v8 }
 0x34f   :  { %7630 = vmatprep.mubr.msk.bf16.mxu1 %vm1739_vm4, %v10717_v25  ;;  %7636 = vmatprep.mubr.msk.bf16.mxu0 %vm1739_vm4, %v10717_v25 }
 0x350   :  { %2635 = vmatpush2.bf16.msra.mxu1 %v2604_v0  ;;  %2726 = vmatpush2.bf16.msra.mxu0 %v2610_v4 }
 0x351   :  { %2636 = vmatprep.subr.bf16.mxu1 %v9119_v43  ;;  %2727 = vmatprep.subr.bf16.mxu0 %v12778_v20 }
 0x354   :  { %2637 = vmatpush2.bf16.msra.mxu1 %v9117_v58  ;;  %2728 = vmatpush2.bf16.msra.mxu0 %v9120_v12 }
 0x355   :  { %2638 = vmatprep.subr.bf16.mxu1 %v9123_v46  ;;  %2729 = vmatprep.subr.bf16.mxu0 %v12778_v20 }
 0x356   :  { %2254 = vmatmul.mubr.bf16.gmra.mxu1 %v10706_v32  ;;  %2335 = vmatmul.mubr.bf16.gmra.mxu0 %v10706_v32 }
 0x357   :  { %7729 = vmatprep.mubr.msk.bf16.mxu1 %vm1739_vm4, %v10597_v11  ;;  %7735 = vmatprep.mubr.msk.bf16.mxu0 %vm1739_vm4, %v10597_v11  ;;  %v9129_v11 = vld [vmem:[%s12777_s4 + $0x330] ss:$12 sps:$4 sm:$0xff]  }
 0x358   :  { %2639 = vmatpush2.bf16.msra.mxu1 %v9121_v45  ;;  %2730 = vmatpush2.bf16.msra.mxu0 %v9124_v34 }
 0x359   :  { %2640 = vmatprep.subr.bf16.mxu1 %v9127_v22  ;;  %2731 = vmatprep.subr.bf16.mxu0 %v12778_v20 }
 0x35c   :  { %2641 = vmatpush2.bf16.msra.mxu1 %v9125_v63  ;;  %2732 = vmatpush2.bf16.msra.mxu0 %v9128_v62 }
 0x35d   :  { %2642 = vmatprep.subr.bf16.mxu1 %v9131_v57  ;;  %2733 = vmatprep.subr.bf16.mxu0 %v12778_v20 }
 0x360   :  { %2643 = vmatpush2.bf16.msra.mxu1 %v9129_v11  ;;  %2734 = vmatpush2.bf16.msra.mxu0 %v9132_v1 }
 0x363   :  { %2645 = vmatmul.mubr.bf16.vlgmr.msra.gmra.mxu1 %v10593_v59  ;;  %2736 = vmatmul.mubr.bf16.vlgmr.msra.gmra.mxu0 %v10593_v59  ;;  %v1388_v59 = vpack.c.bf16 %v10730_v35, %v10730_v35 }
 0x364   :  { %7730 = vmatprep.mubr.msk.bf16.mxu1 %vm1739_vm4, %v10624_v10  ;;  %7736 = vmatprep.mubr.msk.bf16.mxu0 %vm1739_vm4, %v10624_v10 }
 0x36b   :  { %2655 = vmatmul.mubr.bf16.gmra.mxu1 %v10616_v21  ;;  %2744 = vmatmul.mubr.bf16.gmra.mxu0 %v10616_v21  ;;  %v1387_v21 = vpack.c.bf16 %v10727_v47, %v10727_v47 }
 0x36c   :  { %7731 = vmatprep.mubr.msk.bf16.mxu1 %vm1739_vm4, %v10654_v2  ;;  %7737 = vmatprep.mubr.msk.bf16.mxu0 %vm1739_vm4, %v10654_v2 }
 0x373   :  { %2665 = vmatmul.mubr.bf16.gmra.mxu1 %v10646_v40  ;;  %2752 = vmatmul.mubr.bf16.gmra.mxu0 %v10646_v40 }
 0x374   :  { %7732 = vmatprep.mubr.msk.bf16.mxu1 %vm1739_vm4, %v10684_v26  ;;  %7738 = vmatprep.mubr.msk.bf16.mxu0 %vm1739_vm4, %v10684_v26 }
 0x37b   :  { %2675 = vmatmul.mubr.bf16.gmra.mxu1 %v10676_v8  ;;  %2760 = vmatmul.mubr.bf16.gmra.mxu0 %v10676_v8 }
 0x37c   :  { %7733 = vmatprep.mubr.msk.bf16.mxu1 %vm1739_vm4, %v10717_v25  ;;  %7739 = vmatprep.mubr.msk.bf16.mxu0 %vm1739_vm4, %v10717_v25 }
 0x383   :  { %2685 = vmatmul.mubr.bf16.gmra.mxu1 %v10706_v32  ;;  %2768 = vmatmul.mubr.bf16.gmra.mxu0 %v10706_v32 }
 0x384   :  { %7734 = vmatprep.mubr.msk.bf16.mxu1 %vm1739_vm4, %v1388_v59  ;;  %7740 = vmatprep.mubr.msk.bf16.mxu0 %vm1739_vm4, %v1388_v59  ;;  %vm6949_vm4 = vcmask 293888  }
 0x38b   :  { %2695 = vmatmul.mubr.bf16.gmra.mxu1 %v1387_v21  ;;  %2776 = vmatmul.mubr.bf16.gmra.mxu0 %v1387_v21 }
 0x38c   :  { %3170 = vmatprep.mubr.bf16.mxu1 %v12778_v20 }
 0x3ba   :  { %v1802_v10 = vpop.f32.mrf.mxu1  ;;  %v1893_v40 = vpop.f32.mrf.mxu0 }
 0x3bc   :  { %v1804_v2 = vpop.f32.mrf.mxu1  ;;  %v1895_v8 = vpop.f32.mrf.mxu0 }
 0x3be   :  { %v1806_v26 = vpop.f32.mrf.mxu1  ;;  %v1896_v25 = vpop.f32.mrf.mxu0 }
 0x3c0   :  { %v10988_v35 = vpop.f32.mrf.mxu1  ;;  %v1898_v32 = vpop.f32.mrf.mxu0 }
 0x3c1   :  { %12779 = vst [vmem:[#allocation14_spill] sm:$0xff] %v10988_v35 }
 0x3c2   :  { %v1812_v17 = vpop.f32.mrf.mxu1  ;;  %v1901_v14 = vpop.f32.mrf.mxu0 }
 0x3c4   :  { %v1814_v56 = vpop.f32.mrf.mxu1  ;;  %v1903_v37 = vpop.f32.mrf.mxu0 }
 0x3c6   :  { %v1816_v23 = vpop.f32.mrf.mxu1  ;;  %v1904_v9 = vpop.f32.mrf.mxu0 }
 0x3c8   :  { %v10990_v47 = vpop.f32.mrf.mxu1  ;;  %v1906_v24 = vpop.f32.mrf.mxu0 }
 0x3c9   :  { %12780 = vst [vmem:[#allocation11_spill] sm:$0xff] %v10990_v47 }
 0x3ca   :  { %v1822_v44 = vpop.f32.mrf.mxu1  ;;  %v10992_v53 = vpop.f32.mrf.mxu0 }
 0x3cc   :  { %v10994_v15 = vpop.f32.mrf.mxu1  ;;  %v1911_v19 = vpop.f32.mrf.mxu0 }
 0x3ce   :  { %v1826_v27 = vpop.f32.mrf.mxu1  ;;  %v10996_v41 = vpop.f32.mrf.mxu0 }
 0x3d0   :  { %v10998_v48 = vpop.f32.mrf.mxu1  ;;  %v1914_v6 = vpop.f32.mrf.mxu0 }
 0x3d2   :  { %v11000_v51 = vpop.f32.mrf.mxu1  ;;  %v11002_v38 = vpop.f32.mrf.mxu0 }
 0x3d4   :  { %v11004_v29 = vpop.f32.mrf.mxu1  ;;  %v1919_v5 = vpop.f32.mrf.mxu0 }
 0x3d6   :  { %v11006_v60 = vpop.f32.mrf.mxu1  ;;  %v11008_v33 = vpop.f32.mrf.mxu0 }
 0x3d8   :  { %v11010_v49 = vpop.f32.mrf.mxu1  ;;  %v1922_v28 = vpop.f32.mrf.mxu0 }
 0x3da   :  { %v11012_v31 = vpop.f32.mrf.mxu1  ;;  %v11014_v55 = vpop.f32.mrf.mxu0 }
 0x3dc   :  { %v11016_v3 = vpop.f32.mrf.mxu1  ;;  %v1927_v7 = vpop.f32.mrf.mxu0 }
 0x3de   :  { %v11018_v54 = vpop.f32.mrf.mxu1  ;;  %v11020_v50 = vpop.f32.mrf.mxu0 }
 0x3e0   :  { %v11022_v36 = vpop.f32.mrf.mxu1  ;;  %v1930_v30 = vpop.f32.mrf.mxu0 }
 0x3e2   :  { %v11024_v61 = vpop.f32.mrf.mxu1  ;;  %v11026_v16 = vpop.f32.mrf.mxu0 }
 0x3e3   :  { %12781 = vst [vmem:[#allocation2_spill] sm:$0xff] %v11026_v16 }
 0x3e4   :  { %v11028_v52 = vpop.f32.mrf.mxu1  ;;  %v1935_v39 = vpop.f32.mrf.mxu0 }
 0x3e5   :  { %12782 = vst [vmem:[#allocation3_spill] sm:$0xff] %v11028_v52 }
 0x3e6   :  { %v1856_v42 = vpop.f32.mrf.mxu1  ;;  %v1936_v18 = vpop.f32.mrf.mxu0 }
 0x3e8   :  { %v1857_v0 = vpop.f32.mrf.mxu1  ;;  %v1937_v4 = vpop.f32.mrf.mxu0 }
 0x3ee   :  { %v2205_v43 = vpop.f32.mrf.mxu1  ;;  %v2296_v58 = vpop.f32.mrf.mxu0 }
 0x3ef   :  { %v11030_v12 = vadd.f32 %v2205_v43, %v1802_v10  ;;  %v11032_v46 = vadd.f32 %v2296_v58, %v1893_v40 }
 0x3f0   :  { %v2207_v45 = vpop.f32.mrf.mxu1  ;;  %v2298_v34 = vpop.f32.mrf.mxu0 }
 0x3f1   :  { %v11034_v22 = vadd.f32 %v2207_v45, %v1804_v2 }
 0x3f2   :  { %v2209_v63 = vpop.f32.mrf.mxu1  ;;  %v2299_v62 = vpop.f32.mrf.mxu0 }
 0x3f3   :  { %12783 = vst [vmem:[#allocation8_spill] sm:$0xff] %v11034_v22  ;;  %v11036_v57 = vadd.f32 %v2209_v63, %v1806_v26  ;;  %v11038_v11 = vadd.f32 %v2299_v62, %v1896_v25 }
 0x3f4   :  { %v11040_v1 = vpop.f32.mrf.mxu1  ;;  %v2301_v59 = vpop.f32.mrf.mxu0 }
 0x3f5   :  { %12784 = vst [vmem:[#allocation10_spill] sm:$0xff] %v11040_v1  ;;  %v12791_v1 = vld [vmem:[#allocation5_spill] sm:$0xff] }
 0x3f6   :  { %v2215_v21 = vpop.f32.mrf.mxu1  ;;  %v2304_v8 = vpop.f32.mrf.mxu0 }
 0x3f7   :  { %v11042_v32 = vadd.f32 %v2215_v21, %v1812_v17  ;;  %v11044_v10 = vadd.f32 %v2304_v8, %v1901_v14 }
 0x3f8   :  { %v2217_v40 = vpop.f32.mrf.mxu1  ;;  %v2306_v37 = vpop.f32.mrf.mxu0 }
 0x3f9   :  { %v11046_v24 = vadd.f32 %v2217_v40, %v1814_v56 }
 0x3fa   :  { %v2219_v2 = vpop.f32.mrf.mxu1  ;;  %v2307_v19 = vpop.f32.mrf.mxu0 }
 0x3fb   :  { %12785 = vst [vmem:[#allocation17_spill] sm:$0xff] %v11046_v24  ;;  %v11048_v6 = vadd.f32 %v2219_v2, %v1816_v23  ;;  %v11050_v26 = vadd.f32 %v2307_v19, %v1904_v9 }
 0x3fc   :  { %v11052_v25 = vpop.f32.mrf.mxu1  ;;  %v2309_v5 = vpop.f32.mrf.mxu0 }
 0x3fd   :  { %12786 = vst [vmem:[#allocation6_spill] sm:$0xff] %v11052_v25 }
 0x3fe   :  { %v2225_v28 = vpop.f32.mrf.mxu1  ;;  %v11054_v7 = vpop.f32.mrf.mxu0 }
 0x3ff   :  { %v11056_v17 = vadd.f32 %v2225_v28, %v1822_v44 }
 0x400   :  { %v11058_v14 = vpop.f32.mrf.mxu1  ;;  %v2314_v30 = vpop.f32.mrf.mxu0 }
 0x402   :  { %v2229_v39 = vpop.f32.mrf.mxu1  ;;  %v11060_v56 = vpop.f32.mrf.mxu0 }
 0x403   :  { %v11062_v42 = vadd.f32 %v2229_v39, %v1826_v27 }
 0x404   :  { %v11064_v23 = vpop.f32.mrf.mxu1  ;;  %v2317_v9 = vpop.f32.mrf.mxu0 }
 0x406   :  { %v11066_v18 = vpop.f32.mrf.mxu1  ;;  %v11068_v0 = vpop.f32.mrf.mxu0 }
 0x408   :  { %v11070_v4 = vpop.f32.mrf.mxu1  ;;  %v2322_v43 = vpop.f32.mrf.mxu0 }
 0x40a   :  { %v11072_v44 = vpop.f32.mrf.mxu1  ;;  %v11074_v58 = vpop.f32.mrf.mxu0 }
 0x40c   :  { %v11076_v45 = vpop.f32.mrf.mxu1  ;;  %v2325_v34 = vpop.f32.mrf.mxu0 }
 0x40d   :  { %v11099_v34 = vld [vmem:[%s12789_s3] sm:$0x7] }
 0x40e   :  { %v11078_v63 = vpop.f32.mrf.mxu1  ;;  %v11080_v27 = vpop.f32.mrf.mxu0  ;;  %v11105_v35 = vrot.slane %v11099_v34, %v12791_v1 }
 0x410   :  { %v11082_v62 = vpop.f32.mrf.mxu1  ;;  %v2330_v59 = vpop.f32.mrf.mxu0 }
 0x411   :  { %v12790_v59 = vld [vmem:[#allocation4_spill] sm:$0xff] }
 0x412   :  { %v11084_v21 = vpop.f32.mrf.mxu1  ;;  %v11086_v8 = vpop.f32.mrf.mxu0  ;;  %v2828_v20 = vsub.s32 2, %v12790_v59 }
 0x414   :  { %v11088_v40 = vpop.f32.mrf.mxu1  ;;  %v2333_v37 = vpop.f32.mrf.mxu0 }
 0x416   :  { %v11090_v2 = vpop.f32.mrf.mxu1  ;;  %v11092_v19 = vpop.f32.mrf.mxu0 }
 0x417   :  { %12787 = vst [vmem:[#allocation15_spill] sm:$0xff] %v11092_v19 }
 0x418   :  { %v11094_v5 = vpop.f32.mrf.mxu1  ;;  %v2338_v28 = vpop.f32.mrf.mxu0 }
 0x419   :  { %12788 = vst [vmem:[#allocation18_spill] sm:$0xff] %v11094_v5 }
 0x41a   :  { %v2259_v30 = vpop.f32.mrf.mxu1  ;;  %v2339_v39 = vpop.f32.mrf.mxu0 }
 0x41b   :  { %v11109_v30 = vrot.slane %v11099_v34, %v2828_v20 }
 0x41c   :  { %v2260_v9 = vpop.f32.mrf.mxu1  ;;  %v2340_v43 = vpop.f32.mrf.mxu0 }
 0x423   :  { %v2646_v22 = vpop.f32.mrf.mxu1  ;;  %v2737_v37 = vpop.f32.mrf.mxu0 }
 0x424   :  { %v2783_v24 = vadd.f32 %v2646_v22, %v11030_v12  ;;  %v2785_v28 = vadd.f32 %v2737_v37, %v11032_v46 }
 0x425   :  { %v11111_v39 = vpop.f32.mrf.mxu1  ;;  %v2739_v9 = vpop.f32.mrf.mxu0 }
 0x426   :  { %12792 = vst [vmem:[#allocation7_spill] sm:$0xff] %v11111_v39  ;;  %v2833_v59 = vadd.f32 %v11105_v35, %v2783_v24  ;;  %v2835_v12 = vadd.f32 %v11109_v30, %v2785_v28 }
 0x427   :  { %v2650_v43 = vpop.f32.mrf.mxu1  ;;  %v2740_v5 = vpop.f32.mrf.mxu0 }
 0x428   :  { %v2786_v52 = vadd.f32 %v2650_v43, %v11036_v57  ;;  %v2788_v22 = vadd.f32 %v2740_v5, %v11038_v11  ;;  %v2866_v9 = vmax.f32 %v2833_v59, 0.0  ;;  %v2868_v57 = vmax.f32 %v2835_v12, 0.0 }
 0x429   :  { %v11117_v1 = vpop.f32.mrf.mxu1  ;;  %v2742_v25 = vpop.f32.mrf.mxu0 }
 0x42a   :  { %12793 = vst [vmem:[#allocation12_spill] sm:$0xff] %v11117_v1  ;;  %v2836_v46 = vadd.f32 %v11105_v35, %v2786_v52  ;;  %v2838_v20 = vadd.f32 %v11109_v30, %v2788_v22 }
 0x42b   :  { %v2656_v37 = vpop.f32.mrf.mxu1  ;;  %v2745_v39 = vpop.f32.mrf.mxu0 }
 0x42c   :  { %v2869_v47 = vmax.f32 %v2836_v46, 0.0  ;;  %v2789_v19 = vadd.f32 %v2656_v37, %v11042_v32  ;;  %v2791_v24 = vadd.f32 %v2745_v39, %v11044_v10  ;;  %v2871_v43 = vmax.f32 %v2838_v20, 0.0 }
 0x42d   :  { %v11123_v28 = vpop.f32.mrf.mxu1  ;;  %v2747_v11 = vpop.f32.mrf.mxu0  ;;  %v2313_v39 = vadd.f32 %v11054_v7, %v10992_v53  ;;  %v2228_v53 = vadd.f32 %v11058_v14, %v10994_v15 }
 0x42e   :  { %v11125_v5 = vmax.f32 %v2866_v9, %v2869_v47  ;;  %v2839_v25 = vadd.f32 %v11105_v35, %v2789_v19  ;;  %v2841_v52 = vadd.f32 %v11109_v30, %v2791_v24  ;;  %v11129_v22 = vmax.f32 %v2868_v57, %v2871_v43 }
 0x42f   :  { %v2660_v1 = vpop.f32.mrf.mxu1  ;;  %v2748_v59 = vpop.f32.mrf.mxu0 }
 0x430   :  { %v2872_v46 = vmax.f32 %v2839_v25, 0.0  ;;  %v2874_v16 = vmax.f32 %v2841_v52, 0.0  ;;  %v2792_v32 = vadd.f32 %v2660_v1, %v11048_v6  ;;  %v2794_v10 = vadd.f32 %v2748_v59, %v11050_v26 }
 0x431   :  { %v11135_v12 = vpop.f32.mrf.mxu1  ;;  %v2750_v20 = vpop.f32.mrf.mxu0 }
 0x432   :  { %v11137_v37 = vmax.f32 %v2869_v47, %v2872_v46  ;;  %v11139_v19 = vmax.f32 %v2871_v43, %v2874_v16  ;;  %v2842_v9 = vadd.f32 %v11105_v35, %v2792_v32  ;;  %v2844_v24 = vadd.f32 %v11109_v30, %v2794_v10 }
 0x433   :  { %v2666_v57 = vpop.f32.mrf.mxu1  ;;  %v2753_v11 = vpop.f32.mrf.mxu0  ;;  %v2316_v47 = vadd.f32 %v11060_v56, %v10996_v41  ;;  %v2232_v41 = vadd.f32 %v11064_v23, %v10998_v48  ;;  %v2236_v56 = vadd.f32 %v11066_v18, %v11000_v51 }
 0x434   :  { %v2875_v25 = vmax.f32 %v2842_v9, 0.0  ;;  %v2877_v1 = vmax.f32 %v2844_v24, 0.0  ;;  %v2795_v6 = vadd.f32 %v2666_v57, %v11056_v17  ;;  %v2797_v26 = vadd.f32 %v2753_v11, %v2313_v39 }
 0x435   :  { %v2668_v7 = vpop.f32.mrf.mxu1  ;;  %v2755_v43 = vpop.f32.mrf.mxu0 }
 0x436   :  { %v11148_v52 = vmax.f32 %v2872_v46, %v2875_v25  ;;  %v11150_v59 = vmax.f32 %v2874_v16, %v2877_v1  ;;  %v2845_v32 = vadd.f32 %v11105_v35, %v2795_v6  ;;  %v2847_v10 = vadd.f32 %v11109_v30, %v2797_v26 }
 0x437   :  { %v2796_v20 = vadd.f32 %v2668_v7, %v2228_v53  ;;  %v2670_v9 = vpop.f32.mrf.mxu1  ;;  %v2756_v17 = vpop.f32.mrf.mxu0  ;;  %v2321_v16 = vadd.f32 %v11068_v0, %v11002_v38  ;;  %v11163_v46 = vrot.slane %v11099_v34, %v10164_v13  ;;  %v2324_v7 = vadd.f32 %v11074_v58, %v11008_v33 }
 0x438   :  { %v2878_v39 = vmax.f32 %v2845_v32, 0.0  ;;  %v2880_v24 = vmax.f32 %v2847_v10, 0.0  ;;  %v2798_v15 = vadd.f32 %v2670_v9, %v11062_v42  ;;  %v2800_v14 = vadd.f32 %v2756_v17, %v2316_v47 }
 0x439   :  { %v2672_v57 = vpop.f32.mrf.mxu1  ;;  %v2758_v11 = vpop.f32.mrf.mxu0  ;;  %v11172_v23 = vadd.f32 %v11163_v46, %v2796_v20 }
 0x43a   :  { %v11165_v6 = vmax.f32 %v2875_v25, %v2878_v39  ;;  %v11167_v26 = vmax.f32 %v2877_v1, %v2880_v24  ;;  %v2848_v42 = vadd.f32 %v11105_v35, %v2798_v15  ;;  %v2850_v48 = vadd.f32 %v11109_v30, %v2800_v14 }
 0x43b   :  { %v2799_v51 = vadd.f32 %v2672_v57, %v2232_v41  ;;  %v2676_v18 = vpop.f32.mrf.mxu1  ;;  %v2761_v38 = vpop.f32.mrf.mxu0  ;;  %v2238_v25 = vadd.f32 %v11070_v4, %v11004_v29  ;;  %v2240_v1 = vadd.f32 %v11072_v44, %v11006_v60  ;;  %v2879_v29 = vmax.f32 %v11172_v23, 0.0 }
 0x43c   :  { %v2881_v0 = vmax.f32 %v2848_v42, 0.0  ;;  %v2883_v53 = vmax.f32 %v2850_v48, 0.0  ;;  %v2801_v34 = vadd.f32 %v2676_v18, %v2236_v56  ;;  %v2803_v47 = vadd.f32 %v2761_v38, %v2321_v16 }
 0x43d   :  { %v11181_v43 = vadd.f32 %v11163_v46, %v2799_v51  ;;  %v2678_v32 = vpop.f32.mrf.mxu1  ;;  %v2763_v10 = vpop.f32.mrf.mxu0  ;;  %v2329_v16 = vadd.f32 %v11080_v27, %v11014_v55 }
 0x43e   :  { %v11183_v20 = vmax.f32 %v2878_v39, %v2881_v0  ;;  %v2913_v9 = vmax.f32 %v2880_v24, %v2883_v53  ;;  %v2851_v17 = vadd.f32 %v11105_v35, %v2801_v34  ;;  %v2853_v15 = vadd.f32 %v11109_v30, %v2803_v47 }
 0x43f   :  { %v2882_v4 = vmax.f32 %v11181_v43, 0.0  ;;  %v2802_v60 = vadd.f32 %v2678_v32, %v2238_v25  ;;  %v2680_v44 = vpop.f32.mrf.mxu1  ;;  %v2764_v14 = vpop.f32.mrf.mxu0  ;;  %v2242_v39 = vadd.f32 %v11076_v45, %v11010_v49  ;;  %v2246_v24 = vadd.f32 %v11078_v63, %v11012_v31 }
 0x440   :  { %v2884_v33 = vmax.f32 %v2851_v17, 0.0  ;;  %v2886_v58 = vmax.f32 %v2853_v15, 0.0  ;;  %v2804_v41 = vadd.f32 %v2680_v44, %v2240_v1  ;;  %v2806_v56 = vadd.f32 %v2764_v14, %v2324_v7 }
 0x441   :  { %v2682_v57 = vpop.f32.mrf.mxu1  ;;  %v2766_v11 = vpop.f32.mrf.mxu0  ;;  %v11199_v42 = vmax.f32 %v2879_v29, %v2882_v4  ;;  %v11208_v31 = vadd.f32 %v11163_v46, %v2802_v60  ;;  %v2332_v1 = vadd.f32 %v11086_v8, %v11020_v50 }
 0x442   :  { %v11201_v48 = vmax.f32 %v2881_v0, %v2884_v33  ;;  %v11203_v51 = vmax.f32 %v2883_v53, %v2886_v58  ;;  %v2854_v49 = vadd.f32 %v11105_v35, %v2804_v41  ;;  %v2856_v45 = vadd.f32 %v11109_v30, %v2806_v56 }
 0x443   :  { %v2805_v55 = vadd.f32 %v2682_v57, %v2242_v39  ;;  %v2686_v63 = vpop.f32.mrf.mxu1  ;;  %v2769_v27 = vpop.f32.mrf.mxu0  ;;  %v8735_v18 = vpack.i.bf16 %v2913_v9, %v11199_v42  ;;  %v2248_v0 = vadd.f32 %v11082_v62, %v11016_v3  ;;  %v2250_v53 = vadd.f32 %v11084_v21, %v11018_v54  ;;  %v12795_v39 = vld [vmem:[#allocation15_spill] sm:$0xff] }
 0x444   :  { %v2887_v38 = vmax.f32 %v2854_v49, 0.0  ;;  %v2889_v34 = vmax.f32 %v2856_v45, 0.0  ;;  %v2807_v47 = vadd.f32 %v2686_v63, %v2246_v24  ;;  %v2809_v25 = vadd.f32 %v2769_v27, %v2329_v16  ;;  %v12796_v63 = vld [vmem:[#allocation11_spill] sm:$0xff] }
 0x445   :  { %v2855_v7 = vadd.f32 %v11163_v46, %v2805_v55  ;;  %8736 = vrot.lane.b32.xlu1 %v8735_v18, %s9567_s1  ;;  %v2688_v32 = vpop.f32.mrf.mxu1  ;;  %v2771_v10 = vpop.f32.mrf.mxu0  ;;  %v2252_v54 = vadd.f32 %v11088_v40, %v11022_v36  ;;  %v2885_v62 = vmax.f32 %v11208_v31, 0.0 }
 0x446   :  { %v11219_v9 = vmax.f32 %v2884_v33, %v2887_v38  ;;  %v2919_v17 = vmax.f32 %v2886_v58, %v2889_v34  ;;  %v2857_v15 = vadd.f32 %v11105_v35, %v2807_v47  ;;  %v2859_v3 = vadd.f32 %v11109_v30, %v2809_v25  ;;  %v12794_v58 = vld [vmem:[#allocation2_spill] sm:$0xff] }
 0x447   :  { %v2888_v50 = vmax.f32 %v2855_v7, 0.0  ;;  %v2808_v21 = vadd.f32 %v2688_v32, %v2248_v0  ;;  %v2690_v8 = vpop.f32.mrf.mxu1  ;;  %v2772_v60 = vpop.f32.mrf.mxu0  ;;  %v2256_v33 = vadd.f32 %v11090_v2, %v11024_v61  ;;  %v2337_v24 = vadd.f32 %v12795_v39, %v12794_v58  ;;  %v12797_v61 = vld [vmem:[#allocation6_spill] sm:$0xff] }
 0x448   :  { %v2890_v44 = vmax.f32 %v2857_v15, 0.0  ;;  %v2892_v14 = vmax.f32 %v2859_v3, 0.0  ;;  %v2810_v41 = vadd.f32 %v2690_v8, %v2250_v53  ;;  %v2812_v56 = vadd.f32 %v2772_v60, %v2332_v1  ;;  %v12799_v10 = vld [vmem:[#allocation18_spill] sm:$0xff] }
 0x449   :  { %v2858_v16 = vadd.f32 %v11163_v46, %v2808_v21  ;;  %v2692_v57 = vpop.f32.mrf.mxu1  ;;  %v2774_v36 = vpop.f32.mrf.mxu0  ;;  %v11233_v40 = vmax.f32 %v2885_v62, %v2888_v50  ;;  %v2222_v2 = vadd.f32 %v12797_v61, %v12796_v63 }
 0x44a   :  { %v11235_v11 = vmax.f32 %v2887_v38, %v2890_v44  ;;  %v2922_v49 = vmax.f32 %v2889_v34, %v2892_v14  ;;  %v2860_v45 = vadd.f32 %v11105_v35, %v2810_v41  ;;  %v2862_v55 = vadd.f32 %v11109_v30, %v2812_v56  ;;  %v12798_v38 = vld [vmem:[#allocation3_spill] sm:$0xff] }
 0x44b   :  { %v2891_v27 = vmax.f32 %v2858_v16, 0.0  ;;  %v2811_v18 = vadd.f32 %v2692_v57, %v2252_v54  ;;  %v2696_v47 = vpop.f32.mrf.mxu1  ;;  %v2777_v25 = vpop.f32.mrf.mxu0  ;;  %v8740_v0 = vpack.i.bf16 %v2919_v17, %v11233_v40  ;;  %v2258_v34 = vadd.f32 %v12799_v10, %v12798_v38  ;;  %v12800_v16 = vld [vmem:[#allocation14_spill] sm:$0xff] }
 0x44c   :  { %v2893_v53 = vmax.f32 %v2860_v45, 0.0  ;;  %v2895_v1 = vmax.f32 %v2862_v55, 0.0  ;;  %v2813_v7 = vadd.f32 %v2696_v47, %v2256_v33  ;;  %v2815_v32 = vadd.f32 %v2777_v25, %v2337_v24  ;;  %v12801_v57 = vld [vmem:[#allocation10_spill] sm:$0xff]  ;;  %v12802_v55 = vld [vmem:[#allocation17_spill] sm:$0xff] }
 0x44d   :  { %v2793_v15 = vadd.f32 %v11135_v12, %v2222_v2  ;;  %v11245_v3 = vmax.f32 %v2888_v50, %v2891_v27  ;;  %v2861_v21 = vadd.f32 %v11163_v46, %v2811_v18  ;;  %8741 = vrot.lane.b32.xlu0 %v8740_v0, %s9567_s1  ;;  %v2698_v54 = vpop.f32.mrf.mxu1  ;;  %v2779_v8 = vpop.f32.mrf.mxu0  ;;  %v8745_v12 = vpack.i.bf16 %v11235_v11, %v11219_v9  ;;  %v12803_v2 = vld [vmem:[#allocation12_spill] sm:$0xff] }
 0x44e   :  { %v11249_v60 = vmax.f32 %v2890_v44, %v2893_v53  ;;  %v2925_v17 = vmax.f32 %v2892_v14, %v2895_v1  ;;  %v2863_v41 = vadd.f32 %v11105_v35, %v2813_v7  ;;  %v2865_v56 = vadd.f32 %v11109_v30, %v2815_v32  ;;  %v12804_v7 = vld [vmem:[#allocation8_spill] sm:$0xff]  ;;  %v12805_v32 = vld [vmem:[#allocation7_spill] sm:$0xff] }
 0x44f   :  { %v2894_v33 = vmax.f32 %v2861_v21, 0.0  ;;  %v2814_v58 = vadd.f32 %v2698_v54, %v2258_v34  ;;  %v2700_v39 = vpop.f32.mrf.mxu1  ;;  %v2780_v24 = vpop.f32.mrf.mxu0  ;;  %v8750_v50 = vpack.i.bf16 %v2922_v49, %v11245_v3  ;;  %v2212_v36 = vadd.f32 %v12801_v57, %v12800_v16  ;;  %v9162_v16 = vld [vmem:[%s12806_s28 + $0x130] ss:$8 sps:$4 sm:$0xff]   ;;  %v9170_v57 = vld [vmem:[%s12806_s28 + $0x124] ss:$8 sps:$4 sm:$0xff]  }
 0x450   :  { %v2896_v45 = vmax.f32 %v2863_v41, 0.0  ;;  %v2898_v44 = vmax.f32 %v2865_v56, 0.0  ;;  %v2790_v14 = vadd.f32 %v11123_v28, %v12802_v55  ;;  %v2843_v25 = vadd.f32 %v11163_v46, %v2793_v15  ;;  %v9152_v39 = vld [vmem:[%s12806_s28 + $0x154] ss:$8 sps:$4 sm:$0xff]   ;;  %v9158_v24 = vld [vmem:[%s12806_s28 + $0x144] ss:$8 sps:$4 sm:$0xff]  }
 0x451   :  { %v2864_v35 = vadd.f32 %v11163_v46, %v2814_v58  ;;  %8746 = vrot.lane.b32.xlu0 %v8745_v12, %s9567_s1  ;;  %8751 = vrot.lane.b32.xlu1 %v8750_v50, %s9567_s1  ;;  %v2701_v30 = vpop.f32.mrf.mxu1  ;;  %v2781_v63 = vpop.f32.mrf.mxu0  ;;  %v11263_v61 = vmax.f32 %v2891_v27, %v2894_v33  ;;  %v2787_v49 = vadd.f32 %v12803_v2, %v2212_v36  ;;  %v9144_v58 = vld [vmem:[%s12806_s28 + $0x160] ss:$8 sps:$4 sm:$0xff]   ;;  %v9164_v50 = vld [vmem:[%s12806_s28 + $0x134] ss:$8 sps:$4 sm:$0xff]  }
 0x452   :  { %v11266_v18 = vmax.f32 %v2893_v53, %v2896_v45  ;;  %v2928_v47 = vmax.f32 %v2895_v1, %v2898_v44  ;;  %v2784_v38 = vadd.f32 %v12805_v32, %v12804_v7  ;;  %v2840_v10 = vadd.f32 %v11163_v46, %v2790_v14  ;;  %v9156_v12 = vld [vmem:[%s12806_s28 + $0x140] ss:$8 sps:$4 sm:$0xff]   ;;  %v9176_v45 = vld [vmem:[%s12806_s28 + $0x114] ss:$8 sps:$4 sm:$0xff]   ;;  %v9174_v44 = vld [vmem:[%s12806_s28 + $0x110] ss:$8 sps:$4 sm:$0xff]  }
 0x453   :  { %v2897_v0 = vmax.f32 %v2864_v35, 0.0  ;;  %v8755_v28 = vpack.i.bf16 %v2925_v17, %v11263_v61  ;;  %v2837_v27 = vadd.f32 %v11163_v46, %v2787_v49  ;;  %v2876_v21 = vmax.f32 %v2843_v25, 0.0  ;;  %v9168_v36 = vld [vmem:[%s12806_s28 + $0x120] ss:$8 sps:$4 sm:$0xff]   ;;  %v9182_v55 = vld [vmem:[%s12806_s28 + $0x104] ss:$8 sps:$4 sm:$0xff]  }
 0x454   :  { %v11281_v53 = vmax.f32 %v2882_v4, %v2885_v62  ;;  %v8760_v15 = vpack.i.bf16 %v11266_v18, %v11249_v60  ;;  %v2834_v54 = vadd.f32 %v11163_v46, %v2784_v38  ;;  %v2873_v8 = vmax.f32 %v2840_v10, 0.0  ;;  %v9180_v14 = vld [vmem:[%s12806_s28 + $0x100] ss:$8 sps:$4 sm:$0xff]   ;;  %v9188_v35 = vld [vmem:[%s12806_s28 + $0xf4] ss:$8 sps:$4 sm:$0xff]  }
 0x455   :  { %v11273_v34 = vmax.f32 %v2894_v33, %v2897_v0  ;;  %8756 = vrot.lane.b32.xlu1 %v8755_v28, %s9567_s1  ;;  %v2870_v17 = vmax.f32 %v2837_v27, 0.0  ;;  %v11291_v31 = vmax.f32 %v2876_v21, %v2879_v29  ;;  %v8775_v4 = vpack.i.bf16 %v11201_v48, %v11183_v20  ;;  %v9186_v30 = vld [vmem:[%s12806_s28 + $0xf0] ss:$8 sps:$4 sm:$0xff]   ;;  %v9194_v63 = vld [vmem:[%s12806_s28 + $0x1d4] ss:$8 sps:$4 sm:$0xff]  }
 0x456   :  { %v8770_v43 = vpack.i.bf16 %v11203_v51, %v11281_v53  ;;  %v11297_v62 = vmax.f32 %v2873_v8, %v2876_v21  ;;  %v2867_v41 = vmax.f32 %v2834_v54, 0.0  ;;  %v8790_v56 = vpack.i.bf16 %v11165_v6, %v11148_v52  ;;  %v9192_v2 = vld [vmem:[%s12806_s28 + $0x1d0] ss:$8 sps:$4 sm:$0xff]   ;;  %v9200_v49 = vld [vmem:[%s12806_s28 + $0x1c4] ss:$8 sps:$4 sm:$0xff]  }
 0x457   :  { %v8765_v1 = vpack.i.bf16 %v2928_v47, %v11273_v34  ;;  %v8785_v46 = vpack.i.bf16 %v11167_v26, %v11291_v31  ;;  %v11309_v51 = vmax.f32 %v2870_v17, %v2873_v8  ;;  %v8805_v26 = vpack.i.bf16 %v11137_v37, %v11125_v5  ;;  %v9198_v47 = vld [vmem:[%s12806_s28 + $0x1c0] ss:$8 sps:$4 sm:$0xff]  }
 0x458   :  { %v8780_v23 = vpack.i.bf16 %v11150_v59, %v11297_v62  ;;  %v11305_v29 = vmax.f32 %v2867_v41, %v2870_v17 }
 0x459   :  { %8766 = vrot.lane.b32.xlu0 %v8765_v1, %s9567_s1  ;;  %8761 = vrot.lane.b32.xlu1 %v8760_v15, %s9567_s1  ;;  %v8800_v59 = vpack.i.bf16 %v11139_v19, %v11309_v51  ;;  %v9150_v19 = vld [vmem:[%s12806_s28 + $0x150] ss:$8 sps:$4 sm:$0xff]  }
 0x45a   :  { %v8795_v33 = vpack.i.bf16 %v11129_v22, %v11305_v29  ;;  %v9146_v22 = vld [vmem:[%s12806_s28 + $0x164] ss:$8 sps:$4 sm:$0xff]  }
 0x45b   :  { %3479 = vmatprep.subr.bf16.mxu0 %v9146_v22 }
 0x45c   :  { %3480 = vmatpush1.bf16.msra.mxu0 %v9144_v58 }
 0x45d   :  { %8771 = vrot.lane.b32.xlu0 %v8770_v43, %s9567_s1  ;;  %8776 = vrot.lane.b32.xlu1 %v8775_v4, %s9567_s1 }
 0x45e   :  { %3481 = vmatprep.subr.bf16.mxu0 %v9152_v39 }
 0x460   :  { %3482 = vmatpush1.bf16.msra.mxu0 %v9150_v19 }
 0x461   :  { %8786 = vrot.lane.b32.xlu1 %v8785_v46, %s9567_s1  ;;  %8781 = vrot.lane.b32.xlu0 %v8780_v23, %s9567_s1 }
 0x462   :  { %3483 = vmatprep.subr.bf16.mxu0 %v9158_v24 }
 0x464   :  { %3484 = vmatpush1.bf16.msra.mxu0 %v9156_v12 }
 0x465   :  { %8791 = vrot.lane.b32.xlu0 %v8790_v56, %s9567_s1  ;;  %8796 = vrot.lane.b32.xlu1 %v8795_v33, %s9567_s1 }
 0x466   :  { %3485 = vmatprep.subr.bf16.mxu0 %v9164_v50 }
 0x468   :  { %3486 = vmatpush1.bf16.msra.mxu0 %v9162_v16 }
 0x469   :  { %8801 = vrot.lane.b32.xlu0 %v8800_v59, %s9567_s1  ;;  %8806 = vrot.lane.b32.xlu1 %v8805_v26, %s9567_s1 }
 0x46a   :  { %3487 = vmatprep.subr.bf16.mxu0 %v9170_v57 }
 0x46c   :  { %3488 = vmatpush1.bf16.msra.mxu0 %v9168_v36 }
 0x46d   :  { %3489 = vmatprep.subr.bf16.mxu0 %v9176_v45 }
 0x470   :  { %3490 = vmatpush1.bf16.msra.mxu0 %v9174_v44 }
 0x471   :  { %3491 = vmatprep.subr.bf16.mxu0 %v9182_v55 }
 0x474   :  { %3492 = vmatpush1.bf16.msra.mxu0 %v9180_v14 }
 0x475   :  { %3493 = vmatprep.subr.bf16.mxu0 %v9188_v35 }
 0x478   :  { %3494 = vmatpush1.bf16.msra.mxu0 %v9186_v30 }
 0x479   :  { %3497 = vmatprep.subr.bf16.mxu0 %v9194_v63 }
 0x47c   :  { %3498 = vmatpush2.bf16.msra.mxu0 %v9192_v2 }
 0x47d   :  { %3499 = vmatprep.subr.bf16.mxu0 %v9200_v49 }
 0x480   :  { %3500 = vmatpush2.bf16.msra.mxu0 %v9198_v47 }
 0x4b7   :  { %v8737_v25 = vpop.permute.xlu1 %8736 }
 0x4b8   :  { %v8739_v43 = vunpack.i.h.bf16 %v8737_v25  ;;  %v8738_v58 = vunpack.i.l.bf16 %v8737_v25 }
 0x4bf   :  { %v8742_v0 = vpop.permute.xlu0 %8741 }
 0x4c0   :  { %v8744_v7 = vunpack.i.h.bf16 %v8742_v0  ;;  %v8743_v32 = vunpack.i.l.bf16 %v8742_v0 }
 0x4c2   :  { %v3033_v17 = vsel %vm3019_vm5, %v8743_v32, %v8744_v7 }
 0x4c3   :  { %v8752_v28 = vpop.permute.xlu1 %8751  ;;  %v8747_v38 = vpop.permute.xlu0 %8746  ;;  %v3073_v39 = vmax.f32 %v11233_v40, %v3033_v17 }
 0x4c4   :  { %v8754_v10 = vunpack.i.h.bf16 %v8752_v28  ;;  %v8753_v27 = vunpack.i.l.bf16 %v8752_v28  ;;  %v8749_v54 = vunpack.i.h.bf16 %v8747_v38  ;;  %v8748_v8 = vunpack.i.l.bf16 %v8747_v38 }
 0x4c6   :  { %v3035_v4 = vsel %vm3019_vm5, %v8753_v27, %v8754_v10  ;;  %v3032_v22 = vsel %vm3019_vm5, %v8748_v8, %v8743_v32  ;;  %v3034_v19 = vsel %vm3019_vm5, %v8749_v54, %v8753_v27 }
 0x4c7   :  { %v8757_v21 = vpop.permute.xlu1 %8756  ;;  %v3075_v16 = vmax.f32 %v11245_v3, %v3035_v4  ;;  %v3072_v2 = vmax.f32 %v11219_v9, %v3032_v22  ;;  %v3074_v49 = vmax.f32 %v11235_v11, %v3034_v19 }
 0x4c8   :  { %v8759_v1 = vunpack.i.h.bf16 %v8757_v21  ;;  %v8758_v15 = vunpack.i.l.bf16 %v8757_v21 }
 0x4c9   :  { %v3096_v28 = vpack.c.bf16 %v3075_v16, %v3073_v39  ;;  %v3095_v10 = vpack.c.bf16 %v3074_v49, %v3072_v2  ;;  %v9155_v2 = vld [vmem:[%s12806_s28 + $0x44] ss:$8 sps:$4 sm:$0xff]   ;;  %v9153_v49 = vld [vmem:[%s12806_s28 + $0x40] ss:$8 sps:$4 sm:$0xff]  }
 0x4ca   :  { %v3037_v41 = vsel %vm3019_vm5, %v8758_v15, %v8759_v1 }
 0x4cb   :  { %v8767_v46 = vpop.permute.xlu0 %8766  ;;  %v8762_v23 = vpop.permute.xlu1 %8761  ;;  %v3077_v55 = vmax.f32 %v11263_v61, %v3037_v41 }
 0x4cc   :  { %v8769_v56 = vunpack.i.h.bf16 %v8767_v46  ;;  %v8768_v33 = vunpack.i.l.bf16 %v8767_v46  ;;  %v8764_v59 = vunpack.i.h.bf16 %v8762_v23  ;;  %v8763_v26 = vunpack.i.l.bf16 %v8762_v23 }
 0x4ce   :  { %v3039_v24 = vsel %vm3019_vm5, %v8768_v33, %v8769_v56  ;;  %v3038_v12 = vsel %vm3019_vm5, %v8764_v59, %v8768_v33  ;;  %v3036_v50 = vsel %vm3019_vm5, %v8763_v26, %v8758_v15 }
 0x4cf   :  { %v3078_v57 = vmax.f32 %v11266_v18, %v3038_v12  ;;  %v3076_v36 = vmax.f32 %v11249_v60, %v3036_v50  ;;  %v8772_v45 = vpop.permute.xlu0 %8771  ;;  %v8777_v44 = vpop.permute.xlu1 %8776  ;;  %v3079_v14 = vmax.f32 %v11273_v34, %v3039_v24  ;;  %v3029_v18 = vsel %vm3019_vm5, %v8738_v58, %v8739_v43 }
 0x4d0   :  { %v8774_v35 = vunpack.i.h.bf16 %v8772_v45  ;;  %v8773_v40 = vunpack.i.l.bf16 %v8772_v45  ;;  %v8779_v30 = vunpack.i.h.bf16 %v8777_v44  ;;  %v8778_v63 = vunpack.i.l.bf16 %v8777_v44 }
 0x4d1   :  { %v3098_v47 = vpack.c.bf16 %v3079_v14, %v3077_v55  ;;  %v3097_v3 = vpack.c.bf16 %v3078_v57, %v3076_v36  ;;  %v3069_v27 = vmax.f32 %v11199_v42, %v3029_v18  ;;  %v9140_v14 = vld [vmem:[%s12806_s28 + $0x74] ss:$8 sps:$4 sm:$0xff]   ;;  %v9159_v18 = vld [vmem:[%s12806_s28 + $0x30] ss:$8 sps:$4 sm:$0xff]  }
 0x4d2   :  { %v3031_v60 = vsel %vm3019_vm5, %v8773_v40, %v8774_v35  ;;  %v3030_v25 = vsel %vm3019_vm5, %v8779_v30, %v8773_v40  ;;  %v3028_v61 = vsel %vm3019_vm5, %v8778_v63, %v8738_v58  ;;  %v9133_v35 = vld [vmem:[%s12807_s9] sm:$0xff]   ;;  %v9149_v40 = vld [vmem:[%s12806_s28 + $0x54] ss:$8 sps:$4 sm:$0xff]   ;;  %v9134_v30 = vld [vmem:[%s12807_s9 + $0x8] sm:$0xff]  }
 0x4d3   :  { %3144 = vmatprep.subr.bf16.mxu1 %v3098_v47  ;;  %v8787_v34 = vpop.permute.xlu1 %8786  ;;  %v8782_v0 = vpop.permute.xlu0 %8781  ;;  %v3071_v7 = vmax.f32 %v11281_v53, %v3031_v60  ;;  %v3070_v21 = vmax.f32 %v11201_v48, %v3030_v25  ;;  %v3068_v1 = vmax.f32 %v11183_v20, %v3028_v61  ;;  %v9147_v63 = vld [vmem:[%s12806_s28 + $0x50] ss:$8 sps:$4 sm:$0xff]   ;;  %v9161_v47 = vld [vmem:[%s12806_s28 + $0x34] ss:$8 sps:$4 sm:$0xff]   ;;  %v9167_v60 = vld [vmem:[%s12806_s28 + $0x24] ss:$8 sps:$4 sm:$0xff]  }
 0x4d4   :  { %v8789_v32 = vunpack.i.h.bf16 %v8787_v34  ;;  %v8788_v9 = vunpack.i.l.bf16 %v8787_v34  ;;  %v8784_v38 = vunpack.i.h.bf16 %v8782_v0  ;;  %v8783_v11 = vunpack.i.l.bf16 %v8782_v0  ;;  %3145 = vmatpush1.bf16.msra.mxu1 %v3097_v3  ;;  %v9135_v3 = vld [vmem:[%s12807_s9 + $0x10] sm:$0xff]   ;;  %v9165_v25 = vld [vmem:[%s12806_s28 + $0x20] ss:$8 sps:$4 sm:$0xff]   ;;  %v9136_v34 = vld [vmem:[%s12807_s9 + $0x18] sm:$0xff]  }
 0x4d5   :  { %3146 = vmatprep.subr.bf16.mxu1 %v3096_v28  ;;  %v3094_v53 = vpack.c.bf16 %v3071_v7, %v3069_v27  ;;  %v3093_v48 = vpack.c.bf16 %v3070_v21, %v3068_v1  ;;  %v9173_v61 = vld [vmem:[%s12806_s28 + $0x14] ss:$8 sps:$4 sm:$0xff]   ;;  %v9171_v0 = vld [vmem:[%s12806_s28 + $0x10] ss:$8 sps:$4 sm:$0xff]   ;;  %v9179_v28 = vld [vmem:[%s12806_s28 + $0x4] ss:$8 sps:$4 sm:$0xff]  }
 0x4d6   :  { %v3027_v15 = vsel %vm3019_vm5, %v8788_v9, %v8789_v32  ;;  %v3025_v54 = vsel %vm3019_vm5, %v8783_v11, %v8784_v38  ;;  %v9177_v7 = vld [vmem:[%s12806_s28] ss:$8 sps:$4 sm:$0xff]   ;;  %v9185_v32 = vld [vmem:[%s12806_s28 + $0xe4] ss:$8 sps:$4 sm:$0xff]   ;;  %v9203_v1 = vld [vmem:[%s12806_s28 + $0xb4] ss:$8 sps:$4 sm:$0xff]  }
 0x4d7   :  { %v8792_v8 = vpop.permute.xlu0 %8791  ;;  %v8797_v17 = vpop.permute.xlu1 %8796  ;;  %v3065_v43 = vmax.f32 %v11297_v62, %v3025_v54  ;;  %v3067_v4 = vmax.f32 %v11291_v31, %v3027_v15  ;;  %v9183_v38 = vld [vmem:[%s12806_s28 + $0xe0] ss:$8 sps:$4 sm:$0xff]   ;;  %v9197_v27 = vld [vmem:[%s12806_s28 + $0xc4] ss:$8 sps:$4 sm:$0xff]   ;;  %v9201_v15 = vld [vmem:[%s12806_s28 + $0xb0] ss:$8 sps:$4 sm:$0xff]  }
 0x4d8   :  { %v8794_v41 = vunpack.i.h.bf16 %v8792_v8  ;;  %v8793_v46 = vunpack.i.l.bf16 %v8792_v8  ;;  %v8799_v23 = vunpack.i.h.bf16 %v8797_v17  ;;  %v8798_v56 = vunpack.i.l.bf16 %v8797_v17  ;;  %3147 = vmatpush1.bf16.msra.mxu1 %v3095_v10  ;;  %v9189_v10 = vld [vmem:[%s12806_s28 + $0xd0] ss:$8 sps:$4 sm:$0xff]   ;;  %v9195_v21 = vld [vmem:[%s12806_s28 + $0xc0] ss:$8 sps:$4 sm:$0xff]   ;;  %v9209_v54 = vld [vmem:[%s12806_s28 + $0xa4] ss:$8 sps:$4 sm:$0xff]  }
 0x4d9   :  { %3148 = vmatprep.subr.bf16.mxu1 %v3094_v53  ;;  %v3092_v31 = vpack.c.bf16 %v3067_v4, %v3065_v43  ;;  %v9207_v8 = vld [vmem:[%s12806_s28 + $0xa0] ss:$8 sps:$4 sm:$0xff]   ;;  %v9206_v17 = vld [vmem:[%s12806_s28 + $0x1b4] ss:$8 sps:$4 sm:$0xff]   ;;  %v9204_v53 = vld [vmem:[%s12806_s28 + $0x1b0] ss:$8 sps:$4 sm:$0xff]  }
 0x4da   :  { %v3026_v42 = vsel %vm3019_vm5, %v8794_v41, %v8788_v9  ;;  %v3024_v20 = vsel %vm3019_vm5, %v8793_v46, %v8783_v11  ;;  %v3021_v26 = vsel %vm3019_vm5, %v8798_v56, %v8799_v23  ;;  %v9137_v9 = vld [vmem:[%s12807_s9 + $0x20] ss:$0 sps:$4 sm:$0xff]   ;;  %v9191_v11 = vld [vmem:[%s12806_s28 + $0xd4] ss:$8 sps:$4 sm:$0xff]   ;;  %3501 = vmatprep.subr.bf16.mxu0 %v9206_v17  ;;  %v9213_v4 = vld [vmem:[%s12806_s28 + $0x90] ss:$8 sps:$4 sm:$0xff]  }
 0x4db   :  { %v3066_v33 = vmax.f32 %v11165_v6, %v3026_v42  ;;  %v3064_v59 = vmax.f32 %v11148_v52, %v3024_v20  ;;  %v8802_v62 = vpop.permute.xlu0 %8801  ;;  %v8807_v58 = vpop.permute.xlu1 %8806  ;;  %v3061_v36 = vmax.f32 %v11305_v29, %v3021_v26  ;;  %v12808_v29 = vmov 0   ;;  %v9215_v43 = vld [vmem:[%s12806_s28 + $0x94] ss:$8 sps:$4 sm:$0xff]   ;;  %3502 = vmatpush2.bf16.msra.mxu0 %v9204_v53  ;;  %v9212_v41 = vld [vmem:[%s12806_s28 + $0x1a4] ss:$8 sps:$4 sm:$0xff]   ;;  %s12812_s9 = sld [smem:[#allocation28_spill]] }
 0x4dc   :  { %v8804_v22 = vunpack.i.h.bf16 %v8802_v62  ;;  %v8803_v19 = vunpack.i.l.bf16 %v8802_v62  ;;  %v8809_v39 = vunpack.i.h.bf16 %v8807_v58  ;;  %v8808_v24 = vunpack.i.l.bf16 %v8807_v58  ;;  %3149 = vmatpush1.bf16.msra.mxu1 %v3093_v48  ;;  %v9210_v46 = vld [vmem:[%s12806_s28 + $0x1a0] ss:$8 sps:$4 sm:$0xff]   ;;  %3503 = vmatprep.subr.bf16.mxu0 %v9212_v41  ;;  %v9221_v23 = vld [vmem:[%s12806_s28 + $0x84] ss:$8 sps:$4 sm:$0xff]   ;;  %v9218_v42 = vld [vmem:[%s12806_s28 + $0x194] ss:$8 sps:$4 sm:$0xff]  }
 0x4dd   :  { %3150 = vmatprep.subr.bf16.mxu1 %v3092_v31  ;;  %v3091_v12 = vpack.c.bf16 %v3066_v33, %v3064_v59  ;;  %v9216_v20 = vld [vmem:[%s12806_s28 + $0x190] ss:$8 sps:$4 sm:$0xff]   ;;  %v9224_v48 = vld [vmem:[%s12806_s28 + $0x184] ss:$8 sps:$4 sm:$0xff]   ;;  %v9222_v33 = vld [vmem:[%s12806_s28 + $0x180] ss:$8 sps:$4 sm:$0xff]  }
 0x4de   :  { %v3023_v50 = vsel %vm3019_vm5, %v8803_v19, %v8804_v22  ;;  %v3022_v16 = vsel %vm3019_vm5, %v8809_v39, %v8803_v19  ;;  %v3020_v6 = vsel %vm3019_vm5, %v8808_v24, %v8798_v56  ;;  %v9219_v56 = vld [vmem:[%s12806_s28 + $0x80] ss:$8 sps:$4 sm:$0xff]   ;;  %v9227_v59 = vld [vmem:[%s12806_s28 + $0x174] ss:$8 sps:$4 sm:$0xff]   ;;  %v9225_v26 = vld [vmem:[%s12806_s28 + $0x170] ss:$8 sps:$4 sm:$0xff]  }
 0x4df   :  { %v3062_v52 = vmax.f32 %v11137_v37, %v3022_v16  ;;  %v3060_v57 = vmax.f32 %v11125_v5, %v3020_v6  ;;  %v3063_v45 = vmax.f32 %v11309_v51, %v3023_v50  ;;  %v9138_v5 = vld [vmem:[%s12806_s28 + $0x70] ss:$8 sps:$4 sm:$0xff]   ;;  %v9143_v37 = vld [vmem:[%s12806_s28 + $0x64] ss:$8 sps:$4 sm:$0xff]   ;;  %v9141_v51 = vld [vmem:[%s12806_s28 + $0x60] ss:$8 sps:$4 sm:$0xff]   ;;  %3504 = vmatpush2.bf16.msra.mxu0 %v9210_v46 }
 0x4e0   :  { %3151 = vmatpush1.bf16.msra.mxu1 %v3091_v12  ;;  %3505 = vmatprep.subr.bf16.mxu0 %v9218_v42  ;;  %v9230_v62 = vld [vmem:[%s12806_s28 + $0x254] ss:$8 sps:$4 sm:$0xff]   ;;  %v9243_v41 = vld [vmem:[%s12806_s28 + $0x200] ss:$8 sps:$4 sm:$0xff]   ;;  %v9251_v42 = vld [vmem:[%s12806_s28 + $0x1e4] ss:$8 sps:$4 sm:$0xff]  }
 0x4e1   :  { %v3090_v44 = vpack.c.bf16 %v3063_v45, %v3061_v36  ;;  %v3089_v55 = vpack.c.bf16 %v3062_v52, %v3060_v57 }
 0x4e3   :  { %3152 = vmatprep.subr.bf16.mxu1 %v3090_v44  ;;  %3506 = vmatpush2.bf16.msra.mxu0 %v9216_v20  ;;  %v9249_v20 = vld [vmem:[%s12806_s28 + $0x1e0] ss:$8 sps:$4 sm:$0xff]  }
 0x4e4   :  { %3153 = vmatpush1.bf16.msra.mxu1 %v3089_v55  ;;  %3507 = vmatprep.subr.bf16.mxu0 %v9224_v48  ;;  %v9254_v48 = vld [vmem:[%s12806_s28 + $0x2c4] ss:$8 sps:$4 sm:$0xff]  }
 0x4e5   :  { %3712 = vmatprep.subr.bf16.mxu1 %v9140_v14 }
 0x4e7   :  { %7746 = vmatmul.mubr.msk.bf16.vlgmr.msra.gmra.mxu1 %vm3122_vm6, %v9133_v35  ;;  %3508 = vmatpush2.bf16.msra.mxu0 %v9222_v33  ;;  %v9252_v33 = vld [vmem:[%s12806_s28 + $0x2c0] ss:$8 sps:$4 sm:$0xff]  }
 0x4e8   :  { %3180 = vmatprep.mubr.bf16.mxu1 %v12808_v29  ;;  %3713 = vmatpush1.bf16.msra.mxu1 %v9138_v5  ;;  %v9228_v5 = vld [vmem:[%s12806_s28 + $0x250] ss:$8 sps:$4 sm:$0xff]  }
 0x4e9   :  { %3714 = vmatprep.subr.bf16.mxu1 %v9143_v37  ;;  %3509 = vmatprep.subr.bf16.mxu0 %v9227_v59  ;;  %v9257_v59 = vld [vmem:[%s12806_s28 + $0x2b4] ss:$8 sps:$4 sm:$0xff]  }
 0x4eb   :  { %3510 = vmatpush2.bf16.msra.mxu0 %v9225_v26  ;;  %v9255_v26 = vld [vmem:[%s12806_s28 + $0x2b0] ss:$8 sps:$4 sm:$0xff]  }
 0x4ec   :  { %3715 = vmatpush1.bf16.msra.mxu1 %v9141_v51  ;;  %3967 = vmatprep.subr.bf16.mxu0 %v9230_v62  ;;  %v9233_v51 = vld [vmem:[%s12806_s28 + $0x244] ss:$8 sps:$4 sm:$0xff]  }
 0x4ed   :  { %3716 = vmatprep.subr.bf16.mxu1 %v9149_v40  ;;  %v9260_v62 = vld [vmem:[%s12806_s28 + $0x2a4] ss:$8 sps:$4 sm:$0xff]  }
 0x4ef   :  { %7747 = vmatmul.mubr.msk.bf16.gmra.mxu1 %vm3122_vm6, %v9134_v30 }
 0x4f0   :  { %3190 = vmatprep.mubr.bf16.mxu1 %v12808_v29  ;;  %3717 = vmatpush1.bf16.msra.mxu1 %v9147_v63 }
 0x4f1   :  { %3718 = vmatprep.subr.bf16.mxu1 %v9155_v2 }
 0x4f4   :  { %3719 = vmatpush1.bf16.msra.mxu1 %v9153_v49  ;;  %v9231_v49 = vld [vmem:[%s12806_s28 + $0x240] ss:$8 sps:$4 sm:$0xff]  }
 0x4f5   :  { %3720 = vmatprep.subr.bf16.mxu1 %v9161_v47 }
 0x4f7   :  { %7748 = vmatmul.mubr.msk.bf16.gmra.mxu1 %vm3122_vm6, %v9135_v3  ;;  %v9236_v3 = vld [vmem:[%s12806_s28 + $0x234] ss:$8 sps:$4 sm:$0xff]  }
 0x4f8   :  { %3200 = vmatprep.mubr.bf16.mxu1 %v12808_v29  ;;  %3721 = vmatpush1.bf16.msra.mxu1 %v9159_v18 }
 0x4f9   :  { %3722 = vmatprep.subr.bf16.mxu1 %v9167_v60 }
 0x4fc   :  { %3723 = vmatpush1.bf16.msra.mxu1 %v9165_v25 }
 0x4fd   :  { %3724 = vmatprep.subr.bf16.mxu1 %v9173_v61 }
 0x4ff   :  { %7749 = vmatmul.mubr.msk.bf16.gmra.mxu1 %vm3122_vm6, %v9136_v34  ;;  %v9234_v34 = vld [vmem:[%s12806_s28 + $0x230] ss:$8 sps:$4 sm:$0xff]  }
 0x500   :  { %3210 = vmatprep.mubr.bf16.mxu1 %v12808_v29  ;;  %3725 = vmatpush1.bf16.msra.mxu1 %v9171_v0 }
 0x501   :  { %3726 = vmatprep.subr.bf16.mxu1 %v9179_v28  ;;  %v9239_v28 = vld [vmem:[%s12806_s28 + $0x224] ss:$8 sps:$4 sm:$0xff]  }
 0x504   :  { %3727 = vmatpush1.bf16.msra.mxu1 %v9177_v7 }
 0x505   :  { %3730 = vmatprep.subr.bf16.mxu1 %v9185_v32 }
 0x507   :  { %7750 = vmatmul.mubr.msk.bf16.gmra.mxu1 %vm3122_vm6, %v9137_v9 }
 0x508   :  { %3731 = vmatpush2.bf16.msra.mxu1 %v9183_v38 }
 0x509   :  { %3732 = vmatprep.subr.bf16.mxu1 %v9191_v11  ;;  %v9237_v11 = vld [vmem:[%s12806_s28 + $0x220] ss:$8 sps:$4 sm:$0xff]  }
 0x50c   :  { %3733 = vmatpush2.bf16.msra.mxu1 %v9189_v10 }
 0x50d   :  { %3734 = vmatprep.subr.bf16.mxu1 %v9197_v27 }
 0x510   :  { %3735 = vmatpush2.bf16.msra.mxu1 %v9195_v21  ;;  %v9242_v21 = vld [vmem:[%s12806_s28 + $0x214] ss:$8 sps:$4 sm:$0xff]  }
 0x511   :  { %3736 = vmatprep.subr.bf16.mxu1 %v9203_v1 }
 0x514   :  { %3737 = vmatpush2.bf16.msra.mxu1 %v9201_v15 }
 0x515   :  { %3738 = vmatprep.subr.bf16.mxu1 %v9209_v54  ;;  %v9240_v54 = vld [vmem:[%s12806_s28 + $0x210] ss:$8 sps:$4 sm:$0xff]  }
 0x518   :  { %3739 = vmatpush2.bf16.msra.mxu1 %v9207_v8 }
 0x519   :  { %3740 = vmatprep.subr.bf16.mxu1 %v9215_v43  ;;  %v9245_v43 = vld [vmem:[%s12806_s28 + $0x204] ss:$8 sps:$4 sm:$0xff]  }
 0x51c   :  { %3741 = vmatpush2.bf16.msra.mxu1 %v9213_v4 }
 0x51d   :  { %3742 = vmatprep.subr.bf16.mxu1 %v9221_v23  ;;  %v9248_v23 = vld [vmem:[%s12806_s28 + $0x1f4] ss:$8 sps:$4 sm:$0xff]  }
 0x520   :  { %3743 = vmatpush2.bf16.msra.mxu1 %v9219_v56  ;;  %v9246_v56 = vld [vmem:[%s12806_s28 + $0x1f0] ss:$8 sps:$4 sm:$0xff]  }
 0x5a7   :  { %v3172_v58 = vpop.f32.mrf.mxu1 }
 0x5a9   :  { %v3174_v31 = vpop.f32.mrf.mxu1 }
 0x5ab   :  { %v3176_v22 = vpop.f32.mrf.mxu1 }
 0x5ac   :  { %v3219_v24 = vpack.c.bf16 %v3176_v22, %v3172_v58  ;;  %v9258_v58 = vld [vmem:[%s12806_s28 + $0x2a0] ss:$8 sps:$4 sm:$0xff]   ;;  %v9261_v22 = vld [vmem:[%s12806_s28 + $0x290] ss:$8 sps:$4 sm:$0xff]  }
 0x5ad   :  { %v3178_v19 = vpop.f32.mrf.mxu1 }
 0x5ae   :  { %v3220_v39 = vpack.c.bf16 %v3178_v19, %v3174_v31  ;;  %v3298_v14 = vrot.slane %v3219_v24, 4  ;;  %v9263_v31 = vld [vmem:[%s12806_s28 + $0x294] ss:$8 sps:$4 sm:$0xff]   ;;  %v9266_v19 = vld [vmem:[%s12806_s28 + $0x284] ss:$8 sps:$4 sm:$0xff]  }
 0x5af   :  { %v3182_v12 = vpop.f32.mrf.mxu1 }
 0x5b0   :  { %7845 = vmatprep.mubr.msk.bf16.mxu1 %vm3466_vm7, %v3220_v39  ;;  %v3301_v44 = vrot.slane %v3220_v39, 4  ;;  %v9264_v39 = vld [vmem:[%s12806_s28 + $0x280] ss:$8 sps:$4 sm:$0xff]  }
 0x5b1   :  { %v3184_v50 = vpop.f32.mrf.mxu1  ;;  %3745 = vmatmul.mubr.bf16.vlgmr.msra.gmra.mxu1 %v3219_v24  ;;  %v9269_v24 = vld [vmem:[%s12806_s28 + $0x274] ss:$8 sps:$4 sm:$0xff]  }
 0x5b3   :  { %v3186_v16 = vpop.f32.mrf.mxu1 }
 0x5b4   :  { %v11571_v6 = vpack.c.bf16 %v3186_v16, %v3182_v12  ;;  %v9267_v12 = vld [vmem:[%s12806_s28 + $0x270] ss:$8 sps:$4 sm:$0xff]   ;;  %v9270_v16 = vld [vmem:[%s12806_s28 + $0x260] ss:$8 sps:$4 sm:$0xff]  }
 0x5b5   :  { %v3188_v52 = vpop.f32.mrf.mxu1 }
 0x5b6   :  { %v11573_v57 = vpack.c.bf16 %v3188_v52, %v3184_v50  ;;  %v3299_v36 = vrot.slane %v11571_v6, 4  ;;  %v9272_v50 = vld [vmem:[%s12806_s28 + $0x264] ss:$8 sps:$4 sm:$0xff]  }
 0x5b7   :  { %v3192_v45 = vpop.f32.mrf.mxu1 }
 0x5b8   :  { %v3302_v55 = vrot.slane %v11573_v57, 4  ;;  %7846 = vmatprep.mubr.msk.bf16.mxu1 %vm3466_vm7, %v11573_v57  ;;  %v3300_v30 = vsel %vm157_vm0, %v3298_v14, %v3299_v36 }
 0x5b9   :  { %v3194_v35 = vpop.f32.mrf.mxu1  ;;  %3755 = vmatmul.mubr.bf16.gmra.mxu1 %v11571_v6 }
 0x5ba   :  { %v3303_v37 = vsel %vm157_vm0, %v3301_v44, %v3302_v55 }
 0x5bb   :  { %v3196_v40 = vpop.f32.mrf.mxu1  ;;  %7811 = vmatprep.mubr.msk.bf16.mxu0 %vm3466_vm7, %v3303_v37 }
 0x5bc   :  { %v11589_v63 = vpack.c.bf16 %v3196_v40, %v3192_v45  ;;  %3512 = vmatmul.mubr.bf16.vlgmr.msra.gmra.mxu0 %v3300_v30 }
 0x5bd   :  { %3968 = vmatpush1.bf16.msra.mxu0 %v9228_v5  ;;  %v3198_v2 = vpop.f32.mrf.mxu1 }
 0x5be   :  { %v11594_v47 = vpack.c.bf16 %v3198_v2, %v3194_v35  ;;  %3969 = vmatprep.subr.bf16.mxu0 %v9233_v51  ;;  %v3304_v18 = vrot.slane %v11589_v63, 4 }
 0x5bf   :  { %v3202_v60 = vpop.f32.mrf.mxu1 }
 0x5c0   :  { %v3306_v25 = vrot.slane %v11594_v47, 4  ;;  %7847 = vmatprep.mubr.msk.bf16.mxu1 %vm3466_vm7, %v11594_v47  ;;  %v3305_v32 = vsel %vm157_vm0, %v3299_v36, %v3304_v18 }
 0x5c1   :  { %3970 = vmatpush1.bf16.msra.mxu0 %v9231_v49  ;;  %v3204_v61 = vpop.f32.mrf.mxu1  ;;  %3765 = vmatmul.mubr.bf16.gmra.mxu1 %v11589_v63 }
 0x5c2   :  { %v3307_v0 = vsel %vm157_vm0, %v3302_v55, %v3306_v25  ;;  %3971 = vmatprep.subr.bf16.mxu0 %v9236_v3 }
 0x5c3   :  { %v3206_v7 = vpop.f32.mrf.mxu1  ;;  %7812 = vmatprep.mubr.msk.bf16.mxu0 %vm3466_vm7, %v3307_v0 }
 0x5c4   :  { %v11613_v9 = vpack.c.bf16 %v3206_v7, %v3202_v60  ;;  %3522 = vmatmul.mubr.bf16.gmra.mxu0 %v3305_v32 }
 0x5c5   :  { %3972 = vmatpush1.bf16.msra.mxu0 %v9234_v34  ;;  %v3208_v38 = vpop.f32.mrf.mxu1 }
 0x5c6   :  { %v3308_v10 = vrot.slane %v11613_v9, 4  ;;  %v11619_v27 = vpack.c.bf16 %v3208_v38, %v3204_v61  ;;  %3973 = vmatprep.subr.bf16.mxu0 %v9239_v28 }
 0x5c7   :  { %v11624_v1 = vpop.f32.mrf.mxu1 }
 0x5c8   :  { %v3310_v15 = vrot.slane %v11619_v27, 4  ;;  %7848 = vmatprep.mubr.msk.bf16.mxu1 %vm3466_vm7, %v11619_v27  ;;  %v3309_v8 = vsel %vm157_vm0, %v3304_v18, %v3308_v10 }
 0x5c9   :  { %3974 = vmatpush1.bf16.msra.mxu0 %v9237_v11  ;;  %3775 = vmatmul.mubr.bf16.gmra.mxu1 %v11613_v9  ;;  %v3214_v17 = vpop.f32.mrf.mxu1 }
 0x5ca   :  { %v3311_v53 = vsel %vm157_vm0, %v3306_v25, %v3310_v15  ;;  %3975 = vmatprep.subr.bf16.mxu0 %v9242_v21  ;;  %4247 = vmatprep.mubr.bf16.mxu1 %v12808_v29  ;;  %v3228_v52 = vpack.c.bf16 %v3214_v17, %v3214_v17 }
 0x5cb   :  { %7813 = vmatprep.mubr.msk.bf16.mxu0 %vm3466_vm7, %v3311_v53  ;;  %v3216_v4 = vpop.f32.mrf.mxu1 }
 0x5cc   :  { %3532 = vmatmul.mubr.bf16.gmra.mxu0 %v3309_v8 }
 0x5cd   :  { %3976 = vmatpush1.bf16.msra.mxu0 %v9240_v54  ;;  %7814 = vmatprep.mubr.msk.bf16.mxu0 %vm3466_vm7, %v3310_v15  ;;  %v3217_v46 = vpop.f32.mrf.mxu1 }
 0x5ce   :  { %3977 = vmatprep.subr.bf16.mxu0 %v9245_v43  ;;  %v4052_v46 = vld [vmem:[%s12809_s29] sm:$0x3] }
 0x5d1   :  { %3978 = vmatpush1.bf16.msra.mxu0 %v9243_v41 }
 0x5d2   :  { %3979 = vmatprep.subr.bf16.mxu0 %v9248_v23 }
 0x5d4   :  { %3542 = vmatmul.mubr.bf16.gmra.mxu0 %v3308_v10 }
 0x5d5   :  { %3980 = vmatpush1.bf16.msra.mxu0 %v9246_v56  ;;  %7909 = vmatprep.mubr.msk.bf16.mxu0 %vm3466_vm7, %v11573_v57  ;;  %v3227_v57 = vpack.c.bf16 %v11624_v1, %v11624_v1 }
 0x5d6   :  { %3981 = vmatprep.subr.bf16.mxu0 %v9251_v42  ;;  %v12810_v42 = vld [vmem:[#allocation5_spill] sm:$0xff] }
 0x5d9   :  { %3982 = vmatpush1.bf16.msra.mxu0 %v9249_v20  ;;  %v11724_v20 = vrot.slane %v4052_v46, %v12810_v42 }
 0x5da   :  { %3985 = vmatprep.subr.bf16.mxu0 %v9254_v48 }
 0x5dd   :  { %3986 = vmatpush2.bf16.msra.mxu0 %v9252_v33  ;;  %v11727_v33 = vrot.slane %v4052_v46, %v10164_v13 }
 0x5de   :  { %3987 = vmatprep.subr.bf16.mxu0 %v9257_v59 }
 0x5e1   :  { %3988 = vmatpush2.bf16.msra.mxu0 %v9255_v26 }
 0x5e2   :  { %3989 = vmatprep.subr.bf16.mxu0 %v9260_v62 }
 0x5e5   :  { %3990 = vmatpush2.bf16.msra.mxu0 %v9258_v58 }
 0x5e6   :  { %3991 = vmatprep.subr.bf16.mxu0 %v9263_v31 }
 0x5e9   :  { %3992 = vmatpush2.bf16.msra.mxu0 %v9261_v22 }
 0x5ea   :  { %3993 = vmatprep.subr.bf16.mxu0 %v9266_v19 }
 0x5ed   :  { %3994 = vmatpush2.bf16.msra.mxu0 %v9264_v39 }
 0x5ee   :  { %3995 = vmatprep.subr.bf16.mxu0 %v9269_v24 }
 0x5f1   :  { %3996 = vmatpush2.bf16.msra.mxu0 %v9267_v12 }
 0x5f2   :  { %3997 = vmatprep.subr.bf16.mxu0 %v9272_v50 }
 0x5f5   :  { %3998 = vmatpush2.bf16.msra.mxu0 %v9270_v16 }
 0x5f8   :  { %4000 = vmatmul.mubr.bf16.vlgmr.msra.gmra.mxu0 %v11571_v6 }
 0x5f9   :  { %7910 = vmatprep.mubr.msk.bf16.mxu0 %vm3466_vm7, %v11594_v47 }
 0x600   :  { %4010 = vmatmul.mubr.bf16.gmra.mxu0 %v11589_v63 }
 0x601   :  { %7911 = vmatprep.mubr.msk.bf16.mxu0 %vm3466_vm7, %v11619_v27 }
 0x608   :  { %4020 = vmatmul.mubr.bf16.gmra.mxu0 %v11613_v9 }
 0x609   :  { %7912 = vmatprep.mubr.msk.bf16.mxu0 %vm3466_vm7, %v3228_v52 }
 0x610   :  { %4030 = vmatmul.mubr.bf16.gmra.mxu0 %v3227_v57 }
 0x671   :  { %v3746_v36 = vpop.f32.mrf.mxu1 }
 0x673   :  { %v3748_v45 = vpop.f32.mrf.mxu1 }
 0x675   :  { %v3750_v6 = vpop.f32.mrf.mxu1 }
 0x677   :  { %v3752_v44 = vpop.f32.mrf.mxu1 }
 0x679   :  { %v3756_v55 = vpop.f32.mrf.mxu1 }
 0x67b   :  { %v3758_v14 = vpop.f32.mrf.mxu1 }
 0x67c   :  { %v3513_v35 = vpop.f32.mrf.mxu0 }
 0x67d   :  { %v3747_v5 = vadd.f32 %v3746_v36, %v3513_v35  ;;  %v3760_v37 = vpop.f32.mrf.mxu1 }
 0x67e   :  { %v3515_v51 = vpop.f32.mrf.mxu0 }
 0x67f   :  { %v3749_v40 = vadd.f32 %v3748_v45, %v3515_v51  ;;  %v3762_v30 = vpop.f32.mrf.mxu1 }
 0x680   :  { %v3517_v63 = vpop.f32.mrf.mxu0 }
 0x681   :  { %v3751_v2 = vadd.f32 %v3750_v6, %v3517_v63  ;;  %v3766_v49 = vpop.f32.mrf.mxu1 }
 0x682   :  { %v3519_v47 = vpop.f32.mrf.mxu0 }
 0x683   :  { %v3753_v3 = vadd.f32 %v3752_v44, %v3519_v47  ;;  %v3768_v18 = vpop.f32.mrf.mxu1 }
 0x684   :  { %v3523_v60 = vpop.f32.mrf.mxu0 }
 0x685   :  { %v3757_v25 = vadd.f32 %v3756_v55, %v3523_v60  ;;  %v11710_v61 = vpop.f32.mrf.mxu1 }
 0x686   :  { %v3525_v34 = vpop.f32.mrf.mxu0 }
 0x687   :  { %v3759_v0 = vadd.f32 %v3758_v14, %v3525_v34  ;;  %v11712_v28 = vpop.f32.mrf.mxu1 }
 0x688   :  { %v3527_v7 = vpop.f32.mrf.mxu0 }
 0x689   :  { %v3761_v32 = vadd.f32 %v3760_v37, %v3527_v7  ;;  %v11714_v9 = vpop.f32.mrf.mxu1 }
 0x68a   :  { %v3529_v38 = vpop.f32.mrf.mxu0 }
 0x68b   :  { %v3763_v11 = vadd.f32 %v3762_v30, %v3529_v38  ;;  %v11716_v10 = vpop.f32.mrf.mxu1 }
 0x68c   :  { %v3533_v27 = vpop.f32.mrf.mxu0 }
 0x68d   :  { %v3767_v21 = vadd.f32 %v3766_v49, %v3533_v27  ;;  %v3780_v1 = vpop.f32.mrf.mxu1 }
 0x68e   :  { %v3535_v15 = vpop.f32.mrf.mxu0 }
 0x68f   :  { %v3781_v54 = vpop.f32.mrf.mxu1  ;;  %v3769_v47 = vadd.f32 %v3768_v18, %v3535_v15 }
 0x690   :  { %v3537_v8 = vpop.f32.mrf.mxu0 }
 0x691   :  { %v3771_v7 = vadd.f32 %v11710_v61, %v3537_v8 }
 0x692   :  { %v3539_v17 = vpop.f32.mrf.mxu0 }
 0x694   :  { %v3543_v53 = vpop.f32.mrf.mxu0 }
 0x696   :  { %v11718_v43 = vpop.f32.mrf.mxu0 }
 0x698   :  { %v3547_v4 = vpop.f32.mrf.mxu0 }
 0x699   :  { %v3773_v4 = vadd.f32 %v11712_v28, %v3539_v17 }
 0x69a   :  { %v3548_v41 = vpop.f32.mrf.mxu0 }
 0x6b8   :  { %v4001_v23 = vpop.f32.mrf.mxu0 }
 0x6b9   :  { %v4038_v56 = vadd.f32 %v4001_v23, %v3747_v5 }
 0x6ba   :  { %v4003_v48 = vpop.f32.mrf.mxu0 }
 0x6bb   :  { %v4039_v59 = vadd.f32 %v4003_v48, %v3749_v40  ;;  %v4064_v62 = vadd.f32 %v11724_v20, %v4038_v56 }
 0x6bc   :  { %v4005_v26 = vpop.f32.mrf.mxu0 }
 0x6bd   :  { %v4040_v58 = vadd.f32 %v4005_v26, %v3751_v2  ;;  %v4065_v31 = vadd.f32 %v11727_v33, %v4039_v59  ;;  %v4078_v12 = vmax.f32 %v4064_v62, 0.0  ;;  %v3779_v59 = vadd.f32 %v11716_v10, %v11718_v43 }
 0x6be   :  { %v4007_v22 = vpop.f32.mrf.mxu0 }
 0x6bf   :  { %v4066_v19 = vadd.f32 %v11724_v20, %v4040_v58  ;;  %v4041_v39 = vadd.f32 %v4007_v22, %v3753_v3  ;;  %v4079_v57 = vmax.f32 %v4065_v31, 0.0 }
 0x6c0   :  { %v4011_v24 = vpop.f32.mrf.mxu0 }
 0x6c1   :  { %v4080_v50 = vmax.f32 %v4066_v19, 0.0  ;;  %v4067_v16 = vadd.f32 %v11727_v33, %v4041_v39  ;;  %v4042_v52 = vadd.f32 %v4011_v24, %v3757_v25 }
 0x6c2   :  { %v4013_v36 = vpop.f32.mrf.mxu0 }
 0x6c3   :  { %v11733_v45 = vmax.f32 %v4078_v12, %v4080_v50  ;;  %v4081_v6 = vmax.f32 %v4067_v16, 0.0  ;;  %v4068_v44 = vadd.f32 %v11724_v20, %v4042_v52  ;;  %v4043_v55 = vadd.f32 %v4013_v36, %v3759_v0 }
 0x6c4   :  { %v4015_v14 = vpop.f32.mrf.mxu0 }
 0x6c5   :  { %v11736_v35 = vmax.f32 %v4079_v57, %v4081_v6  ;;  %v4082_v5 = vmax.f32 %v4068_v44, 0.0  ;;  %v4069_v37 = vadd.f32 %v11727_v33, %v4043_v55  ;;  %v4044_v51 = vadd.f32 %v4015_v14, %v3761_v32  ;;  %v9280_v55 = vld [vmem:[%s12811_s10 + $0x148] ss:$8 sps:$4 sm:$0xff]   ;;  %v9282_v14 = vld [vmem:[%s12811_s10 + $0x14c] ss:$8 sps:$4 sm:$0xff]  }
 0x6c6   :  { %v4017_v40 = vpop.f32.mrf.mxu0  ;;  %4519 = vmatprep.subr.bf16.mxu0 %v9282_v14 }
 0x6c7   :  { %v11739_v30 = vmax.f32 %v4080_v50, %v4082_v5  ;;  %v4083_v63 = vmax.f32 %v4069_v37, 0.0  ;;  %v4070_v2 = vadd.f32 %v11724_v20, %v4044_v51  ;;  %v4045_v49 = vadd.f32 %v4017_v40, %v3763_v11  ;;  %4520 = vmatpush1.bf16.msra.mxu0 %v9280_v55  ;;  %v9288_v37 = vld [vmem:[%s12811_s10 + $0x13c] ss:$8 sps:$4 sm:$0xff]   ;;  %v9294_v51 = vld [vmem:[%s12811_s10 + $0x12c] ss:$8 sps:$4 sm:$0xff]  }
 0x6c8   :  { %v4021_v3 = vpop.f32.mrf.mxu0  ;;  %4521 = vmatprep.subr.bf16.mxu0 %v9288_v37  ;;  %v9292_v40 = vld [vmem:[%s12811_s10 + $0x128] ss:$8 sps:$4 sm:$0xff]  }
 0x6c9   :  { %v11742_v60 = vmax.f32 %v4081_v6, %v4083_v63  ;;  %v4084_v25 = vmax.f32 %v4070_v2, 0.0  ;;  %v4071_v34 = vadd.f32 %v11727_v33, %v4045_v49  ;;  %v4046_v0 = vadd.f32 %v4021_v3, %v3767_v21  ;;  %v9298_v2 = vld [vmem:[%s12811_s10 + $0x118] ss:$8 sps:$4 sm:$0xff]   ;;  %v9306_v49 = vld [vmem:[%s12811_s10 + $0x10c] ss:$8 sps:$4 sm:$0xff]  }
 0x6ca   :  { %v4023_v38 = vpop.f32.mrf.mxu0  ;;  %v3777_v21 = vadd.f32 %v11714_v9, %v3543_v53  ;;  %v8830_v6 = vpack.i.bf16 %v11736_v35, %v11733_v45  ;;  %v9312_v3 = vld [vmem:[%s12811_s10 + $0xfc] ss:$8 sps:$4 sm:$0xff]  }
 0x6cb   :  { %v11746_v27 = vmax.f32 %v4082_v5, %v4084_v25  ;;  %v4085_v32 = vmax.f32 %v4071_v34, 0.0  ;;  %v4072_v1 = vadd.f32 %v11724_v20, %v4046_v0  ;;  %v4047_v54 = vadd.f32 %v4023_v38, %v3769_v47  ;;  %v9286_v5 = vld [vmem:[%s12811_s10 + $0x138] ss:$8 sps:$4 sm:$0xff]   ;;  %v9304_v47 = vld [vmem:[%s12811_s10 + $0x108] ss:$8 sps:$4 sm:$0xff]  }
 0x6cc   :  { %v4025_v11 = vpop.f32.mrf.mxu0  ;;  %v8835_v44 = vpack.i.bf16 %v11742_v60, %v11739_v30  ;;  %4522 = vmatpush1.bf16.msra.mxu0 %v9286_v5  ;;  %v9318_v34 = vld [vmem:[%s12811_s10 + $0xec] ss:$8 sps:$4 sm:$0xff]   ;;  %v9316_v0 = vld [vmem:[%s12811_s10 + $0xe8] ss:$8 sps:$4 sm:$0xff]  }
 0x6cd   :  { %v11750_v18 = vmax.f32 %v4083_v63, %v4085_v32  ;;  %v4086_v15 = vmax.f32 %v4072_v1, 0.0  ;;  %v4073_v41 = vadd.f32 %v11727_v33, %v4047_v54  ;;  %v4048_v46 = vadd.f32 %v4025_v11, %v3771_v7  ;;  %4523 = vmatprep.subr.bf16.mxu0 %v9294_v51  ;;  %v9300_v63 = vld [vmem:[%s12811_s10 + $0x11c] ss:$8 sps:$4 sm:$0xff]   ;;  %v7947_v38 = vld [vmem:[%s12811_s10 + $0x1a8] sm:$0xff] }
 0x6ce   :  { %v4027_v23 = vpop.f32.mrf.mxu0  ;;  %v9324_v7 = vld [vmem:[%s12811_s10 + $0xdc] ss:$8 sps:$4 sm:$0xff]   ;;  %v7975_v1 = vcombine.high %v7947_v38, %v7947_v38  ;;  %v7974_v54 = vcombine.low %v7947_v38, %v7947_v38  ;;  %v9307_v38 = vld [vmem:[%s12811_s10 + $0x20] ss:$8 sps:$4 sm:$0xff]  }
 0x6cf   :  { %v11754_v61 = vmax.f32 %v4084_v25, %v4086_v15  ;;  %v4087_v8 = vmax.f32 %v4073_v41, 0.0  ;;  %v4074_v56 = vadd.f32 %v11724_v20, %v4048_v46  ;;  %v4049_v48 = vadd.f32 %v4027_v23, %v3773_v4  ;;  %v9310_v25 = vld [vmem:[%s12811_s10 + $0xf8] ss:$8 sps:$4 sm:$0xff]  }
 0x6d0   :  { %v4031_v28 = vpop.f32.mrf.mxu0  ;;  %v8815_v36 = vpack.i.bf16 %v11750_v18, %v11746_v27  ;;  %4524 = vmatpush1.bf16.msra.mxu0 %v9292_v40  ;;  %v4514_v4 = vsel %vm157_vm0, %v7974_v54, 0  ;;  %v9279_v40 = vld [vmem:[%s12811_s10 + $0x74] ss:$8 sps:$4 sm:$0xff]   ;;  %v9313_v54 = vld [vmem:[%s12811_s10 + $0x10] ss:$8 sps:$4 sm:$0xff]  }
 0x6d1   :  { %v11759_v17 = vmax.f32 %v4085_v32, %v4087_v8  ;;  %v4088_v26 = vmax.f32 %v4074_v56, 0.0  ;;  %v4075_v62 = vadd.f32 %v11727_v33, %v4049_v48  ;;  %v4050_v58 = vadd.f32 %v4031_v28, %v3777_v21  ;;  %4525 = vmatprep.subr.bf16.mxu0 %v9300_v63  ;;  %v9322_v32 = vld [vmem:[%s12811_s10 + $0xd8] ss:$8 sps:$4 sm:$0xff]   ;;  %v9291_v63 = vld [vmem:[%s12811_s10 + $0x54] ss:$8 sps:$4 sm:$0xff]  }
 0x6d2   :  { %v4033_v31 = vpop.f32.mrf.mxu0 }
 0x6d3   :  { %v11762_v22 = vmax.f32 %v4086_v15, %v4088_v26  ;;  %v4089_v9 = vmax.f32 %v4075_v62, 0.0  ;;  %v4076_v53 = vadd.f32 %v11724_v20, %v4050_v58  ;;  %v4051_v19 = vadd.f32 %v4033_v31, %v3779_v59 }
 0x6d4   :  { %v4035_v39 = vpop.f32.mrf.mxu0  ;;  %4526 = vmatpush1.bf16.msra.mxu0 %v9298_v2  ;;  %v9274_v2 = vld [vmem:[%s12812_s9 + $0x8] sm:$0xff]  }
 0x6d5   :  { %v11765_v24 = vmax.f32 %v4087_v8, %v4089_v9  ;;  %v4090_v12 = vmax.f32 %v4076_v53, 0.0  ;;  %v4077_v10 = vadd.f32 %v11727_v33, %v4051_v19  ;;  %v8825_v33 = vpack.i.bf16 %v11759_v17, %v11754_v61  ;;  %4527 = vmatprep.subr.bf16.mxu0 %v9306_v49  ;;  %v9289_v49 = vld [vmem:[%s12811_s10 + $0x50] ss:$8 sps:$4 sm:$0xff]  }
 0x6d6   :  { %v4036_v43 = vpop.f32.mrf.mxu0 }
 0x6d7   :  { %v11768_v50 = vmax.f32 %v4088_v26, %v4090_v12  ;;  %v4091_v16 = vmax.f32 %v4077_v10, 0.0  ;;  %v8810_v52 = vpack.i.bf16 %v11765_v24, %v11762_v22 }
 0x6d8   :  { %4528 = vmatpush1.bf16.msra.mxu0 %v9304_v47  ;;  %v9297_v47 = vld [vmem:[%s12811_s10 + $0x44] ss:$8 sps:$4 sm:$0xff]  }
 0x6d9   :  { %v11772_v57 = vmax.f32 %v4089_v9, %v4091_v16  ;;  %8811 = vrot.lane.b32.xlu0 %v8810_v52, %s9568_s17  ;;  %4529 = vmatprep.subr.bf16.mxu0 %v9312_v3  ;;  %v9295_v3 = vld [vmem:[%s12811_s10 + $0x40] ss:$8 sps:$4 sm:$0xff]  }
 0x6db   :  { %v8820_v20 = vpack.i.bf16 %v11772_v57, %v11768_v50 }
 0x6dc   :  { %4530 = vmatpush1.bf16.msra.mxu0 %v9310_v25  ;;  %v9303_v25 = vld [vmem:[%s12811_s10 + $0x34] ss:$8 sps:$4 sm:$0xff]  }
 0x6dd   :  { %8821 = vrot.lane.b32.xlu1 %v8820_v20, %s9568_s17  ;;  %8816 = vrot.lane.b32.xlu0 %v8815_v36, %s9568_s17 }
 0x6de   :  { %4531 = vmatprep.subr.bf16.mxu0 %v9318_v34  ;;  %v9275_v34 = vld [vmem:[%s12812_s9 + $0x10] sm:$0xff]  }
 0x6e0   :  { %4532 = vmatpush1.bf16.msra.mxu0 %v9316_v0  ;;  %v9301_v0 = vld [vmem:[%s12811_s10 + $0x30] ss:$8 sps:$4 sm:$0xff]  }
 0x6e1   :  { %8826 = vrot.lane.b32.xlu1 %v8825_v33, %s9568_s17  ;;  %8831 = vrot.lane.b32.xlu0 %v8830_v6, %s9568_s17 }
 0x6e2   :  { %4533 = vmatprep.subr.bf16.mxu0 %v9324_v7  ;;  %v9309_v7 = vld [vmem:[%s12811_s10 + $0x24] ss:$8 sps:$4 sm:$0xff]  }
 0x6e4   :  { %4534 = vmatpush1.bf16.msra.mxu0 %v9322_v32  ;;  %v9315_v32 = vld [vmem:[%s12811_s10 + $0x14] ss:$8 sps:$4 sm:$0xff]  }
 0x6e5   :  { %8836 = vrot.lane.b32.xlu1 %v8835_v44, %s9568_s17  ;;  %7976 = vmatprep.subr.msk.bf16.mxu0 %vm157_vm0, %v7975_v1  ;;  %v9276_v1 = vld [vmem:[%s12812_s9 + $0x18] ss:$0 sps:$4 sm:$0xff]  }
 0x6e8   :  { %4540 = vmatpush2.bf16.msra.mxu0 %v4514_v4  ;;  %v9321_v4 = vld [vmem:[%s12811_s10 + $0x4] ss:$8 sps:$4 sm:$0xff]  }
 0x74b   :  { %v8812_v11 = vpop.permute.xlu0 %8811 }
 0x74c   :  { %v8814_v15 = vunpack.i.h.bf16 %v8812_v11  ;;  %v8813_v41 = vunpack.i.l.bf16 %v8812_v11  ;;  %v4320_v11 = vld [vmem:[%s12811_s10 + $0xd0] sm:$0xff] }
 0x74e   :  { %v4145_v46 = vsel %vm4140_vm8, %v8813_v41, %v8814_v15  ;;  %v4168_v62 = vmax.f32 %v11765_v24, %v8814_v15  ;;  %v9319_v15 = vld [vmem:[%s12811_s10] ss:$8 sps:$4 sm:$0xff]   ;;  %v8007_v41 = vcombine.high %v4320_v11, %v4320_v11 }
 0x74f   :  { %v8822_v21 = vpop.permute.xlu1 %8821  ;;  %v8817_v23 = vpop.permute.xlu0 %8816  ;;  %v4167_v58 = vmax.f32 %v11762_v22, %v4145_v46  ;;  %v8006_v46 = vcombine.low %v4320_v11, %v4320_v11 }
 0x750   :  { %v8824_v8 = vunpack.i.h.bf16 %v8822_v21  ;;  %v8823_v56 = vunpack.i.l.bf16 %v8822_v21  ;;  %v8819_v48 = vunpack.i.h.bf16 %v8817_v23  ;;  %v8818_v59 = vunpack.i.l.bf16 %v8817_v23  ;;  %v9331_v23 = vld [vmem:[%s12811_s10 + $0xc4] ss:$8 sps:$4 sm:$0xff]  }
 0x751   :  { %v4725_v21 = vsel %vm157_vm0, %v8006_v46, 0 }
 0x752   :  { %v4170_v28 = vmax.f32 %v11772_v57, %v8824_v8  ;;  %v4146_v26 = vsel %vm4140_vm8, %v8823_v56, %v8824_v8  ;;  %v4143_v9 = vsel %vm4140_vm8, %v8818_v59, %v8819_v48  ;;  %v4164_v57 = vmax.f32 %v11750_v18, %v8819_v48  ;;  %v9329_v8 = vld [vmem:[%s12811_s10 + $0xc0] ss:$8 sps:$4 sm:$0xff]   ;;  %v9337_v56 = vld [vmem:[%s12811_s10 + $0xb4] ss:$8 sps:$4 sm:$0xff]   ;;  %v9335_v48 = vld [vmem:[%s12811_s10 + $0xb0] ss:$8 sps:$4 sm:$0xff]  }
 0x753   :  { %v4169_v31 = vmax.f32 %v11768_v50, %v4146_v26  ;;  %v8827_v53 = vpop.permute.xlu1 %8826  ;;  %v8832_v19 = vpop.permute.xlu0 %8831  ;;  %v4163_v22 = vmax.f32 %v11746_v27, %v4143_v9  ;;  %v9343_v59 = vld [vmem:[%s12811_s10 + $0xa4] ss:$8 sps:$4 sm:$0xff]  }
 0x754   :  { %v8829_v39 = vunpack.i.h.bf16 %v8827_v53  ;;  %v8828_v12 = vunpack.i.l.bf16 %v8827_v53  ;;  %v8834_v10 = vunpack.i.h.bf16 %v8832_v19  ;;  %v8833_v43 = vunpack.i.l.bf16 %v8832_v19  ;;  %v9334_v26 = vld [vmem:[%s12811_s10 + $0x19c] ss:$8 sps:$4 sm:$0xff]   ;;  %v9340_v9 = vld [vmem:[%s12811_s10 + $0x18c] ss:$8 sps:$4 sm:$0xff]   ;;  %v9338_v53 = vld [vmem:[%s12811_s10 + $0x188] ss:$8 sps:$4 sm:$0xff]  }
 0x755   :  { %v4183_v16 = vpack.c.bf16 %v4170_v28, %v4168_v62  ;;  %v4182_v52 = vpack.c.bf16 %v4169_v31, %v4167_v58  ;;  %v9341_v28 = vld [vmem:[%s12811_s10 + $0xa0] ss:$8 sps:$4 sm:$0xff]   ;;  %4541 = vmatprep.subr.bf16.mxu0 %v9334_v26  ;;  %v9349_v58 = vld [vmem:[%s12811_s10 + $0x94] ss:$8 sps:$4 sm:$0xff]   ;;  %v9347_v31 = vld [vmem:[%s12811_s10 + $0x90] ss:$8 sps:$4 sm:$0xff]  }
 0x756   :  { %v4166_v20 = vmax.f32 %v11759_v17, %v8829_v39  ;;  %v4144_v24 = vsel %vm4140_vm8, %v8828_v12, %v8829_v39  ;;  %v4141_v33 = vsel %vm4140_vm8, %v8833_v43, %v8834_v10  ;;  %v4160_v5 = vmax.f32 %v11736_v35, %v8834_v10  ;;  %v9273_v35 = vld [vmem:[%s12812_s9] sm:$0xff]   ;;  %v9352_v43 = vld [vmem:[%s12811_s10 + $0x16c] ss:$8 sps:$4 sm:$0xff]  }
 0x757   :  { %v4165_v50 = vmax.f32 %v11754_v61, %v4144_v24  ;;  %4225 = vmatprep.subr.bf16.mxu1 %v4183_v16  ;;  %v8837_v36 = vpop.permute.xlu1 %8836  ;;  %v4159_v27 = vmax.f32 %v11733_v45, %v4141_v33  ;;  %v9277_v45 = vld [vmem:[%s12811_s10 + $0x70] ss:$8 sps:$4 sm:$0xff]   ;;  %v9355_v19 = vld [vmem:[%s12811_s10 + $0x84] ss:$8 sps:$4 sm:$0xff]   ;;  %v9353_v39 = vld [vmem:[%s12811_s10 + $0x80] ss:$8 sps:$4 sm:$0xff]  }
 0x758   :  { %4226 = vmatpush1.bf16.msra.mxu1 %v4182_v52  ;;  %v8839_v6 = vunpack.i.h.bf16 %v8837_v36  ;;  %v8838_v44 = vunpack.i.l.bf16 %v8837_v36  ;;  %v4181_v55 = vpack.c.bf16 %v4166_v20, %v4164_v57  ;;  %v9332_v62 = vld [vmem:[%s12811_s10 + $0x198] ss:$8 sps:$4 sm:$0xff]   ;;  %v9346_v12 = vld [vmem:[%s12811_s10 + $0x17c] ss:$8 sps:$4 sm:$0xff]   ;;  %v9350_v16 = vld [vmem:[%s12811_s10 + $0x168] ss:$8 sps:$4 sm:$0xff]  }
 0x759   :  { %v4180_v14 = vpack.c.bf16 %v4165_v50, %v4163_v22  ;;  %4542 = vmatpush2.bf16.msra.mxu0 %v9332_v62  ;;  %v9344_v10 = vld [vmem:[%s12811_s10 + $0x178] ss:$8 sps:$4 sm:$0xff]   ;;  %v9358_v52 = vld [vmem:[%s12811_s10 + $0x15c] ss:$8 sps:$4 sm:$0xff]  }
 0x75a   :  { %v4162_v18 = vmax.f32 %v11742_v60, %v8839_v6  ;;  %v4142_v17 = vsel %vm4140_vm8, %v8838_v44, %v8839_v6  ;;  %4227 = vmatprep.subr.bf16.mxu1 %v4181_v55  ;;  %v9283_v60 = vld [vmem:[%s12811_s10 + $0x60] ss:$8 sps:$4 sm:$0xff]   ;;  %4543 = vmatprep.subr.bf16.mxu0 %v9340_v9  ;;  %v9361_v20 = vld [vmem:[%s12811_s10 + $0x224] ss:$8 sps:$4 sm:$0xff]   ;;  %v9380_v62 = vld [vmem:[%s12811_s10 + $0x1b0] ss:$8 sps:$4 sm:$0xff]  }
 0x75b   :  { %v4161_v61 = vmax.f32 %v11739_v30, %v4142_v17  ;;  %v9285_v30 = vld [vmem:[%s12811_s10 + $0x64] ss:$8 sps:$4 sm:$0xff]   ;;  %v9356_v57 = vld [vmem:[%s12811_s10 + $0x158] ss:$8 sps:$4 sm:$0xff]  }
 0x75c   :  { %4228 = vmatpush1.bf16.msra.mxu1 %v4180_v14  ;;  %v4179_v37 = vpack.c.bf16 %v4162_v18, %v4160_v5  ;;  %v8038_v26 = vld [vmem:[%s12811_s10 + $0x280] sm:$0xff] }
 0x75d   :  { %v4178_v51 = vpack.c.bf16 %v4161_v61, %v4159_v27  ;;  %4544 = vmatpush2.bf16.msra.mxu0 %v9338_v53  ;;  %v9387_v53 = vld [vmem:[%s12811_s10 + $0x274] ss:$8 sps:$4 sm:$0xff]  }
 0x75e   :  { %4229 = vmatprep.subr.bf16.mxu1 %v4179_v37  ;;  %4545 = vmatprep.subr.bf16.mxu0 %v9346_v12  ;;  %v9388_v12 = vld [vmem:[%s12811_s10 + $0x260] ss:$8 sps:$4 sm:$0xff]  }
 0x760   :  { %4230 = vmatpush1.bf16.msra.mxu1 %v4178_v51 }
 0x761   :  { %4730 = vmatprep.subr.bf16.mxu1 %v9279_v40  ;;  %4546 = vmatpush2.bf16.msra.mxu0 %v9344_v10  ;;  %v9393_v10 = vld [vmem:[%s12811_s10 + $0x254] ss:$8 sps:$4 sm:$0xff]  }
 0x762   :  { %4547 = vmatprep.subr.bf16.mxu0 %v9352_v43  ;;  %v9391_v43 = vld [vmem:[%s12811_s10 + $0x250] ss:$8 sps:$4 sm:$0xff]  }
 0x763   :  { %7917 = vmatmul.mubr.msk.bf16.vlgmr.msra.gmra.mxu1 %vm4202_vm9, %v9273_v35 }
 0x764   :  { %4257 = vmatprep.mubr.bf16.mxu1 %v12808_v29  ;;  %4731 = vmatpush1.bf16.msra.mxu1 %v9277_v45  ;;  %v9359_v45 = vld [vmem:[%s12811_s10 + $0x220] ss:$8 sps:$4 sm:$0xff]  }
 0x765   :  { %4732 = vmatprep.subr.bf16.mxu1 %v9285_v30  ;;  %4548 = vmatpush2.bf16.msra.mxu0 %v9350_v16  ;;  %v9396_v16 = vld [vmem:[%s12811_s10 + $0x244] ss:$8 sps:$4 sm:$0xff]  }
 0x766   :  { %4549 = vmatprep.subr.bf16.mxu0 %v9358_v52  ;;  %v9394_v52 = vld [vmem:[%s12811_s10 + $0x240] ss:$8 sps:$4 sm:$0xff]  }
 0x768   :  { %4733 = vmatpush1.bf16.msra.mxu1 %v9283_v60  ;;  %v9364_v60 = vld [vmem:[%s12811_s10 + $0x214] ss:$8 sps:$4 sm:$0xff]  }
 0x769   :  { %4734 = vmatprep.subr.bf16.mxu1 %v9291_v63  ;;  %4550 = vmatpush2.bf16.msra.mxu0 %v9356_v57  ;;  %v9399_v57 = vld [vmem:[%s12811_s10 + $0x234] ss:$8 sps:$4 sm:$0xff]  }
 0x76a   :  { %4963 = vmatprep.subr.bf16.mxu0 %v9361_v20  ;;  %v9397_v20 = vld [vmem:[%s12811_s10 + $0x230] ss:$8 sps:$4 sm:$0xff]  }
 0x76b   :  { %7918 = vmatmul.mubr.msk.bf16.gmra.mxu1 %vm4202_vm9, %v9274_v2 }
 0x76c   :  { %4267 = vmatprep.mubr.bf16.mxu1 %v12808_v29  ;;  %4735 = vmatpush1.bf16.msra.mxu1 %v9289_v49 }
 0x76d   :  { %4736 = vmatprep.subr.bf16.mxu1 %v9297_v47 }
 0x770   :  { %4737 = vmatpush1.bf16.msra.mxu1 %v9295_v3  ;;  %v9362_v3 = vld [vmem:[%s12811_s10 + $0x210] ss:$8 sps:$4 sm:$0xff]  }
 0x771   :  { %4738 = vmatprep.subr.bf16.mxu1 %v9303_v25 }
 0x773   :  { %7919 = vmatmul.mubr.msk.bf16.gmra.mxu1 %vm4202_vm9, %v9275_v34  ;;  %v9367_v34 = vld [vmem:[%s12811_s10 + $0x204] ss:$8 sps:$4 sm:$0xff]  }
 0x774   :  { %4277 = vmatprep.mubr.bf16.mxu1 %v12808_v29  ;;  %4739 = vmatpush1.bf16.msra.mxu1 %v9301_v0 }
 0x775   :  { %4740 = vmatprep.subr.bf16.mxu1 %v9309_v7 }
 0x778   :  { %4741 = vmatpush1.bf16.msra.mxu1 %v9307_v38 }
 0x779   :  { %4742 = vmatprep.subr.bf16.mxu1 %v9315_v32  ;;  %v9365_v32 = vld [vmem:[%s12811_s10 + $0x200] ss:$8 sps:$4 sm:$0xff]  }
 0x77b   :  { %7920 = vmatmul.mubr.msk.bf16.gmra.mxu1 %vm4202_vm9, %v9276_v1 }
 0x77c   :  { %4743 = vmatpush1.bf16.msra.mxu1 %v9313_v54 }
 0x77d   :  { %4744 = vmatprep.subr.bf16.mxu1 %v9321_v4  ;;  %v9370_v4 = vld [vmem:[%s12811_s10 + $0x1f4] ss:$8 sps:$4 sm:$0xff]  }
 0x780   :  { %4745 = vmatpush1.bf16.msra.mxu1 %v9319_v15 }
 0x781   :  { %8008 = vmatprep.subr.msk.bf16.mxu1 %vm157_vm0, %v8007_v41  ;;  %v9368_v41 = vld [vmem:[%s12811_s10 + $0x1f0] ss:$8 sps:$4 sm:$0xff]  }
 0x784   :  { %4751 = vmatpush2.bf16.msra.mxu1 %v4725_v21  ;;  %v9373_v21 = vld [vmem:[%s12811_s10 + $0x1e4] ss:$8 sps:$4 sm:$0xff]  }
 0x785   :  { %4752 = vmatprep.subr.bf16.mxu1 %v9331_v23  ;;  %v9371_v23 = vld [vmem:[%s12811_s10 + $0x1e0] ss:$8 sps:$4 sm:$0xff]  }
 0x788   :  { %4753 = vmatpush2.bf16.msra.mxu1 %v9329_v8  ;;  %v9376_v8 = vld [vmem:[%s12811_s10 + $0x1d4] ss:$8 sps:$4 sm:$0xff]  }
 0x789   :  { %4754 = vmatprep.subr.bf16.mxu1 %v9337_v56  ;;  %v9374_v56 = vld [vmem:[%s12811_s10 + $0x1d0] ss:$8 sps:$4 sm:$0xff]  }
 0x78c   :  { %4755 = vmatpush2.bf16.msra.mxu1 %v9335_v48  ;;  %v9379_v48 = vld [vmem:[%s12811_s10 + $0x1c4] ss:$8 sps:$4 sm:$0xff]  }
 0x78d   :  { %4756 = vmatprep.subr.bf16.mxu1 %v9343_v59  ;;  %v9377_v59 = vld [vmem:[%s12811_s10 + $0x1c0] ss:$8 sps:$4 sm:$0xff]  }
 0x790   :  { %4757 = vmatpush2.bf16.msra.mxu1 %v9341_v28  ;;  %v9382_v28 = vld [vmem:[%s12811_s10 + $0x1b4] ss:$8 sps:$4 sm:$0xff]  }
 0x791   :  { %4758 = vmatprep.subr.bf16.mxu1 %v9349_v58  ;;  %v8066_v58 = vcombine.high %v8038_v26, %v8038_v26 }
 0x794   :  { %4759 = vmatpush2.bf16.msra.mxu1 %v9347_v31  ;;  %v8065_v31 = vcombine.low %v8038_v26, %v8038_v26 }
 0x795   :  { %4760 = vmatprep.subr.bf16.mxu1 %v9355_v19  ;;  %v9385_v19 = vld [vmem:[%s12811_s10 + $0x270] ss:$8 sps:$4 sm:$0xff]  }
 0x796   :  { %v4958_v9 = vsel %vm157_vm0, %v8065_v31, 0 }
 0x798   :  { %4761 = vmatpush2.bf16.msra.mxu1 %v9353_v39  ;;  %v9390_v39 = vld [vmem:[%s12811_s10 + $0x264] ss:$8 sps:$4 sm:$0xff]  }
 0x823   :  { %v4249_v24 = vpop.f32.mrf.mxu1 }
 0x825   :  { %v4251_v22 = vpop.f32.mrf.mxu1 }
 0x827   :  { %v4253_v50 = vpop.f32.mrf.mxu1 }
 0x828   :  { %v4286_v6 = vpack.c.bf16 %v4253_v50, %v4249_v24 }
 0x829   :  { %v4255_v36 = vpop.f32.mrf.mxu1 }
 0x82a   :  { %v4287_v33 = vpack.c.bf16 %v4255_v36, %v4251_v22  ;;  %v4355_v40 = vrot.slane %v4286_v6, 4 }
 0x82b   :  { %v4259_v44 = vpop.f32.mrf.mxu1 }
 0x82c   :  { %8009 = vmatprep.mubr.msk.bf16.mxu1 %vm4503_vm10, %v4287_v33  ;;  %v4358_v37 = vrot.slane %v4287_v33, 4 }
 0x82d   :  { %v4261_v55 = vpop.f32.mrf.mxu1  ;;  %4763 = vmatmul.mubr.bf16.vlgmr.msra.gmra.mxu1 %v4286_v6 }
 0x82f   :  { %v4263_v14 = vpop.f32.mrf.mxu1 }
 0x830   :  { %v11997_v5 = vpack.c.bf16 %v4263_v14, %v4259_v44 }
 0x831   :  { %v4265_v18 = vpop.f32.mrf.mxu1 }
 0x832   :  { %v4289_v17 = vpack.c.bf16 %v4265_v18, %v4261_v55  ;;  %v4356_v27 = vrot.slane %v11997_v5, 4 }
 0x833   :  { %v4269_v61 = vpop.f32.mrf.mxu1 }
 0x834   :  { %v4359_v51 = vrot.slane %v4289_v17, 4  ;;  %8010 = vmatprep.mubr.msk.bf16.mxu1 %vm4503_vm10, %v4289_v17  ;;  %v4357_v2 = vsel %vm157_vm0, %v4355_v40, %v4356_v27 }
 0x835   :  { %v4271_v35 = vpop.f32.mrf.mxu1  ;;  %4773 = vmatmul.mubr.bf16.gmra.mxu1 %v11997_v5 }
 0x836   :  { %v4360_v30 = vsel %vm157_vm0, %v4358_v37, %v4359_v51 }
 0x837   :  { %v4273_v63 = vpop.f32.mrf.mxu1  ;;  %7977 = vmatprep.mubr.msk.bf16.mxu0 %vm4503_vm10, %v4360_v30 }
 0x838   :  { %v12011_v49 = vpack.c.bf16 %v4273_v63, %v4269_v61  ;;  %4552 = vmatmul.mubr.bf16.vlgmr.msra.gmra.mxu0 %v4357_v2 }
 0x839   :  { %4964 = vmatpush1.bf16.msra.mxu0 %v9359_v45  ;;  %v4275_v47 = vpop.f32.mrf.mxu1 }
 0x83a   :  { %v12016_v25 = vpack.c.bf16 %v4275_v47, %v4271_v35  ;;  %4965 = vmatprep.subr.bf16.mxu0 %v9364_v60  ;;  %v4361_v0 = vrot.slane %v12011_v49, 4 }
 0x83b   :  { %v12022_v7 = vpop.f32.mrf.mxu1 }
 0x83c   :  { %v4363_v38 = vrot.slane %v12016_v25, 4  ;;  %8011 = vmatprep.mubr.msk.bf16.mxu1 %vm4503_vm10, %v12016_v25  ;;  %v4362_v11 = vsel %vm157_vm0, %v4356_v27, %v4361_v0  ;;  %v4292_v22 = vpack.c.bf16 %v12022_v7, %v12022_v7 }
 0x83d   :  { %4966 = vmatpush1.bf16.msra.mxu0 %v9362_v3  ;;  %4783 = vmatmul.mubr.bf16.gmra.mxu1 %v12011_v49  ;;  %v12031_v1 = vpop.f32.mrf.mxu1 }
 0x83e   :  { %v4364_v54 = vsel %vm157_vm0, %v4359_v51, %v4363_v38  ;;  %4967 = vmatprep.subr.bf16.mxu0 %v9367_v34  ;;  %5185 = vmatprep.mubr.bf16.mxu1 %v12808_v29  ;;  %v4293_v24 = vpack.c.bf16 %v12031_v1, %v12031_v1 }
 0x83f   :  { %7978 = vmatprep.mubr.msk.bf16.mxu0 %vm4503_vm10, %v4364_v54  ;;  %v4283_v15 = vpop.f32.mrf.mxu1 }
 0x840   :  { %4562 = vmatmul.mubr.bf16.gmra.mxu0 %v4362_v11 }
 0x841   :  { %4968 = vmatpush1.bf16.msra.mxu0 %v9365_v32  ;;  %7979 = vmatprep.mubr.msk.bf16.mxu0 %vm4503_vm10, %v4363_v38  ;;  %v4284_v46 = vpop.f32.mrf.mxu1  ;;  %v5034_v38 = vld [vmem:[%s12693_s12] sm:$0x3]  ;;  %s9569_s12 = smov 80  }
 0x842   :  { %4969 = vmatprep.subr.bf16.mxu0 %v9370_v4  ;;  %v5039_v54 = vrot.slane %v5034_v38, %v12810_v42  ;;  %v5043_v11 = vrot.slane %v5034_v38, %v10164_v13 }
 0x845   :  { %4970 = vmatpush1.bf16.msra.mxu0 %v9368_v41 }
 0x846   :  { %4971 = vmatprep.subr.bf16.mxu0 %v9373_v21 }
 0x848   :  { %4572 = vmatmul.mubr.bf16.gmra.mxu0 %v4361_v0 }
 0x849   :  { %4972 = vmatpush1.bf16.msra.mxu0 %v9371_v23  ;;  %8068 = vmatprep.mubr.msk.bf16.mxu0 %vm4503_vm10, %v4289_v17 }
 0x84a   :  { %4973 = vmatprep.subr.bf16.mxu0 %v9376_v8 }
 0x84d   :  { %4974 = vmatpush1.bf16.msra.mxu0 %v9374_v56 }
 0x84e   :  { %4975 = vmatprep.subr.bf16.mxu0 %v9379_v48 }
 0x851   :  { %4976 = vmatpush1.bf16.msra.mxu0 %v9377_v59 }
 0x852   :  { %4977 = vmatprep.subr.bf16.mxu0 %v9382_v28 }
 0x855   :  { %4978 = vmatpush1.bf16.msra.mxu0 %v9380_v62 }
 0x856   :  { %8067 = vmatprep.subr.msk.bf16.mxu0 %vm157_vm0, %v8066_v58 }
 0x859   :  { %4984 = vmatpush2.bf16.msra.mxu0 %v4958_v9 }
 0x85a   :  { %4985 = vmatprep.subr.bf16.mxu0 %v9387_v53 }
 0x85d   :  { %4986 = vmatpush2.bf16.msra.mxu0 %v9385_v19 }
 0x85e   :  { %4987 = vmatprep.subr.bf16.mxu0 %v9390_v39 }
 0x861   :  { %4988 = vmatpush2.bf16.msra.mxu0 %v9388_v12 }
 0x862   :  { %4989 = vmatprep.subr.bf16.mxu0 %v9393_v10 }
 0x865   :  { %4990 = vmatpush2.bf16.msra.mxu0 %v9391_v43 }
 0x866   :  { %4991 = vmatprep.subr.bf16.mxu0 %v9396_v16 }
 0x869   :  { %4992 = vmatpush2.bf16.msra.mxu0 %v9394_v52 }
 0x86a   :  { %4993 = vmatprep.subr.bf16.mxu0 %v9399_v57 }
 0x86d   :  { %4994 = vmatpush2.bf16.msra.mxu0 %v9397_v20 }
 0x870   :  { %4996 = vmatmul.mubr.bf16.vlgmr.msra.gmra.mxu0 %v11997_v5 }
 0x871   :  { %8069 = vmatprep.mubr.msk.bf16.mxu0 %vm4503_vm10, %v12016_v25 }
 0x878   :  { %5006 = vmatmul.mubr.bf16.gmra.mxu0 %v12011_v49 }
 0x879   :  { %8070 = vmatprep.mubr.msk.bf16.mxu0 %vm4503_vm10, %v4293_v24 }
 0x880   :  { %5016 = vmatmul.mubr.bf16.gmra.mxu0 %v4292_v22 }
 0x8ed   :  { %v4764_v50 = vpop.f32.mrf.mxu1 }
 0x8ef   :  { %v4766_v36 = vpop.f32.mrf.mxu1 }
 0x8f1   :  { %v4768_v33 = vpop.f32.mrf.mxu1 }
 0x8f3   :  { %v4770_v6 = vpop.f32.mrf.mxu1 }
 0x8f5   :  { %v4774_v44 = vpop.f32.mrf.mxu1 }
 0x8f7   :  { %v4776_v55 = vpop.f32.mrf.mxu1 }
 0x8f8   :  { %v4553_v14 = vpop.f32.mrf.mxu0 }
 0x8f9   :  { %v4765_v5 = vadd.f32 %v4764_v50, %v4553_v14  ;;  %v4778_v18 = vpop.f32.mrf.mxu1 }
 0x8fa   :  { %v4555_v17 = vpop.f32.mrf.mxu0 }
 0x8fb   :  { %v4767_v27 = vadd.f32 %v4766_v36, %v4555_v17  ;;  %v4780_v61 = vpop.f32.mrf.mxu1 }
 0x8fc   :  { %v4557_v37 = vpop.f32.mrf.mxu0 }
 0x8fd   :  { %v4769_v51 = vadd.f32 %v4768_v33, %v4557_v37  ;;  %v4784_v40 = vpop.f32.mrf.mxu1 }
 0x8fe   :  { %v4559_v35 = vpop.f32.mrf.mxu0 }
 0x8ff   :  { %v4771_v45 = vadd.f32 %v4770_v6, %v4559_v35  ;;  %v4786_v30 = vpop.f32.mrf.mxu1 }
 0x900   :  { %v4563_v60 = vpop.f32.mrf.mxu0 }
 0x901   :  { %v4788_v63 = vpop.f32.mrf.mxu1  ;;  %v4775_v56 = vadd.f32 %v4774_v44, %v4563_v60 }
 0x902   :  { %v4565_v2 = vpop.f32.mrf.mxu0 }
 0x903   :  { %v4789_v49 = vpop.f32.mrf.mxu1  ;;  %v4777_v28 = vadd.f32 %v4776_v55, %v4565_v2 }
 0x904   :  { %v4567_v47 = vpop.f32.mrf.mxu0 }
 0x905   :  { %v4779_v53 = vadd.f32 %v4778_v18, %v4567_v47 }
 0x906   :  { %v4569_v3 = vpop.f32.mrf.mxu0 }
 0x907   :  { %v4781_v52 = vadd.f32 %v4780_v61, %v4569_v3 }
 0x908   :  { %v4573_v25 = vpop.f32.mrf.mxu0 }
 0x909   :  { %v4785_v36 = vadd.f32 %v4784_v40, %v4573_v25 }
 0x90a   :  { %v4575_v34 = vpop.f32.mrf.mxu0 }
 0x90c   :  { %v4577_v0 = vpop.f32.mrf.mxu0 }
 0x90e   :  { %v4578_v7 = vpop.f32.mrf.mxu0 }
 0x930   :  { %v4997_v32 = vpop.f32.mrf.mxu0 }
 0x931   :  { %v5024_v1 = vadd.f32 %v4997_v32, %v4765_v5  ;;  %v4787_v5 = vadd.f32 %v4786_v30, %v4575_v34 }
 0x932   :  { %v4999_v4 = vpop.f32.mrf.mxu0 }
 0x933   :  { %v5025_v15 = vadd.f32 %v4999_v4, %v4767_v27  ;;  %v5046_v46 = vadd.f32 %v5039_v54, %v5024_v1  ;;  %v9409_v1 = vld [vmem:[%s12695_s5 + $0x70] ss:$8 sps:$4 sm:$0xff]   ;;  %v9415_v4 = vld [vmem:[%s12695_s5 + $0x60] ss:$8 sps:$4 sm:$0xff]  }
 0x934   :  { %v5001_v41 = vpop.f32.mrf.mxu0 }
 0x935   :  { %v5026_v21 = vadd.f32 %v5001_v41, %v4769_v51  ;;  %v5047_v23 = vadd.f32 %v5043_v11, %v5025_v15  ;;  %v5056_v62 = vmax.f32 %v5046_v46, 0.0  ;;  %v9423_v15 = vld [vmem:[%s12695_s5 + $0x54] ss:$8 sps:$4 sm:$0xff]   ;;  %v9421_v41 = vld [vmem:[%s12695_s5 + $0x50] ss:$8 sps:$4 sm:$0xff]  }
 0x936   :  { %v5003_v8 = vpop.f32.mrf.mxu0  ;;  %v9429_v46 = vld [vmem:[%s12695_s5 + $0x44] ss:$8 sps:$4 sm:$0xff]  }
 0x937   :  { %v5048_v48 = vadd.f32 %v5039_v54, %v5026_v21  ;;  %v5027_v59 = vadd.f32 %v5003_v8, %v4771_v45  ;;  %v5057_v19 = vmax.f32 %v5047_v23, 0.0  ;;  %v9427_v21 = vld [vmem:[%s12695_s5 + $0x40] ss:$8 sps:$4 sm:$0xff]   ;;  %v9435_v23 = vld [vmem:[%s12695_s5 + $0x34] ss:$8 sps:$4 sm:$0xff]  }
 0x938   :  { %v5007_v26 = vpop.f32.mrf.mxu0  ;;  %v9433_v8 = vld [vmem:[%s12695_s5 + $0x30] ss:$8 sps:$4 sm:$0xff]  }
 0x939   :  { %v5058_v58 = vmax.f32 %v5048_v48, 0.0  ;;  %v5049_v31 = vadd.f32 %v5043_v11, %v5027_v59  ;;  %v5028_v9 = vadd.f32 %v5007_v26, %v4775_v56  ;;  %v9441_v56 = vld [vmem:[%s12695_s5 + $0x24] ss:$8 sps:$4 sm:$0xff]   ;;  %v9439_v48 = vld [vmem:[%s12695_s5 + $0x20] ss:$8 sps:$4 sm:$0xff]  }
 0x93a   :  { %v5009_v39 = vpop.f32.mrf.mxu0 }
 0x93b   :  { %v12118_v12 = vmax.f32 %v5056_v62, %v5058_v58  ;;  %v5059_v10 = vmax.f32 %v5049_v31, 0.0  ;;  %v5050_v43 = vadd.f32 %v5039_v54, %v5028_v9  ;;  %v5029_v16 = vadd.f32 %v5009_v39, %v4777_v28 }
 0x93c   :  { %v5011_v57 = vpop.f32.mrf.mxu0 }
 0x93d   :  { %v12120_v20 = vmax.f32 %v5057_v19, %v5059_v10  ;;  %v5060_v24 = vmax.f32 %v5050_v43, 0.0  ;;  %v5051_v22 = vadd.f32 %v5043_v11, %v5029_v16  ;;  %v5030_v50 = vadd.f32 %v5011_v57, %v4779_v53 }
 0x93e   :  { %v5013_v33 = vpop.f32.mrf.mxu0 }
 0x93f   :  { %v12122_v6 = vmax.f32 %v5058_v58, %v5060_v24  ;;  %v5061_v44 = vmax.f32 %v5051_v22, 0.0  ;;  %v5052_v55 = vadd.f32 %v5039_v54, %v5030_v50  ;;  %v5031_v14 = vadd.f32 %v5013_v33, %v4781_v52 }
 0x940   :  { %v5017_v18 = vpop.f32.mrf.mxu0  ;;  %v8845_v38 = vpack.i.bf16 %v12120_v20, %v12118_v12 }
 0x941   :  { %v12124_v17 = vmax.f32 %v5059_v10, %v5061_v44  ;;  %v5062_v27 = vmax.f32 %v5052_v55, 0.0  ;;  %v5053_v37 = vadd.f32 %v5043_v11, %v5031_v14  ;;  %v5032_v61 = vadd.f32 %v5017_v18, %v4785_v36 }
 0x942   :  { %v5019_v51 = vpop.f32.mrf.mxu0 }
 0x943   :  { %v12126_v35 = vmax.f32 %v5060_v24, %v5062_v27  ;;  %v5063_v45 = vmax.f32 %v5053_v37, 0.0  ;;  %v5054_v60 = vadd.f32 %v5039_v54, %v5032_v61  ;;  %v5033_v63 = vadd.f32 %v5019_v51, %v4787_v5  ;;  %v9411_v54 = vld [vmem:[%s12695_s5 + $0x74] ss:$8 sps:$4 sm:$0xff]  }
 0x944   :  { %v5021_v40 = vpop.f32.mrf.mxu0  ;;  %v8855_v32 = vpack.i.bf16 %v12124_v17, %v12122_v6  ;;  %5595 = vmatprep.subr.bf16.mxu0 %v9411_v54  ;;  %v9405_v61 = vld [vmem:[%s12695_s5 + $0x134] ss:$8 sps:$4 sm:$0xff]   ;;  %v9465_v54 = vld [vmem:[%s12695_s5 + $0xa4] ss:$8 sps:$4 sm:$0xff]  }
 0x945   :  { %v5071_v2 = vmax.f32 %v5061_v44, %v5063_v45  ;;  %v5064_v49 = vmax.f32 %v5054_v60, 0.0  ;;  %v5055_v47 = vadd.f32 %v5043_v11, %v5033_v63  ;;  %5596 = vmatpush1.bf16.msra.mxu0 %v9409_v1  ;;  %v9417_v11 = vld [vmem:[%s12695_s5 + $0x64] ss:$8 sps:$4 sm:$0xff]   ;;  %v9412_v60 = vld [vmem:[%s12695_s5 + $0x110] ss:$8 sps:$4 sm:$0xff]  }
 0x946   :  { %v5022_v3 = vpop.f32.mrf.mxu0  ;;  %5597 = vmatprep.subr.bf16.mxu0 %v9417_v11  ;;  %v9420_v63 = vld [vmem:[%s12695_s5 + $0x104] ss:$8 sps:$4 sm:$0xff]   ;;  %v9418_v40 = vld [vmem:[%s12695_s5 + $0x100] ss:$8 sps:$4 sm:$0xff]   ;;  %v9457_v1 = vld [vmem:[%s12695_s5 + $0xb0] ss:$8 sps:$4 sm:$0xff]  }
 0x947   :  { %v5072_v25 = vmax.f32 %v5062_v27, %v5064_v49  ;;  %v5065_v0 = vmax.f32 %v5055_v47, 0.0  ;;  %v8840_v30 = vpack.i.bf16 %v5071_v2, %v12126_v35  ;;  %v9402_v49 = vld [vmem:[%s12694_s20 + $0x10] sm:$0xff]   ;;  %v9430_v3 = vld [vmem:[%s12695_s5 + $0xe0] ss:$8 sps:$4 sm:$0xff]   ;;  %v9444_v11 = vld [vmem:[%s12695_s5 + $0xc4] ss:$8 sps:$4 sm:$0xff]  }
 0x948   :  { %v9424_v47 = vld [vmem:[%s12695_s5 + $0xf0] ss:$8 sps:$4 sm:$0xff]  }
 0x949   :  { %v5073_v34 = vmax.f32 %v5063_v45, %v5065_v0  ;;  %8841 = vrot.lane.b32.xlu0 %v8840_v30, %s9569_s12  ;;  %5598 = vmatpush1.bf16.msra.mxu0 %v9415_v4  ;;  %v9401_v45 = vld [vmem:[%s12694_s20 + $0x8] sm:$0xff]   ;;  %v9436_v0 = vld [vmem:[%s12695_s5 + $0xd0] ss:$8 sps:$4 sm:$0xff]   ;;  %v9447_v30 = vld [vmem:[%s12695_s5 + $0x14] ss:$8 sps:$4 sm:$0xff]  }
 0x94a   :  { %5599 = vmatprep.subr.bf16.mxu0 %v9423_v15  ;;  %v9463_v4 = vld [vmem:[%s12695_s5 + $0xa0] ss:$8 sps:$4 sm:$0xff]  }
 0x94b   :  { %v8850_v7 = vpack.i.bf16 %v5073_v34, %v5072_v25  ;;  %v9442_v15 = vld [vmem:[%s12695_s5 + $0xc0] ss:$8 sps:$4 sm:$0xff]  }
 0x94d   :  { %8851 = vrot.lane.b32.xlu1 %v8850_v7, %s9569_s12  ;;  %8846 = vrot.lane.b32.xlu0 %v8845_v38, %s9569_s12  ;;  %v9453_v7 = vld [vmem:[%s12695_s5 + $0x4] ss:$8 sps:$4 sm:$0xff]   ;;  %v9451_v38 = vld [vmem:[%s12695_s5] ss:$8 sps:$4 sm:$0xff]  }
 0x94e   :  { %5600 = vmatpush1.bf16.msra.mxu0 %v9421_v41  ;;  %v9471_v41 = vld [vmem:[%s12695_s5 + $0x94] ss:$8 sps:$4 sm:$0xff]  }
 0x94f   :  { %5601 = vmatprep.subr.bf16.mxu0 %v9429_v46  ;;  %v9469_v46 = vld [vmem:[%s12695_s5 + $0x90] ss:$8 sps:$4 sm:$0xff]  }
 0x951   :  { %8856 = vrot.lane.b32.xlu1 %v8855_v32, %s9569_s12  ;;  %v9459_v32 = vld [vmem:[%s12695_s5 + $0xb4] ss:$8 sps:$4 sm:$0xff]  }
 0x952   :  { %5602 = vmatpush1.bf16.msra.mxu0 %v9427_v21  ;;  %v9450_v21 = vld [vmem:[%s12695_s5 + $0x174] ss:$8 sps:$4 sm:$0xff]  }
 0x953   :  { %5603 = vmatprep.subr.bf16.mxu0 %v9435_v23  ;;  %v9448_v23 = vld [vmem:[%s12695_s5 + $0x170] ss:$8 sps:$4 sm:$0xff]  }
 0x956   :  { %5604 = vmatpush1.bf16.msra.mxu0 %v9433_v8  ;;  %v9477_v8 = vld [vmem:[%s12695_s5 + $0x84] ss:$8 sps:$4 sm:$0xff]  }
 0x957   :  { %5605 = vmatprep.subr.bf16.mxu0 %v9441_v56  ;;  %v9475_v56 = vld [vmem:[%s12695_s5 + $0x80] ss:$8 sps:$4 sm:$0xff]  }
 0x95a   :  { %5606 = vmatpush1.bf16.msra.mxu0 %v9439_v48  ;;  %v9456_v48 = vld [vmem:[%s12695_s5 + $0x164] ss:$8 sps:$4 sm:$0xff]  }
 0x95b   :  { %5607 = vmatprep.subr.bf16.mxu0 %v9447_v30  ;;  %v9495_v30 = vld [vmem:[%s12695_s5 + $0x194] ss:$8 sps:$4 sm:$0xff]  }
 0x9bb   :  { %v8842_v59 = vpop.permute.xlu0 %8841 }
 0x9bc   :  { %v8844_v28 = vunpack.i.h.bf16 %v8842_v59  ;;  %v8843_v26 = vunpack.i.l.bf16 %v8842_v59  ;;  %v9454_v59 = vld [vmem:[%s12695_s5 + $0x160] ss:$8 sps:$4 sm:$0xff]  }
 0x9be   :  { %v5100_v62 = vsel %vm3122_vm6, %v8843_v26, %v8844_v28  ;;  %v5115_v10 = vmax.f32 %v5071_v2, %v8844_v28  ;;  %v9426_v2 = vld [vmem:[%s12695_s5 + $0xf4] ss:$8 sps:$4 sm:$0xff]   ;;  %v9460_v26 = vld [vmem:[%s12695_s5 + $0x150] ss:$8 sps:$4 sm:$0xff]  }
 0x9bf   :  { %v8852_v58 = vpop.permute.xlu1 %8851  ;;  %v8847_v31 = vpop.permute.xlu0 %8846  ;;  %v5114_v52 = vmax.f32 %v12126_v35, %v5100_v62  ;;  %v9414_v35 = vld [vmem:[%s12695_s5 + $0x114] ss:$8 sps:$4 sm:$0xff]   ;;  %v9468_v62 = vld [vmem:[%s12695_s5 + $0x144] ss:$8 sps:$4 sm:$0xff]  }
 0x9c0   :  { %v8854_v9 = vunpack.i.h.bf16 %v8852_v58  ;;  %v8853_v53 = vunpack.i.l.bf16 %v8852_v58  ;;  %v8849_v19 = vunpack.i.h.bf16 %v8847_v31  ;;  %v8848_v39 = vunpack.i.l.bf16 %v8847_v31  ;;  %v9462_v28 = vld [vmem:[%s12695_s5 + $0x154] ss:$8 sps:$4 sm:$0xff]   ;;  %v9466_v58 = vld [vmem:[%s12695_s5 + $0x140] ss:$8 sps:$4 sm:$0xff]  }
 0x9c1   :  { %v9474_v31 = vld [vmem:[%s12695_s5 + $0x1f4] ss:$8 sps:$4 sm:$0xff]  }
 0x9c2   :  { %v5117_v43 = vmax.f32 %v5073_v34, %v8854_v9  ;;  %v5101_v16 = vsel %vm3122_vm6, %v8853_v53, %v8854_v9  ;;  %v5098_v22 = vsel %vm3122_vm6, %v8848_v39, %v8849_v19  ;;  %v5111_v55 = vmax.f32 %v12120_v20, %v8849_v19  ;;  %v9400_v20 = vld [vmem:[%s12694_s20] sm:$0xff]   ;;  %v9445_v34 = vld [vmem:[%s12695_s5 + $0x10] ss:$8 sps:$4 sm:$0xff]  }
 0x9c3   :  { %v5116_v57 = vmax.f32 %v5072_v25, %v5101_v16  ;;  %v8857_v24 = vpop.permute.xlu1 %8856  ;;  %v5110_v18 = vmax.f32 %v12118_v12, %v5098_v22  ;;  %v9403_v12 = vld [vmem:[%s12695_s5 + $0x130] ss:$8 sps:$4 sm:$0xff]   ;;  %v9438_v25 = vld [vmem:[%s12695_s5 + $0xd4] ss:$8 sps:$4 sm:$0xff]   ;;  %5608 = vmatpush1.bf16.msra.mxu0 %v9445_v34 }
 0x9c4   :  { %v8859_v50 = vunpack.i.h.bf16 %v8857_v24  ;;  %v8858_v36 = vunpack.i.l.bf16 %v8857_v24  ;;  %v5127_v33 = vpack.c.bf16 %v5117_v43, %v5115_v10  ;;  %5609 = vmatprep.subr.bf16.mxu0 %v9453_v7  ;;  %v9493_v34 = vld [vmem:[%s12695_s5 + $0x190] ss:$8 sps:$4 sm:$0xff]   ;;  %v9498_v7 = vld [vmem:[%s12695_s5 + $0x184] ss:$8 sps:$4 sm:$0xff]  }
 0x9c5   :  { %v5126_v44 = vpack.c.bf16 %v5116_v57, %v5114_v52 }
 0x9c6   :  { %v5113_v14 = vmax.f32 %v12124_v17, %v8859_v50  ;;  %v5099_v5 = vsel %vm3122_vm6, %v8858_v36, %v8859_v50  ;;  %5165 = vmatprep.subr.bf16.mxu1 %v5127_v33  ;;  %v9406_v17 = vld [vmem:[%s12695_s5 + $0x120] ss:$8 sps:$4 sm:$0xff]  }
 0x9c7   :  { %v5112_v27 = vmax.f32 %v12122_v6, %v5099_v5  ;;  %5166 = vmatpush1.bf16.msra.mxu1 %v5126_v44  ;;  %v9408_v6 = vld [vmem:[%s12695_s5 + $0x124] ss:$8 sps:$4 sm:$0xff]   ;;  %5610 = vmatpush1.bf16.msra.mxu0 %v9451_v38  ;;  %v9472_v5 = vld [vmem:[%s12695_s5 + $0x1f0] ss:$8 sps:$4 sm:$0xff]   ;;  %v9496_v38 = vld [vmem:[%s12695_s5 + $0x180] ss:$8 sps:$4 sm:$0xff]  }
 0x9c8   :  { %v5125_v37 = vpack.c.bf16 %v5113_v14, %v5111_v55  ;;  %5619 = vmatprep.subr.bf16.mxu0 %v9459_v32  ;;  %v9501_v32 = vld [vmem:[%s12695_s5 + $0x234] ss:$8 sps:$4 sm:$0xff]  }
 0x9c9   :  { %v5124_v51 = vpack.c.bf16 %v5112_v27, %v5110_v18 }
 0x9ca   :  { %5167 = vmatprep.subr.bf16.mxu1 %v5125_v37  ;;  %v9480_v37 = vld [vmem:[%s12695_s5 + $0x1e4] ss:$8 sps:$4 sm:$0xff]  }
 0x9cb   :  { %5168 = vmatpush1.bf16.msra.mxu1 %v5124_v51  ;;  %5620 = vmatpush2.bf16.msra.mxu0 %v9457_v1  ;;  %v9499_v1 = vld [vmem:[%s12695_s5 + $0x230] ss:$8 sps:$4 sm:$0xff]  }
 0x9cc   :  { %5416 = vmatprep.subr.bf16.mxu1 %v9405_v61  ;;  %5621 = vmatprep.subr.bf16.mxu0 %v9465_v54  ;;  %v9504_v54 = vld [vmem:[%s12695_s5 + $0x224] ss:$8 sps:$4 sm:$0xff]  }
 0x9ce   :  { %8074 = vmatmul.mubr.msk.bf16.vlgmr.msra.gmra.mxu1 %vm5143_vm11, %v9400_v20 }
 0x9cf   :  { %5195 = vmatprep.mubr.bf16.mxu1 %v12808_v29  ;;  %5417 = vmatpush1.bf16.msra.mxu1 %v9403_v12  ;;  %v9478_v12 = vld [vmem:[%s12695_s5 + $0x1e0] ss:$8 sps:$4 sm:$0xff]  }
 0x9d0   :  { %5418 = vmatprep.subr.bf16.mxu1 %v9408_v6  ;;  %5622 = vmatpush2.bf16.msra.mxu0 %v9463_v4  ;;  %v9502_v4 = vld [vmem:[%s12695_s5 + $0x220] ss:$8 sps:$4 sm:$0xff]  }
 0x9d1   :  { %5623 = vmatprep.subr.bf16.mxu0 %v9471_v41  ;;  %v9510_v41 = vld [vmem:[%s12695_s5 + $0x204] ss:$8 sps:$4 sm:$0xff]  }
 0x9d3   :  { %5419 = vmatpush1.bf16.msra.mxu1 %v9406_v17 }
 0x9d4   :  { %5420 = vmatprep.subr.bf16.mxu1 %v9414_v35  ;;  %5624 = vmatpush2.bf16.msra.mxu0 %v9469_v46  ;;  %v9483_v35 = vld [vmem:[%s12695_s5 + $0x1d4] ss:$8 sps:$4 sm:$0xff]   ;;  %v9508_v46 = vld [vmem:[%s12695_s5 + $0x200] ss:$8 sps:$4 sm:$0xff]  }
 0x9d5   :  { %5625 = vmatprep.subr.bf16.mxu0 %v9477_v8 }
 0x9d6   :  { %8075 = vmatmul.mubr.msk.bf16.gmra.mxu1 %vm5143_vm11, %v9401_v45 }
 0x9d7   :  { %5205 = vmatprep.mubr.bf16.mxu1 %v12808_v29  ;;  %5421 = vmatpush1.bf16.msra.mxu1 %v9412_v60  ;;  %v9432_v29 = vld [vmem:[%s12695_s5 + $0xe4] ss:$8 sps:$4 sm:$0xff]  }
 0x9d8   :  { %5422 = vmatprep.subr.bf16.mxu1 %v9420_v63  ;;  %5626 = vmatpush2.bf16.msra.mxu0 %v9475_v56  ;;  %v9481_v63 = vld [vmem:[%s12695_s5 + $0x1d0] ss:$8 sps:$4 sm:$0xff]  }
 0x9db   :  { %5423 = vmatpush1.bf16.msra.mxu1 %v9418_v40 }
 0x9dc   :  { %5424 = vmatprep.subr.bf16.mxu1 %v9426_v2  ;;  %v9486_v2 = vld [vmem:[%s12695_s5 + $0x1c4] ss:$8 sps:$4 sm:$0xff]  }
 0x9de   :  { %8076 = vmatmul.mubr.msk.bf16.gmra.mxu1 %vm5143_vm11, %v9402_v49 }
 0x9df   :  { %5425 = vmatpush1.bf16.msra.mxu1 %v9424_v47  ;;  %v9484_v47 = vld [vmem:[%s12695_s5 + $0x1c0] ss:$8 sps:$4 sm:$0xff]  }
 0x9e0   :  { %5426 = vmatprep.subr.bf16.mxu1 %v9432_v29  ;;  %v9489_v29 = vld [vmem:[%s12695_s5 + $0x1b4] ss:$8 sps:$4 sm:$0xff]  }
 0x9e3   :  { %5427 = vmatpush1.bf16.msra.mxu1 %v9430_v3  ;;  %v9487_v3 = vld [vmem:[%s12695_s5 + $0x1b0] ss:$8 sps:$4 sm:$0xff]  }
 0x9e4   :  { %5428 = vmatprep.subr.bf16.mxu1 %v9438_v25  ;;  %v9492_v25 = vld [vmem:[%s12695_s5 + $0x1a4] ss:$8 sps:$4 sm:$0xff]  }
 0x9e7   :  { %5429 = vmatpush1.bf16.msra.mxu1 %v9436_v0  ;;  %v9490_v0 = vld [vmem:[%s12695_s5 + $0x1a0] ss:$8 sps:$4 sm:$0xff]  }
 0x9e8   :  { %5430 = vmatprep.subr.bf16.mxu1 %v9444_v11  ;;  %v9507_v11 = vld [vmem:[%s12695_s5 + $0x214] ss:$8 sps:$4 sm:$0xff]  }
 0x9eb   :  { %5431 = vmatpush1.bf16.msra.mxu1 %v9442_v15  ;;  %v9505_v15 = vld [vmem:[%s12695_s5 + $0x210] ss:$8 sps:$4 sm:$0xff]  }
 0x9ec   :  { %5440 = vmatprep.subr.bf16.mxu1 %v9450_v21 }
 0x9ef   :  { %5441 = vmatpush2.bf16.msra.mxu1 %v9448_v23 }
 0x9f0   :  { %5442 = vmatprep.subr.bf16.mxu1 %v9456_v48 }
 0x9f3   :  { %5443 = vmatpush2.bf16.msra.mxu1 %v9454_v59 }
 0x9f4   :  { %5444 = vmatprep.subr.bf16.mxu1 %v9462_v28 }
 0x9f7   :  { %5445 = vmatpush2.bf16.msra.mxu1 %v9460_v26 }
 0x9f8   :  { %5446 = vmatprep.subr.bf16.mxu1 %v9468_v62 }
 0x9fb   :  { %5447 = vmatpush2.bf16.msra.mxu1 %v9466_v58 }
 0x9fc   :  { %5796 = vmatprep.subr.bf16.mxu1 %v9474_v31 }
 0xa8e   :  { %v5187_v9 = vpop.f32.mrf.mxu1 }
 0xa90   :  { %v5189_v53 = vpop.f32.mrf.mxu1 }
 0xa92   :  { %v5191_v19 = vpop.f32.mrf.mxu1 }
 0xa93   :  { %v5216_v43 = vpack.c.bf16 %v5191_v19, %v5187_v9 }
 0xa94   :  { %v5193_v39 = vpop.f32.mrf.mxu1 }
 0xa95   :  { %v5217_v10 = vpack.c.bf16 %v5193_v39, %v5189_v53  ;;  %v5277_v14 = vrot.slane %v5216_v43, 4 }
 0xa96   :  { %v5197_v16 = vpop.f32.mrf.mxu1 }
 0xa97   :  { %8151 = vmatprep.mubr.msk.bf16.mxu0 %vm5409_vm12, %v5217_v10  ;;  %v5280_v44 = vrot.slane %v5217_v10, 4  ;;  %v5857_v10 = vld [vmem:[%s12696_s13] sm:$0x3] }
 0xa98   :  { %v5199_v52 = vpop.f32.mrf.mxu1  ;;  %5628 = vmatmul.mubr.bf16.vlgmr.msra.gmra.mxu0 %v5216_v43 }
 0xa9a   :  { %v5201_v57 = vpop.f32.mrf.mxu1 }
 0xa9b   :  { %v12304_v24 = vpack.c.bf16 %v5201_v57, %v5197_v16 }
 0xa9c   :  { %v5203_v22 = vpop.f32.mrf.mxu1 }
 0xa9d   :  { %v5219_v50 = vpack.c.bf16 %v5203_v22, %v5199_v52  ;;  %v5278_v36 = vrot.slane %v12304_v24, 4 }
 0xa9e   :  { %v5207_v33 = vpop.f32.mrf.mxu1 }
 0xa9f   :  { %v5281_v55 = vrot.slane %v5219_v50, 4  ;;  %8152 = vmatprep.mubr.msk.bf16.mxu0 %vm5409_vm12, %v5219_v50  ;;  %v5279_v61 = vsel %vm157_vm0, %v5277_v14, %v5278_v36 }
 0xaa0   :  { %v5209_v18 = vpop.f32.mrf.mxu1  ;;  %5638 = vmatmul.mubr.bf16.gmra.mxu0 %v12304_v24 }
 0xaa1   :  { %v5282_v27 = vsel %vm157_vm0, %v5280_v44, %v5281_v55 }
 0xaa2   :  { %8125 = vmatprep.mubr.msk.bf16.mxu1 %vm5409_vm12, %v5282_v27  ;;  %v5211_v51 = vpop.f32.mrf.mxu1 }
 0xaa3   :  { %5449 = vmatmul.mubr.bf16.vlgmr.msra.gmra.mxu1 %v5279_v61  ;;  %v5220_v20 = vpack.c.bf16 %v5211_v51, %v5207_v33 }
 0xaa4   :  { %5797 = vmatpush1.bf16.msra.mxu1 %v9472_v5  ;;  %v5213_v6 = vpop.f32.mrf.mxu1 }
 0xaa5   :  { %5798 = vmatprep.subr.bf16.mxu1 %v9480_v37  ;;  %v5221_v17 = vpack.c.bf16 %v5213_v6, %v5209_v18  ;;  %v5283_v45 = vrot.slane %v5220_v20, 4 }
 0xaa7   :  { %v5285_v60 = vrot.slane %v5221_v17, 4  ;;  %v5284_v49 = vsel %vm157_vm0, %v5278_v36, %v5283_v45  ;;  %v5862_v36 = vrot.slane %v5857_v10, %v12810_v42 }
 0xaa8   :  { %5799 = vmatpush1.bf16.msra.mxu1 %v9478_v12 }
 0xaa9   :  { %5800 = vmatprep.subr.bf16.mxu1 %v9483_v35  ;;  %v5286_v40 = vsel %vm157_vm0, %v5281_v55, %v5285_v60 }
 0xaaa   :  { %8126 = vmatprep.mubr.msk.bf16.mxu1 %vm5409_vm12, %v5286_v40 }
 0xaab   :  { %5459 = vmatmul.mubr.bf16.gmra.mxu1 %v5284_v49 }
 0xaac   :  { %5801 = vmatpush1.bf16.msra.mxu1 %v9481_v63  ;;  %8201 = vmatprep.mubr.msk.bf16.mxu1 %vm5409_vm12, %v5219_v50 }
 0xaad   :  { %5802 = vmatprep.subr.bf16.mxu1 %v9486_v2 }
 0xab0   :  { %5803 = vmatpush1.bf16.msra.mxu1 %v9484_v47 }
 0xab1   :  { %5804 = vmatprep.subr.bf16.mxu1 %v9489_v29 }
 0xab4   :  { %5805 = vmatpush1.bf16.msra.mxu1 %v9487_v3 }
 0xab5   :  { %5806 = vmatprep.subr.bf16.mxu1 %v9492_v25 }
 0xab8   :  { %5807 = vmatpush1.bf16.msra.mxu1 %v9490_v0 }
 0xab9   :  { %5808 = vmatprep.subr.bf16.mxu1 %v9495_v30 }
 0xabc   :  { %5809 = vmatpush1.bf16.msra.mxu1 %v9493_v34 }
 0xabd   :  { %5810 = vmatprep.subr.bf16.mxu1 %v9498_v7 }
 0xac0   :  { %5811 = vmatpush1.bf16.msra.mxu1 %v9496_v38 }
 0xac1   :  { %5820 = vmatprep.subr.bf16.mxu1 %v9501_v32 }
 0xac4   :  { %5821 = vmatpush2.bf16.msra.mxu1 %v9499_v1 }
 0xac5   :  { %5822 = vmatprep.subr.bf16.mxu1 %v9504_v54 }
 0xac8   :  { %5823 = vmatpush2.bf16.msra.mxu1 %v9502_v4 }
 0xac9   :  { %5824 = vmatprep.subr.bf16.mxu1 %v9507_v11 }
 0xacc   :  { %5825 = vmatpush2.bf16.msra.mxu1 %v9505_v15 }
 0xacd   :  { %5826 = vmatprep.subr.bf16.mxu1 %v9510_v41  ;;  %v9570_v41 = vmov 0.0  }
 0xace   :  { %8437 = vmatprep.subr.bf16.mxu0 %v9570_v41  ;;  %8441 = vmatprep.mubr.msk.bf16.mxu0 %vm9571_vm13, %v9570_v41 }
 0xad0   :  { %5827 = vmatpush2.bf16.msra.mxu1 %v9508_v46 }
 0xad3   :  { %5829 = vmatmul.mubr.bf16.vlgmr.msra.gmra.mxu1 %v12304_v24  ;;  %v5866_v24 = vrot.slane %v5857_v10, %v10164_v13 }
 0xad4   :  { %8202 = vmatprep.mubr.msk.bf16.mxu1 %vm5409_vm12, %v5221_v17 }
 0xadb   :  { %5839 = vmatmul.mubr.bf16.gmra.mxu1 %v5220_v20 }
 0xb58   :  { %v5629_v48 = vpop.f32.mrf.mxu0 }
 0xb5a   :  { %v5631_v28 = vpop.f32.mrf.mxu0 }
 0xb5c   :  { %v5633_v62 = vpop.f32.mrf.mxu0 }
 0xb5e   :  { %v5635_v31 = vpop.f32.mrf.mxu0 }
 0xb60   :  { %v5639_v53 = vpop.f32.mrf.mxu0 }
 0xb62   :  { %v5641_v22 = vpop.f32.mrf.mxu0 }
 0xb63   :  { %v5450_v21 = vpop.f32.mrf.mxu1 }
 0xb64   :  { %v5630_v43 = vadd.f32 %v5629_v48, %v5450_v21  ;;  %v5643_v37 = vpop.f32.mrf.mxu0 }
 0xb65   :  { %v5452_v23 = vpop.f32.mrf.mxu1 }
 0xb66   :  { %v5632_v39 = vadd.f32 %v5631_v28, %v5452_v23  ;;  %v5645_v40 = vpop.f32.mrf.mxu0 }
 0xb67   :  { %v5454_v8 = vpop.f32.mrf.mxu1 }
 0xb68   :  { %v5634_v52 = vadd.f32 %v5633_v62, %v5454_v8 }
 0xb69   :  { %v5456_v56 = vpop.f32.mrf.mxu1 }
 0xb6a   :  { %v5636_v44 = vadd.f32 %v5635_v31, %v5456_v56 }
 0xb6b   :  { %v5460_v59 = vpop.f32.mrf.mxu1 }
 0xb6c   :  { %v5640_v20 = vadd.f32 %v5639_v53, %v5460_v59 }
 0xb6d   :  { %v5462_v26 = vpop.f32.mrf.mxu1 }
 0xb6e   :  { %v5642_v12 = vadd.f32 %v5641_v22, %v5462_v26 }
 0xb6f   :  { %v5464_v58 = vpop.f32.mrf.mxu1 }
 0xb70   :  { %v5644_v17 = vadd.f32 %v5643_v37, %v5464_v58  ;;  %v9522_v37 = vld [vmem:[%s12698_s6 + $0x20] sm:$0xff]  }
 0xb71   :  { %v5466_v9 = vpop.f32.mrf.mxu1 }
 0xb72   :  { %v5646_v47 = vadd.f32 %v5645_v40, %v5466_v9 }
 0xb93   :  { %v5830_v19 = vpop.f32.mrf.mxu1 }
 0xb94   :  { %v5849_v50 = vadd.f32 %v5830_v19, %v5630_v43 }
 0xb95   :  { %v5832_v16 = vpop.f32.mrf.mxu1 }
 0xb96   :  { %v5850_v57 = vadd.f32 %v5832_v16, %v5632_v39  ;;  %v5869_v61 = vadd.f32 %v5862_v36, %v5849_v50 }
 0xb97   :  { %v5834_v33 = vpop.f32.mrf.mxu1 }
 0xb98   :  { %v5851_v55 = vadd.f32 %v5834_v33, %v5634_v52  ;;  %v5870_v5 = vadd.f32 %v5866_v24, %v5850_v57  ;;  %v5877_v2 = vmax.f32 %v5869_v61, 0.0  ;;  %v9511_v33 = vld [vmem:[%s12697_s21] sm:$0xff]   ;;  %v9524_v61 = vld [vmem:[%s12698_s6 + $0x18] sm:$0xff]  }
 0xb99   :  { %v5836_v14 = vpop.f32.mrf.mxu1 }
 0xb9a   :  { %v5871_v18 = vadd.f32 %v5862_v36, %v5851_v55  ;;  %v5852_v27 = vadd.f32 %v5836_v14, %v5636_v44  ;;  %v5878_v45 = vmax.f32 %v5870_v5, 0.0  ;;  %v9512_v55 = vld [vmem:[%s12697_s21 + $0x8] sm:$0xff]   ;;  %v9513_v14 = vld [vmem:[%s12697_s21 + $0x10] sm:$0xff]  }
 0xb9b   :  { %v5840_v51 = vpop.f32.mrf.mxu1  ;;  %v9518_v5 = vld [vmem:[%s12698_s6 + $0x30] sm:$0x3f]  }
 0xb9c   :  { %v5872_v6 = vadd.f32 %v5866_v24, %v5852_v27  ;;  %v5879_v35 = vmax.f32 %v5871_v18, 0.0  ;;  %v5853_v63 = vadd.f32 %v5840_v51, %v5640_v20  ;;  %8634 = vmatprep.subr.msk.bf16.mxu1 %vm1758_vm3, %v9518_v5  ;;  %v6199_v18 = vsel %vm1758_vm3, %v9518_v5, 0  ;;  %v9520_v27 = vld [vmem:[%s12698_s6 + $0x28] sm:$0xff]   ;;  %v9515_v51 = vld [vmem:[%s12698_s6 + $0x60] sm:$0xff]   ;;  %v9526_v20 = vld [vmem:[%s12698_s6 + $0x10] sm:$0xff]  }
 0xb9d   :  { %v5842_v13 = vpop.f32.mrf.mxu1  ;;  %8472 = vmatpush3.bf16.msra.mxu1 %v6199_v18 }
 0xb9e   :  { %v5880_v60 = vmax.f32 %v5872_v6, 0.0  ;;  %v5854_v42 = vadd.f32 %v5842_v13, %v5642_v12  ;;  %v5885_v25 = vmax.f32 %v5877_v2, %v5879_v35  ;;  %v5873_v30 = vadd.f32 %v5862_v36, %v5853_v63  ;;  %8473 = vmatprep.subr.bf16.mxu1 %v9520_v27  ;;  %v9516_v12 = vld [vmem:[%s12698_s6 + $0x58] sm:$0xff]   ;;  %v9528_v6 = vld [vmem:[%s12698_s6 + $0x8] sm:$0xff]   ;;  %v9525_v63 = vld [vmem:[%s12698_s6 + $0xa0] sm:$0x3f]  }
 0xb9f   :  { %v5844_v49 = vpop.f32.mrf.mxu1  ;;  %v9519_v13 = vld [vmem:[%s12698_s6 + $0x48] sm:$0xff]  }
 0xba0   :  { %v5886_v29 = vmax.f32 %v5878_v45, %v5880_v60  ;;  %v5855_v3 = vadd.f32 %v5844_v49, %v5644_v17  ;;  %v5874_v34 = vadd.f32 %v5866_v24, %v5854_v42  ;;  %v5881_v4 = vmax.f32 %v5873_v30, 0.0  ;;  %v9517_v17 = vld [vmem:[%s12698_s6 + $0x50] sm:$0xff]   ;;  %v9521_v45 = vld [vmem:[%s12698_s6 + $0x40] sm:$0xff]  }
 0xba1   :  { %v5846_v0 = vpop.f32.mrf.mxu1  ;;  %8474 = vmatpush3.bf16.msra.mxu1 %v9520_v27 }
 0xba2   :  { %v5875_v7 = vadd.f32 %v5862_v36, %v5855_v3  ;;  %v5856_v38 = vadd.f32 %v5846_v0, %v5646_v47  ;;  %v8865_v32 = vpack.i.bf16 %v5886_v29, %v5885_v25  ;;  %v5882_v11 = vmax.f32 %v5874_v34, 0.0  ;;  %v9514_v36 = vld [vmem:[%s12698_s6 + $0x68] sm:$0x3f]   ;;  %8475 = vmatprep.subr.bf16.mxu1 %v9522_v37 }
 0xba3   :  { %v5887_v56 = vmax.f32 %v5879_v35, %v5881_v4  ;;  %v6100_v44 = vsel %vm1758_vm3, %v9514_v36, 0  ;;  %v9530_v35 = vld [vmem:[%s12698_s6] sm:$0xff]  }
 0xba4   :  { %v5883_v1 = vmax.f32 %v5875_v7, 0.0  ;;  %v5876_v54 = vadd.f32 %v5866_v24, %v5856_v38  ;;  %8866 = vrot.lane.b32.xlu1 %v8865_v32, %s9568_s17  ;;  %v5888_v23 = vmax.f32 %v5880_v60, %v5882_v11  ;;  %v9523_v60 = vld [vmem:[%s12698_s6 + $0x38] sm:$0xff]  }
 0xba5   :  { %8476 = vmatpush3.bf16.msra.mxu1 %v9522_v37 }
 0xba6   :  { %v5884_v15 = vmax.f32 %v5876_v54, 0.0  ;;  %v5889_v46 = vmax.f32 %v5881_v4, %v5883_v1  ;;  %v8870_v48 = vpack.i.bf16 %v5888_v23, %v5887_v56  ;;  %8477 = vmatprep.subr.bf16.mxu1 %v9524_v61 }
 0xba8   :  { %v5890_v21 = vmax.f32 %v5882_v11, %v5884_v15 }
 0xba9   :  { %8478 = vmatpush3.bf16.msra.mxu1 %v9524_v61 }
 0xbaa   :  { %v8860_v8 = vpack.i.bf16 %v5890_v21, %v5889_v46  ;;  %8479 = vmatprep.subr.bf16.mxu1 %v9526_v20  ;;  %v9527_v21 = vld [vmem:[%s12698_s6 + $0x98] sm:$0xff]  }
 0xbac   :  { %8861 = vrot.lane.b32.xlu0 %v8860_v8, %s9568_s17  ;;  %v9529_v8 = vld [vmem:[%s12698_s6 + $0x90] sm:$0xff]  }
 0xbad   :  { %8480 = vmatpush3.bf16.msra.mxu1 %v9526_v20 }
 0xbae   :  { %8481 = vmatprep.subr.bf16.mxu1 %v9528_v6 }
 0xbb0   :  { %8871 = vrot.lane.b32.xlu0 %v8870_v48, %s9568_s17  ;;  %v9532_v48 = vld [vmem:[%s12698_s6 + $0x80] sm:$0xff]  }
 0xbb1   :  { %8482 = vmatpush3.bf16.msra.mxu1 %v9528_v6 }
 0xbb2   :  { %8483 = vmatprep.subr.bf16.mxu1 %v9530_v35 }
 0xbb5   :  { %8484 = vmatpush3.bf16.msra.mxu1 %v9530_v35 }
 0xbb6   :  { %8507 = vmatprep.subr.bf16.mxu1 %v9570_v41 }
 0xc16   :  { %v8867_v59 = vpop.permute.xlu1 %8866 }
 0xc17   :  { %v8869_v26 = vunpack.i.h.bf16 %v8867_v59  ;;  %v8868_v62 = vunpack.i.l.bf16 %v8867_v59  ;;  %v9533_v59 = vld [vmem:[%s12698_s6 + $0x78] sm:$0xff]  }
 0xc19   :  { %v5909_v39 = vsel %vm4140_vm8, %v8868_v62, %v8869_v26 }
 0xc1a   :  { %v5915_v57 = vmax.f32 %v5885_v25, %v5909_v39 }
 0xc1e   :  { %v8862_v28 = vpop.permute.xlu0 %8861 }
 0xc1f   :  { %v8864_v58 = vunpack.i.h.bf16 %v8862_v28  ;;  %v8863_v31 = vunpack.i.l.bf16 %v8862_v28  ;;  %v9534_v28 = vld [vmem:[%s12698_s6 + $0x70] sm:$0xff]  }
 0xc21   :  { %v5911_v9 = vsel %vm4140_vm8, %v8863_v31, %v8864_v58 }
 0xc22   :  { %v8872_v53 = vpop.permute.xlu0 %8871  ;;  %v5917_v19 = vmax.f32 %v5889_v46, %v5911_v9  ;;  %v6310_v46 = vsel %vm1758_vm3, %v9525_v63, 0 }
 0xc23   :  { %v8874_v10 = vunpack.i.h.bf16 %v8872_v53  ;;  %v8873_v43 = vunpack.i.l.bf16 %v8872_v53 }
 0xc24   :  { %v5925_v16 = vpack.c.bf16 %v5917_v19, %v5917_v19 }
 0xc25   :  { %v5910_v52 = vsel %vm4140_vm8, %v8873_v43, %v8874_v10 }
 0xc26   :  { %v5916_v24 = vmax.f32 %v5887_v56, %v5910_v52  ;;  %v5952_v22 = vsel %vm157_vm0, %v5925_v16, 0  ;;  %v9531_v56 = vld [vmem:[%s12698_s6 + $0x88] sm:$0xff]   ;;  %v8264_v52 = vld [vmem:[%s12699_s14] ss:$0 sm:$0xff] }
 0xc27   :  { %8438 = vmatpush3.bf16.msra.mxu0 %v5952_v22 }
 0xc28   :  { %8439 = vmatprep.subr.bf16.mxu0 %v9570_v41  ;;  %v5924_v50 = vpack.c.bf16 %v5916_v24, %v5915_v57 }
 0xc2b   :  { %8440 = vmatpush3.bf16.msra.mxu0 %v5924_v50 }
 0xc2c   :  { %8633 = vmatprep.subr.msk.bf16.mxu0 %vm1758_vm3, %v9514_v36 }
 0xc2e   :  { %8442 = vmatmul.mubr.msk.bf16.vlgmr.msra.gmra.mxu0 %vm5941_vm14, %v9511_v33 }
 0xc2f   :  { %8445 = vmatprep.mubr.msk.bf16.mxu0 %vm9571_vm13, %v9570_v41  ;;  %8454 = vmatpush3.bf16.msra.mxu0 %v6100_v44 }
 0xc30   :  { %8455 = vmatprep.subr.bf16.mxu0 %v9515_v51 }
 0xc33   :  { %8456 = vmatpush3.bf16.msra.mxu0 %v9515_v51 }
 0xc34   :  { %8457 = vmatprep.subr.bf16.mxu0 %v9516_v12 }
 0xc36   :  { %8446 = vmatmul.mubr.msk.bf16.gmra.mxu0 %vm5941_vm14, %v9512_v55 }
 0xc37   :  { %8449 = vmatprep.mubr.msk.bf16.mxu0 %vm9571_vm13, %v9570_v41  ;;  %8458 = vmatpush3.bf16.msra.mxu0 %v9516_v12 }
 0xc38   :  { %8459 = vmatprep.subr.bf16.mxu0 %v9517_v17 }
 0xc3b   :  { %8460 = vmatpush3.bf16.msra.mxu0 %v9517_v17 }
 0xc3c   :  { %8461 = vmatprep.subr.bf16.mxu0 %v9519_v13 }
 0xc3e   :  { %8450 = vmatmul.mubr.msk.bf16.gmra.mxu0 %vm5941_vm14, %v9513_v14 }
 0xc3f   :  { %8462 = vmatpush3.bf16.msra.mxu0 %v9519_v13 }
 0xc40   :  { %8463 = vmatprep.subr.bf16.mxu0 %v9521_v45 }
 0xc43   :  { %8464 = vmatpush3.bf16.msra.mxu0 %v9521_v45 }
 0xc44   :  { %8465 = vmatprep.subr.bf16.mxu0 %v9523_v60 }
 0xc47   :  { %8466 = vmatpush3.bf16.msra.mxu0 %v9523_v60 }
 0xc48   :  { %8635 = vmatprep.subr.msk.bf16.mxu0 %vm1758_vm3, %v9525_v63  ;;  %vm6956_vm3 = vcmask 1041408  }
 0xcee   :  { %v5988_v42 = vpop.f32.mrf.mxu0 }
 0xcf0   :  { %v8443_v40 = vpop.f32.mrf.mxu0 }
 0xcf2   :  { %v5991_v2 = vpop.f32.mrf.mxu0 }
 0xcf3   :  { %v6011_v49 = vpack.c.bf16 %v5991_v2, %v5988_v42 }
 0xcf4   :  { %v8444_v47 = vpop.f32.mrf.mxu0 }
 0xcf5   :  { %8485 = vmatprep.mubr.msk.bf16.mxu1 %vm6092_vm15, %v6011_v49  ;;  %v6046_v34 = vrot.slane %v6011_v49, 4 }
 0xcf6   :  { %v5996_v29 = vpop.f32.mrf.mxu0 }
 0xcf8   :  { %v8447_v3 = vpop.f32.mrf.mxu0 }
 0xcfa   :  { %v5999_v25 = vpop.f32.mrf.mxu0 }
 0xcfb   :  { %v6012_v0 = vpack.c.bf16 %v5999_v25, %v5996_v29  ;;  %v9535_v25 = vld [vmem:[%s12700_s22] sm:$0xff]  }
 0xcfc   :  { %v8448_v30 = vpop.f32.mrf.mxu0 }
 0xcfd   :  { %v6047_v7 = vrot.slane %v6012_v0, 4  ;;  %8486 = vmatmul.mubr.msk.bf16.vlgmr.msra.gmra.mxu1 %vm6092_vm15, %v6012_v0  ;;  %v9537_v30 = vld [vmem:[%s12700_s22 + $0x10] sm:$0xff]  }
 0xcfe   :  { %v6004_v38 = vpop.f32.mrf.mxu0  ;;  %8511 = vmatprep.mubr.msk.bf16.mxu1 %vm9571_vm13, %v9570_v41 }
 0xcff   :  { %v6048_v32 = vsel %vm157_vm0, %v6046_v34, %v6047_v7  ;;  %v9542_v34 = vld [vmem:[%s12701_s7 + $0x20] ss:$0 sps:$4 sm:$0xff]  }
 0xd00   :  { %v8451_v1 = vpop.f32.mrf.mxu0  ;;  %8467 = vmatprep.mubr.msk.bf16.mxu0 %vm6092_vm15, %v6048_v32  ;;  %v9546_v32 = vld [vmem:[%s12701_s7 + $0x10] sm:$0xff]  }
 0xd01   :  { %v9538_v1 = vld [vmem:[%s12701_s7 + $0x44] ss:$0 sps:$4 sm:$0xff]  }
 0xd02   :  { %v6007_v54 = vpop.f32.mrf.mxu0 }
 0xd03   :  { %v6013_v4 = vpack.c.bf16 %v6007_v54, %v6004_v38  ;;  %v9544_v38 = vld [vmem:[%s12701_s7 + $0x18] sm:$0xff]   ;;  %v6555_v54 = vsel %vm157_vm0, %v9538_v1, 0 }
 0xd04   :  { %v8452_v11 = vpop.f32.mrf.mxu0 }
 0xd05   :  { %v6049_v15 = vrot.slane %v6013_v4, 4  ;;  %v9539_v11 = vld [vmem:[%s12701_s7 + $0x3c] sm:$0xff]  }
 0xd07   :  { %v6050_v23 = vsel %vm157_vm0, %v6047_v7, %v6049_v15  ;;  %v6640_v7 = vsel %vm157_vm0, %v9542_v34, 0  ;;  %v9550_v15 = vld [vmem:[%s12701_s7] sm:$0xff]  }
 0xd08   :  { %8468 = vmatmul.mubr.msk.bf16.vlgmr.msra.gmra.mxu0 %vm6092_vm15, %v6050_v23  ;;  %v9543_v23 = vld [vmem:[%s12701_s7 + $0x24] sm:$0xff]  }
 0xd09   :  { %8490 = vmatpush3.bf16.msra.mxu0 %v6310_v46  ;;  %8503 = vmatprep.mubr.msk.bf16.mxu0 %vm6092_vm15, %v6012_v0  ;;  %v9536_v0 = vld [vmem:[%s12700_s22 + $0x8] sm:$0xff]   ;;  %v9540_v46 = vld [vmem:[%s12701_s7 + $0x34] sm:$0xff]  }
 0xd0a   :  { %8491 = vmatprep.subr.bf16.mxu0 %v9527_v21 }
 0xd0d   :  { %8492 = vmatpush3.bf16.msra.mxu0 %v9527_v21  ;;  %v9541_v21 = vld [vmem:[%s12701_s7 + $0x2c] sm:$0xff]  }
 0xd0e   :  { %8493 = vmatprep.subr.bf16.mxu0 %v9529_v8 }
 0xd11   :  { %8494 = vmatpush3.bf16.msra.mxu0 %v9529_v8  ;;  %v9545_v8 = vld [vmem:[%s12701_s7 + $0x68] ss:$0 sps:$4 sm:$0xff]  }
 0xd12   :  { %8495 = vmatprep.subr.bf16.mxu0 %v9531_v56 }
 0xd15   :  { %8496 = vmatpush3.bf16.msra.mxu0 %v9531_v56 }
 0xd16   :  { %8497 = vmatprep.subr.bf16.mxu0 %v9532_v48 }
 0xd19   :  { %8498 = vmatpush3.bf16.msra.mxu0 %v9532_v48 }
 0xd1a   :  { %8499 = vmatprep.subr.bf16.mxu0 %v9533_v59 }
 0xd1d   :  { %8500 = vmatpush3.bf16.msra.mxu0 %v9533_v59 }
 0xd1e   :  { %8501 = vmatprep.subr.bf16.mxu0 %v9534_v28 }
 0xd21   :  { %8502 = vmatpush3.bf16.msra.mxu0 %v9534_v28 }
 0xd22   :  { %8637 = vmatprep.subr.msk.bf16.mxu0 %vm157_vm0, %v9542_v34 }
 0xd24   :  { %8504 = vmatmul.mubr.msk.bf16.vlgmr.msra.gmra.mxu0 %vm6092_vm15, %v6013_v4  ;;  %v9548_v4 = vld [vmem:[%s12701_s7 + $0x8] sm:$0xff]  }
 0xd25   :  { %8538 = vmatpush3.bf16.msra.mxu0 %v6640_v7 }
 0xd26   :  { %8539 = vmatprep.subr.bf16.mxu0 %v9544_v38 }
 0xd29   :  { %8540 = vmatpush3.bf16.msra.mxu0 %v9544_v38 }
 0xd2a   :  { %8541 = vmatprep.subr.bf16.mxu0 %v9546_v32 }
 0xd2d   :  { %8542 = vmatpush3.bf16.msra.mxu0 %v9546_v32 }
 0xd2e   :  { %8543 = vmatprep.subr.bf16.mxu0 %v9548_v4 }
 0xd31   :  { %8544 = vmatpush3.bf16.msra.mxu0 %v9548_v4 }
 0xd32   :  { %8545 = vmatprep.subr.bf16.mxu0 %v9550_v15 }
 0xd35   :  { %8546 = vmatpush3.bf16.msra.mxu0 %v9550_v15 }
 0xd36   :  { %8565 = vmatprep.subr.bf16.mxu0 %v9570_v41 }
 0xdbd   :  { %v8487_v58 = vpop.f32.mrf.mxu1 }
 0xdbf   :  { %v6235_v9 = vpop.f32.mrf.mxu1 }
 0xdc1   :  { %v8488_v39 = vpop.f32.mrf.mxu1 }
 0xdc3   :  { %v6238_v50 = vpop.f32.mrf.mxu1 }
 0xdc8   :  { %v8469_v26 = vpop.f32.mrf.mxu0 }
 0xdc9   :  { %v6244_v19 = vadd.f32 %v8487_v58, %v8469_v26 }
 0xdca   :  { %v6136_v62 = vpop.f32.mrf.mxu0 }
 0xdcb   :  { %v6236_v43 = vadd.f32 %v6235_v9, %v6136_v62 }
 0xdcc   :  { %v8470_v31 = vpop.f32.mrf.mxu0 }
 0xdcd   :  { %v6247_v24 = vadd.f32 %v8488_v39, %v8470_v31 }
 0xdce   :  { %v6139_v53 = vpop.f32.mrf.mxu0 }
 0xdcf   :  { %v6239_v33 = vadd.f32 %v6238_v50, %v6139_v53  ;;  %v6732_v50 = vsel %vm157_vm0, %v9545_v8, 0 }
 0xde4   :  { %v8505_v10 = vpop.f32.mrf.mxu0 }
 0xde5   :  { %v6363_v16 = vadd.f32 %v8505_v10, %v6244_v19 }
 0xde6   :  { %v6346_v57 = vpop.f32.mrf.mxu0 }
 0xde7   :  { %v6361_v22 = vadd.f32 %v6346_v57, %v6236_v43  ;;  %v6374_v44 = vadd.f32 %v8264_v52, %v6363_v16 }
 0xde8   :  { %v8506_v36 = vpop.f32.mrf.mxu0 }
 0xde9   :  { %v6364_v55 = vadd.f32 %v8506_v36, %v6247_v24  ;;  %v6372_v5 = vadd.f32 %v8264_v52, %v6361_v22  ;;  %v6378_v37 = vmax.f32 %v6374_v44, 0.0  ;;  %v9547_v36 = vld [vmem:[%s12701_s7 + $0x60] sm:$0xff]   ;;  %v9549_v44 = vld [vmem:[%s12701_s7 + $0x58] sm:$0xff]  }
 0xdea   :  { %v6349_v14 = vpop.f32.mrf.mxu0 }
 0xdeb   :  { %v6375_v18 = vadd.f32 %v8264_v52, %v6364_v55  ;;  %v6362_v27 = vadd.f32 %v6349_v14, %v6239_v33  ;;  %v6376_v20 = vmax.f32 %v6372_v5, 0.0  ;;  %v9551_v55 = vld [vmem:[%s12701_s7 + $0x50] sm:$0xff]   ;;  %v9552_v14 = vld [vmem:[%s12701_s7 + $0x48] sm:$0xff]  }
 0xded   :  { %v6379_v61 = vmax.f32 %v6375_v18, 0.0  ;;  %v6373_v51 = vadd.f32 %v8264_v52, %v6362_v27 }
 0xdef   :  { %v6377_v12 = vmax.f32 %v6373_v51, 0.0  ;;  %v6382_v6 = vmax.f32 %v6378_v37, %v6379_v61 }
 0xdf1   :  { %v6380_v17 = vmax.f32 %v6376_v20, %v6377_v12  ;;  %v6381_v35 = vmax.f32 %v6377_v12, %v6378_v37  ;;  %6390 = vrot.lane.b32.xlu1 %v6382_v6, %s9567_s1 }
 0xdf3   :  { %v8875_v13 = vpack.i.bf16 %v6381_v35, %v6380_v17 }
 0xdf5   :  { %8876 = vrot.lane.b32.xlu0 %v8875_v13, %s9567_s1  ;;  %v8310_v13 = vld [vmem:[%s12702_s15] ss:$0 sm:$0xff] }
 0xe63   :  { %v6391_v45 = vpop.permute.xlu1 %6390 }
 0xe64   :  { %v6397_v60 = vmax.f32 %v6382_v6, %v6391_v45 }
 0xe66   :  { %v6405_v63 = vpack.c.bf16 %v6397_v60, %v6397_v60 }
 0xe67   :  { %v8877_v42 = vpop.permute.xlu0 %8876 }
 0xe68   :  { %v6431_v40 = vsel %vm157_vm0, %v6405_v63, 0  ;;  %v8879_v2 = vunpack.i.h.bf16 %v8877_v42  ;;  %v8878_v49 = vunpack.i.l.bf16 %v8877_v42 }
 0xe69   :  { %8508 = vmatpush3.bf16.msra.mxu1 %v6431_v40 }
 0xe6a   :  { %v6396_v47 = vmax.f32 %v6381_v35, %v8879_v2  ;;  %v6395_v29 = vmax.f32 %v6380_v17, %v8878_v49  ;;  %8509 = vmatprep.subr.bf16.mxu1 %v9570_v41 }
 0xe6c   :  { %v6404_v3 = vpack.c.bf16 %v6396_v47, %v6395_v29 }
 0xe6e   :  { %8510 = vmatpush3.bf16.msra.mxu1 %v6404_v3 }
 0xe6f   :  { %8636 = vmatprep.subr.msk.bf16.mxu1 %vm157_vm0, %v9538_v1 }
 0xe71   :  { %8512 = vmatmul.mubr.msk.bf16.vlgmr.msra.gmra.mxu1 %vm5941_vm14, %v9535_v25 }
 0xe72   :  { %8515 = vmatprep.mubr.msk.bf16.mxu1 %vm9571_vm13, %v9570_v41  ;;  %8524 = vmatpush3.bf16.msra.mxu1 %v6555_v54 }
 0xe73   :  { %8525 = vmatprep.subr.bf16.mxu1 %v9539_v11 }
 0xe76   :  { %8526 = vmatpush3.bf16.msra.mxu1 %v9539_v11 }
 0xe77   :  { %8527 = vmatprep.subr.bf16.mxu1 %v9540_v46 }
 0xe79   :  { %8516 = vmatmul.mubr.msk.bf16.gmra.mxu1 %vm5941_vm14, %v9536_v0 }
 0xe7a   :  { %8519 = vmatprep.mubr.msk.bf16.mxu1 %vm9571_vm13, %v9570_v41  ;;  %8528 = vmatpush3.bf16.msra.mxu1 %v9540_v46 }
 0xe7b   :  { %8529 = vmatprep.subr.bf16.mxu1 %v9541_v21 }
 0xe7e   :  { %8530 = vmatpush3.bf16.msra.mxu1 %v9541_v21 }
 0xe7f   :  { %8531 = vmatprep.subr.bf16.mxu1 %v9543_v23 }
 0xe81   :  { %8520 = vmatmul.mubr.msk.bf16.gmra.mxu1 %vm5941_vm14, %v9537_v30 }
 0xe82   :  { %8532 = vmatpush3.bf16.msra.mxu1 %v9543_v23 }
 0xe83   :  { %8638 = vmatprep.subr.msk.bf16.mxu1 %vm157_vm0, %v9545_v8 }
 0xf31   :  { %v6467_v56 = vpop.f32.mrf.mxu1 }
 0xf33   :  { %v8513_v48 = vpop.f32.mrf.mxu1 }
 0xf35   :  { %v6470_v59 = vpop.f32.mrf.mxu1 }
 0xf36   :  { %v6490_v28 = vpack.c.bf16 %v6470_v59, %v6467_v56 }
 0xf37   :  { %v8514_v26 = vpop.f32.mrf.mxu1 }
 0xf38   :  { %8547 = vmatprep.mubr.msk.bf16.mxu0 %vm6547_vm2, %v6490_v28  ;;  %v6515_v19 = vrot.slane %v6490_v28, 4 }
 0xf39   :  { %v6475_v62 = vpop.f32.mrf.mxu1 }
 0xf3b   :  { %v8517_v58 = vpop.f32.mrf.mxu1 }
 0xf3c   :  { %v9554_v58 = vld [vmem:[%s12703_s23 + $0x8] sm:$0xff]  }
 0xf3d   :  { %v6478_v31 = vpop.f32.mrf.mxu1 }
 0xf3e   :  { %v6491_v9 = vpack.c.bf16 %v6478_v31, %v6475_v62  ;;  %v9553_v62 = vld [vmem:[%s12703_s23] sm:$0xff]   ;;  %v9555_v31 = vld [vmem:[%s12703_s23 + $0x10] sm:$0xff]  }
 0xf3f   :  { %v8518_v53 = vpop.f32.mrf.mxu1 }
 0xf40   :  { %v6516_v39 = vrot.slane %v6491_v9, 4  ;;  %8548 = vmatmul.mubr.msk.bf16.vlgmr.msra.gmra.mxu0 %vm6547_vm2, %v6491_v9 }
 0xf41   :  { %v6483_v10 = vpop.f32.mrf.mxu1  ;;  %8569 = vmatprep.mubr.msk.bf16.mxu0 %vm9571_vm13, %v9570_v41 }
 0xf42   :  { %v6517_v43 = vsel %vm157_vm0, %v6515_v19, %v6516_v39  ;;  %v9561_v19 = vld [vmem:[%s12704_s8 + $0x8] sm:$0xff]  }
 0xf43   :  { %v8521_v16 = vpop.f32.mrf.mxu1  ;;  %8533 = vmatprep.mubr.msk.bf16.mxu1 %vm6547_vm2, %v6517_v43 }
 0xf44   :  { %v9557_v16 = vld [vmem:[%s12704_s8 + $0x1c] sm:$0xff]  }
 0xf45   :  { %v6486_v52 = vpop.f32.mrf.mxu1 }
 0xf46   :  { %v6492_v57 = vpack.c.bf16 %v6486_v52, %v6483_v10  ;;  %v9556_v10 = vld [vmem:[%s12704_s8 + $0x24] ss:$0 sps:$4 sm:$0x33]   ;;  %v9558_v52 = vld [vmem:[%s12704_s8 + $0x14] sm:$0xff]  }
 0xf47   :  { %v8522_v24 = vpop.f32.mrf.mxu1  ;;  %v6958_v43 = vsel %vm6956_vm3, %v9556_v10, 0 }
 0xf48   :  { %v6518_v22 = vrot.slane %v6492_v57, 4 }
 0xf4a   :  { %v6519_v33 = vsel %vm157_vm0, %v6516_v39, %v6518_v22  ;;  %v9563_v39 = vld [vmem:[%s12704_s8] sm:$0xff]  }
 0xf4b   :  { %8534 = vmatmul.mubr.msk.bf16.vlgmr.msra.gmra.mxu1 %vm6547_vm2, %v6519_v33 }
 0xf4c   :  { %8552 = vmatpush3.bf16.msra.mxu1 %v6732_v50  ;;  %8561 = vmatprep.mubr.msk.bf16.mxu1 %vm6547_vm2, %v6491_v9  ;;  %v9559_v9 = vld [vmem:[%s12704_s8 + $0x10] ss:$0 sps:$4 sm:$0x33]  }
 0xf4d   :  { %8553 = vmatprep.subr.bf16.mxu1 %v9547_v36  ;;  %v7031_v53 = vsel %vm6956_vm3, %v9559_v9, 0 }
 0xf50   :  { %8554 = vmatpush3.bf16.msra.mxu1 %v9547_v36 }
 0xf51   :  { %8555 = vmatprep.subr.bf16.mxu1 %v9549_v44 }
 0xf54   :  { %8556 = vmatpush3.bf16.msra.mxu1 %v9549_v44 }
 0xf55   :  { %8557 = vmatprep.subr.bf16.mxu1 %v9551_v55 }
 0xf58   :  { %8558 = vmatpush3.bf16.msra.mxu1 %v9551_v55 }
 0xf59   :  { %8559 = vmatprep.subr.bf16.mxu1 %v9552_v14 }
 0xf5c   :  { %8560 = vmatpush3.bf16.msra.mxu1 %v9552_v14 }
 0xf5d   :  { %8639 = vmatprep.subr.msk.bf16.mxu1 %vm6956_vm3, %v9556_v10 }
 0xf5f   :  { %8562 = vmatmul.mubr.msk.bf16.vlgmr.msra.gmra.mxu1 %vm6547_vm2, %v6492_v57  ;;  %v9560_v57 = vld [vmem:[%s12704_s8 + $0x38] ss:$0 sps:$4 sm:$0x33]  }
 0xf60   :  { %8582 = vmatpush3.bf16.msra.mxu1 %v6958_v43  ;;  %v7107_v24 = vsel %vm6956_vm3, %v9560_v57, 0 }
 0xf61   :  { %8583 = vmatprep.subr.bf16.mxu1 %v9557_v16 }
 0xf64   :  { %8584 = vmatpush3.bf16.msra.mxu1 %v9557_v16 }
 0xf65   :  { %8585 = vmatprep.subr.bf16.mxu1 %v9558_v52 }
 0xf68   :  { %8586 = vmatpush3.bf16.msra.mxu1 %v9558_v52 }
 0xf69   :  { %8641 = vmatprep.subr.msk.bf16.mxu1 %vm6956_vm3, %v9560_v57 }
0x1000   :  { %v8549_v27 = vpop.f32.mrf.mxu0 }
0x1002   :  { %v6676_v61 = vpop.f32.mrf.mxu0 }
0x1004   :  { %v8550_v12 = vpop.f32.mrf.mxu0 }
0x1006   :  { %v6679_v42 = vpop.f32.mrf.mxu0 }
0x100b   :  { %v8535_v5 = vpop.f32.mrf.mxu1 }
0x100c   :  { %v6685_v20 = vadd.f32 %v8549_v27, %v8535_v5 }
0x100d   :  { %v6591_v18 = vpop.f32.mrf.mxu1 }
0x100e   :  { %v6677_v17 = vadd.f32 %v6676_v61, %v6591_v18 }
0x100f   :  { %v8536_v37 = vpop.f32.mrf.mxu1 }
0x1010   :  { %v6688_v60 = vadd.f32 %v8550_v12, %v8536_v37 }
0x1011   :  { %v6594_v51 = vpop.f32.mrf.mxu1 }
0x1012   :  { %v6680_v2 = vadd.f32 %v6679_v42, %v6594_v51  ;;  %v7196_v42 = vld [vmem:[%s12705_s25 + $0x8] sm:$0xf] }
0x101f   :  { %v8563_v6 = vpop.f32.mrf.mxu1 }
0x1020   :  { %v6785_v35 = vadd.f32 %v8563_v6, %v6685_v20 }
0x1021   :  { %v6768_v45 = vpop.f32.mrf.mxu1 }
0x1022   :  { %v6783_v63 = vadd.f32 %v6768_v45, %v6677_v17  ;;  %v6796_v49 = vadd.f32 %v8310_v13, %v6785_v35  ;;  %v9562_v45 = vld [vmem:[%s12704_s8 + $0x30] sm:$0xff]  }
0x1023   :  { %v8564_v40 = vpop.f32.mrf.mxu1 }
0x1024   :  { %v6786_v47 = vadd.f32 %v8564_v40, %v6688_v60  ;;  %v6794_v3 = vadd.f32 %v8310_v13, %v6783_v63  ;;  %v6800_v30 = vmax.f32 %v6796_v49, 0.0  ;;  %v9564_v63 = vld [vmem:[%s12704_s8 + $0x28] sm:$0xff]  }
0x1025   :  { %v6771_v29 = vpop.f32.mrf.mxu1 }
0x1026   :  { %v6797_v25 = vadd.f32 %v8310_v13, %v6786_v47  ;;  %v6784_v0 = vadd.f32 %v6771_v29, %v6680_v2  ;;  %v6798_v38 = vmax.f32 %v6794_v3, 0.0 }
0x1028   :  { %v6801_v34 = vmax.f32 %v6797_v25, 0.0  ;;  %v6795_v7 = vadd.f32 %v8310_v13, %v6784_v0 }
0x102a   :  { %v6799_v32 = vmax.f32 %v6795_v7, 0.0  ;;  %v6804_v1 = vmax.f32 %v6800_v30, %v6801_v34 }
0x102c   :  { %v6802_v54 = vmax.f32 %v6798_v38, %v6799_v32  ;;  %v6803_v4 = vmax.f32 %v6799_v32, %v6800_v30  ;;  %6812 = vrot.lane.b32.xlu1 %v6804_v1, %s9566_s2  ;;  %v7195_v38 = vld [vmem:[%s12705_s25] sm:$0xff]  ;;  %s9572_s25 = smov 124  }
0x102e   :  { %v8880_v11 = vpack.i.bf16 %v6803_v4, %v6802_v54 }
0x1030   :  { %8881 = vrot.lane.b32.xlu0 %v8880_v11, %s9566_s2 }
0x109e   :  { %v6813_v15 = vpop.permute.xlu1 %6812 }
0x109f   :  { %v6819_v46 = vmax.f32 %v6804_v1, %v6813_v15 }
0x10a1   :  { %v6827_v21 = vpack.c.bf16 %v6819_v46, %v6819_v46 }
0x10a2   :  { %v8882_v23 = vpop.permute.xlu0 %8881 }
0x10a3   :  { %v6853_v8 = vsel %vm157_vm0, %v6827_v21, 0  ;;  %v8884_v56 = vunpack.i.h.bf16 %v8882_v23  ;;  %v8883_v48 = vunpack.i.l.bf16 %v8882_v23 }
0x10a4   :  { %8566 = vmatpush3.bf16.msra.mxu0 %v6853_v8 }
0x10a5   :  { %v6818_v59 = vmax.f32 %v6803_v4, %v8884_v56  ;;  %v6817_v28 = vmax.f32 %v6802_v54, %v8883_v48  ;;  %8567 = vmatprep.subr.bf16.mxu0 %v9570_v41  ;;  %v8342_v4 = vld [vmem:[%s12706_s16] ss:$0 sm:$0xff] }
0x10a7   :  { %v6826_v26 = vpack.c.bf16 %v6818_v59, %v6817_v28 }
0x10a9   :  { %8568 = vmatpush3.bf16.msra.mxu0 %v6826_v26 }
0x10aa   :  { %8640 = vmatprep.subr.msk.bf16.mxu0 %vm6956_vm3, %v9559_v9 }
0x10ac   :  { %8570 = vmatmul.mubr.msk.bf16.vlgmr.msra.gmra.mxu0 %vm5941_vm14, %v9553_v62 }
0x10ad   :  { %8573 = vmatprep.mubr.msk.bf16.mxu0 %vm9571_vm13, %v9570_v41  ;;  %8592 = vmatpush3.bf16.msra.mxu0 %v7031_v53 }
0x10ae   :  { %8593 = vmatprep.subr.bf16.mxu0 %v9561_v19 }
0x10b1   :  { %8594 = vmatpush3.bf16.msra.mxu0 %v9561_v19 }
0x10b2   :  { %8595 = vmatprep.subr.bf16.mxu0 %v9563_v39 }
0x10b4   :  { %8574 = vmatmul.mubr.msk.bf16.gmra.mxu0 %vm5941_vm14, %v9554_v58 }
0x10b5   :  { %8577 = vmatprep.mubr.msk.bf16.mxu0 %vm9571_vm13, %v9570_v41  ;;  %8596 = vmatpush3.bf16.msra.mxu0 %v9563_v39 }
0x10b6   :  { %8611 = vmatprep.subr.mxu0 %v9570_v41 }
0x10bc   :  { %8578 = vmatmul.mubr.msk.bf16.gmra.mxu0 %vm5941_vm14, %v9555_v31 }
0x116c   :  { %v6889_v22 = vpop.f32.mrf.mxu0 }
0x116e   :  { %v8571_v50 = vpop.f32.mrf.mxu0 }
0x1170   :  { %v6892_v36 = vpop.f32.mrf.mxu0 }
0x1171   :  { %v6912_v33 = vpack.c.bf16 %v6892_v36, %v6889_v22 }
0x1172   :  { %v8572_v44 = vpop.f32.mrf.mxu0 }
0x1173   :  { %8597 = vmatprep.mubr.msk.bf16.mxu0 %vm6949_vm4, %v6912_v33  ;;  %v6929_v37 = vrot.slane %v6912_v33, 4 }
0x1174   :  { %v6897_v55 = vpop.f32.mrf.mxu0 }
0x1176   :  { %v8575_v14 = vpop.f32.mrf.mxu0 }
0x1178   :  { %v6900_v5 = vpop.f32.mrf.mxu0 }
0x1179   :  { %v6913_v18 = vpack.c.bf16 %v6900_v5, %v6897_v55 }
0x117a   :  { %v8576_v27 = vpop.f32.mrf.mxu0 }
0x117b   :  { %v6930_v61 = vrot.slane %v6913_v18, 4  ;;  %8598 = vmatmul.mubr.msk.bf16.vlgmr.msra.gmra.mxu0 %vm6949_vm4, %v6913_v18 }
0x117c   :  { %v6905_v51 = vpop.f32.mrf.mxu0  ;;  %8615 = vmatprep.mubr.msk.f32.mxu0 %vm9571_vm13, %v9570_v41  ;;  %8612 = vmatpush3.msk.msra.mxu0 %vm157_vm0, %v7196_v42 }
0x117d   :  { %v6931_v20 = vsel %vm157_vm0, %v6929_v37, %v6930_v61  ;;  %8613 = vmatprep.subr.mxu0 %v9570_v41 }
0x117e   :  { %v8579_v12 = vpop.f32.mrf.mxu0  ;;  %8587 = vmatprep.mubr.msk.bf16.mxu1 %vm6949_vm4, %v6931_v20  ;;  %8614 = vmatpush3.msra.mxu0 %v7195_v38 }
0x1180   :  { %v6908_v6 = vpop.f32.mrf.mxu0 }
0x1181   :  { %v6914_v17 = vpack.c.bf16 %v6908_v6, %v6905_v51 }
0x1182   :  { %v8580_v35 = vpop.f32.mrf.mxu0 }
0x1183   :  { %v6932_v13 = vrot.slane %v6914_v17, 4 }
0x1185   :  { %v6933_v60 = vsel %vm157_vm0, %v6930_v61, %v6932_v13  ;;  %vm7197_vm0 = vcmask 97280  }
0x1186   :  { %8588 = vmatmul.mubr.msk.bf16.vlgmr.msra.gmra.mxu1 %vm6949_vm4, %v6933_v60 }
0x1187   :  { %8602 = vmatpush3.bf16.msra.mxu1 %v7107_v24  ;;  %8607 = vmatprep.mubr.msk.bf16.mxu1 %vm6949_vm4, %v6913_v18  ;;  %v7290_v24 = vld [vmem:[%s12707_s24] sm:$0xff] }
0x1188   :  { %8603 = vmatprep.subr.bf16.mxu1 %v9562_v45 }
0x118b   :  { %8604 = vmatpush3.bf16.msra.mxu1 %v9562_v45 }
0x118c   :  { %8605 = vmatprep.subr.bf16.mxu1 %v9564_v63 }
0x118f   :  { %8606 = vmatpush3.bf16.msra.mxu1 %v9564_v63 }
0x1192   :  { %8608 = vmatmul.mubr.msk.bf16.vlgmr.msra.gmra.mxu1 %vm6949_vm4, %v6914_v17 }
0x1193   :  { %8630 = vmatprep.mubr.msk.f32.mxu1 %vm5941_vm14, %v7290_v24 }
0x123b   :  { %v8599_v49 = vpop.f32.mrf.mxu0 }
0x123d   :  { %v7067_v29 = vpop.f32.mrf.mxu0 }
0x123f   :  { %v8600_v0 = vpop.f32.mrf.mxu0 }
0x1241   :  { %v7070_v11 = vpop.f32.mrf.mxu0 }
0x1246   :  { %v8589_v40 = vpop.f32.mrf.mxu1 }
0x1247   :  { %v7076_v30 = vadd.f32 %v8599_v49, %v8589_v40 }
0x1248   :  { %v6994_v2 = vpop.f32.mrf.mxu1 }
0x1249   :  { %v7068_v34 = vadd.f32 %v7067_v29, %v6994_v2 }
0x124a   :  { %v8590_v47 = vpop.f32.mrf.mxu1 }
0x124b   :  { %v7079_v1 = vadd.f32 %v8600_v0, %v8590_v47 }
0x124c   :  { %v6997_v3 = vpop.f32.mrf.mxu1 }
0x124d   :  { %v7071_v46 = vadd.f32 %v7070_v11, %v6997_v3 }
0x1252   :  { %v8609_v25 = vpop.f32.mrf.mxu1 }
0x1253   :  { %v7160_v32 = vadd.f32 %v8609_v25, %v7076_v30 }
0x1254   :  { %v7143_v7 = vpop.f32.mrf.mxu1 }
0x1255   :  { %v7158_v54 = vadd.f32 %v7143_v7, %v7068_v34  ;;  %v7171_v8 = vadd.f32 %v8342_v4, %v7160_v32 }
0x1256   :  { %v8610_v15 = vpop.f32.mrf.mxu1 }
0x1257   :  { %v7161_v21 = vadd.f32 %v8610_v15, %v7079_v1  ;;  %v7169_v56 = vadd.f32 %v8342_v4, %v7158_v54  ;;  %v7175_v26 = vmax.f32 %v7171_v8, 0.0 }
0x1258   :  { %v7146_v23 = vpop.f32.mrf.mxu1 }
0x1259   :  { %v7159_v48 = vadd.f32 %v7146_v23, %v7071_v46  ;;  %v7172_v59 = vadd.f32 %v8342_v4, %v7161_v21  ;;  %v7173_v62 = vmax.f32 %v7169_v56, 0.0 }
0x125b   :  { %v7170_v28 = vadd.f32 %v8342_v4, %v7159_v48  ;;  %v7176_v31 = vmax.f32 %v7172_v59, 0.0 }
0x125d   :  { %v7174_v58 = vmax.f32 %v7170_v28, 0.0  ;;  %v7179_v19 = vmax.f32 %v7175_v26, %v7176_v31 }
0x125f   :  { %v7178_v9 = vmax.f32 %v7174_v58, %v7175_v26  ;;  %v7177_v53 = vmax.f32 %v7173_v62, %v7174_v58 }
0x1261   :  { %7185 = vrot.lane.b32.xlu0 %v7178_v9, %s9572_s25  ;;  %7183 = vrot.lane.b32.xlu1 %v7177_v53, %s9572_s25 }
0x1265   :  { %7187 = vrot.lane.b32.xlu1 %v7179_v19, %s9572_s25 }
0x12d3   :  { %v7184_v39 = vpop.permute.xlu1 %7183  ;;  %v7186_v43 = vpop.permute.xlu0 %7185 }
0x12d4   :  { %v7192_v10 = vmax.f32 %v7177_v53, %v7184_v39  ;;  %v7193_v16 = vmax.f32 %v7178_v9, %v7186_v43 }
0x12d6   :  { %8616 = vmatmul.mubr.msk.f32.vlgmr.msra.gmra.mxu0 %vm7197_vm0, %v7192_v10 }
0x12d7   :  { %8618 = vmatprep.mubr.msk.f32.mxu0 %vm9571_vm13, %v9570_v41  ;;  %v7188_v52 = vpop.permute.xlu1 %7187 }
0x12d8   :  { %v7194_v57 = vmax.f32 %v7179_v19, %v7188_v52 }
0x12da   :  { %8619 = vmatmul.mubr.msk.f32.gmra.mxu0 %vm7197_vm0, %v7193_v16 }
0x12db   :  { %8621 = vmatprep.mubr.msk.f32.mxu0 %vm9571_vm13, %v9570_v41  ;;  %v7291_v41 = vld [vmem:[%s12707_s24 + $0x8] sm:$0xff] }
0x12de   :  { %8622 = vmatmul.mubr.msk.f32.gmra.mxu0 %vm7197_vm0, %v7194_v57 }
0x1396   :  { %v7276_v22 = vpop.f32.mrf.mxu0 }
0x1398   :  { %v8617_v50 = vpop.f32.mrf.mxu0 }
0x139a   :  { %v7281_v36 = vpop.f32.mrf.mxu0 }
0x139c   :  { %v8620_v33 = vpop.f32.mrf.mxu0 }
0x139e   :  { %v7286_v44 = vpop.f32.mrf.mxu0 }
0x139f   :  { %8624 = vmatprep.subr.mxu1 %v7286_v44 }
0x13a0   :  { %v8623_v55 = vpop.f32.mrf.mxu0  ;;  %8625 = vmatpush3.msra.mxu1 %v7286_v44 }
0x13a1   :  { %8626 = vmatprep.subr.mxu1 %v7281_v36 }
0x13a2   :  { %8627 = vmatpush3.msra.mxu1 %v7281_v36 }
0x13a3   :  { %8628 = vmatprep.subr.mxu1 %v7276_v22 }
0x13a4   :  { %8629 = vmatpush3.msra.mxu1 %v7276_v22 }
0x13a5   :  { %8631 = vmatmul.mubr.msk.f32.vlgmr.msra.gmra.mxu1 %vm5941_vm14, %v7291_v41 }
0x1465   :  { %v8632_v14 = vpop.f32.mrf.mxu1 }
0x1466   :  { %7374 = vst.msk [vmem:[%s12708_s26 + $0x8] sm:$0xff] %vm1245_vm1, %v8632_v14 }
0x1467   :  { %v7364_v5 = vpop.f32.mrf.mxu1 }
0x1468   :  { %7373 = vst.msk [vmem:[%s12708_s26] sm:$0xff] %vm1245_vm1, %v7364_v5 }

</bundles_post_ra>
